<compile_context>
chip_gen: v6e
topology: v6e:2x2x1
jax: 0.10.0
libtpu: 0.0.40
codegen_flags: <defaults>
</compile_context>

<pallas_src>
import functools
import math

import jax
import jax.numpy as jnp
from jax.experimental import pallas as pl
from jax.experimental.pallas import tpu as pltpu


# ----------------------------------------------------------------------------
# Kernel
# ----------------------------------------------------------------------------
def _spatial_attention_kernel(w_ref, x_ref, o_ref, sum_ref, max_ref, pad_ref, *,
                              n_channels, n_ctiles, kernel_size, pad, height,
                              width):
    """One grid step = one (batch-tile, channel-tile) pair.

    w_ref   : (2*K*K,) f32 in SMEM        -- conv weights, flattened (c, ky, kx)
    x_ref   : (TB, TC, S) in VMEM         -- lane-dense channel tile, S = H*W
    o_ref   : (TB, 1, S) in VMEM          -- attention map (written on last c-tile)
    sum_ref : (TB, S) f32 VMEM scratch    -- running channel sum   (multi-tile only)
    max_ref : (TB, S) f32 VMEM scratch    -- running channel max   (multi-tile only)
    pad_ref : (2, TB, H+2p, W+2p) f32     -- zero-padded pooled maps for SAME conv
    """
    H, W, K = height, width, kernel_size
    TB = o_ref.shape[0]
    S = o_ref.shape[2]

    def finalize(sum_val, max_val):
        # (TB, S) lane-dense accumulators -> (TB, H, W) for the spatial conv.
        avg = (sum_val * (1.0 / float(n_channels))).reshape(TB, H, W)
        mx = max_val.reshape(TB, H, W)

        # Zero only the halo (the interior is fully overwritten below).  Done
        # every finalize so correctness does not depend on which core / grid
        # order touches this persistent scratch first.
        pad_ref[:, :, :pad, :] = jnp.zeros((2, TB, pad, W + 2 * pad), jnp.float32)
        pad_ref[:, :, pad + H:, :] = jnp.zeros((2, TB, pad, W + 2 * pad), jnp.float32)
        pad_ref[:, :, :, :pad] = jnp.zeros((2, TB, H + 2 * pad, pad), jnp.float32)
        pad_ref[:, :, :, pad + W:] = jnp.zeros((2, TB, H + 2 * pad, pad), jnp.float32)
        pad_ref[0, :, pad:pad + H, pad:pad + W] = avg
        pad_ref[1, :, pad:pad + H, pad:pad + W] = mx

        # 2->1 channel KxK SAME conv on the VPU (MXU has nothing to do here).
        # Hoist the lane shifts: one dx-shifted copy per (channel, dx) = 2*K lane
        # shifts; the dy loop then only takes cheap sublane-offset slices.
        acc = jnp.zeros((TB, H, W), jnp.float32)
        for cc in range(2):                              # pooled channels (avg, max)
            full = pad_ref[cc]                           # (TB, H+2p, W+2p)
            for dx in range(K):
                col = full[:, :, dx:dx + W]              # lane shift (once per cc,dx)
                for dy in range(K):
                    wv = w_ref[cc * K * K + dy * K + dx]  # SMEM scalar
                    acc = acc + wv * col[:, dy:dy + H, :]

        # sigmoid in f32 (exp lands on the EUP slot), store lane-dense.
        out = 1.0 / (1.0 + jnp.exp(-acc))
        o_ref[...] = out.reshape(TB, 1, S).astype(o_ref.dtype)

    # ---- channel reduction for this tile (VPU/XLU, no Python unroll) ----
    xt = x_ref[...].astype(jnp.float32)                  # (TB, TC, S)
    tile_sum = jnp.sum(xt, axis=1)                       # (TB, S)
    tile_max = jnp.max(xt, axis=1)                       # (TB, S)

    if n_ctiles == 1:
        # Whole channel reduction fits in one tile: single pass, no scratch
        # round-trip, no pl.when.
        finalize(tile_sum, tile_max)
    else:
        c_idx = pl.program_id(1)

        @pl.when(c_idx == 0)
        def _init():
            sum_ref[...] = jnp.zeros_like(sum_ref)
            max_ref[...] = jnp.full_like(max_ref, -jnp.inf)

        sum_ref[...] = sum_ref[...] + tile_sum
        max_ref[...] = jnp.maximum(max_ref[...], tile_max)

        @pl.when(c_idx == n_ctiles - 1)
        def _final():
            finalize(sum_ref[...], max_ref[...])


# ----------------------------------------------------------------------------
# Tile selection
# ----------------------------------------------------------------------------
def _largest_divisor_leq(n, cap, multiple_of=1):
    cap = max(1, min(n, cap))
    for d in range(cap, 0, -1):
        if n % d == 0 and d % multiple_of == 0:
            return d
    return None


def _pick_tiles(B, C, S, itemsize, budget_bytes=8 << 20):
    """Pick (TB, TC) so the (TB, TC, S) input block is ~budget_bytes.

    Pallas double-buffers the input block, so ~2x this lands in VMEM; with the
    32 MiB vmem limit this is safe on v5e / v6e / v7x.
    """
    chan_bytes = S * itemsize
    max_c = max(1, budget_bytes // chan_bytes)
    if C <= max_c:
        # Whole channel reduction fits in one tile -> single pass over channels;
        # additionally block batch elements, but keep >= 2 parallel grid steps
        # when possible so both v7x TensorCores get work.
        TC = C
        max_b = max(1, budget_bytes // max(1, C * chan_bytes))
        if B >= 2:
            max_b = min(max_b, B // 2)
        TB = _largest_divisor_leq(B, max_b) or 1
    else:
        TB = 1
        # Channel tile must be a multiple of 8 (sublane rule) unless it equals C.
        TC = _largest_divisor_leq(C, max_c, multiple_of=8)
        if TC is None:
            TC = C   # fallback for awkward C; may exceed the budget.
    return TB, TC


# ----------------------------------------------------------------------------
# Wrapper
# ----------------------------------------------------------------------------
@functools.partial(jax.jit, static_argnames=("kernel_size",))
def spatial_attention_forward(x, weight, kernel_size=7):
    """x: (B, C, H, W), weight: (1, 2, K, K) (PyTorch OIHW, no bias) -> (B, 1, H, W)."""
    assert kernel_size in (3, 7), "kernel size must be 3 or 7"
    pad = 3 if kernel_size == 7 else 1
    B, C, H, W = x.shape
    S = H * W

    # Lane-dense spatial axis: free reshape, channels are contiguous in NCHW.
    x2 = x.reshape(B, C, S)
    w_flat = weight.reshape(-1).astype(jnp.float32)            # (2*K*K,)

    TB, TC = _pick_tiles(B, C, S, x.dtype.itemsize)
    grid = (B // TB, C // TC)
    n_ctiles = grid[1]

    kernel = functools.partial(
        _spatial_attention_kernel,
        n_channels=C, n_ctiles=n_ctiles, kernel_size=kernel_size,
        pad=pad, height=H, width=W)

    flops = int(B * (2 * C * S + 2 * 2 * kernel_size * kernel_size * S))
    bytes_accessed = int(x.size * x.dtype.itemsize
                         + B * S * x.dtype.itemsize + w_flat.size * 4)
    cost = pl.CostEstimate(flops=flops, transcendentals=int(B * S),
                           bytes_accessed=bytes_accessed)

    out = pl.pallas_call(
        kernel,
        out_shape=jax.ShapeDtypeStruct((B, 1, S), x.dtype),
        grid=grid,
        in_specs=[
            pl.BlockSpec(memory_space=pltpu.MemorySpace.SMEM),        # conv weights
            pl.BlockSpec((TB, TC, S), lambda b, c: (b, c, 0)),        # lane-dense x tile
        ],
        out_specs=pl.BlockSpec((TB, 1, S), lambda b, c: (b, 0, 0)),
        scratch_shapes=[
            pltpu.VMEM((TB, S), jnp.float32),                         # running sum
            pltpu.VMEM((TB, S), jnp.float32),                         # running max
            pltpu.VMEM((2, TB, H + 2 * pad, W + 2 * pad), jnp.float32),  # padded pooled maps
        ],
        compiler_params=pltpu.CompilerParams(
            dimension_semantics=("parallel", "arbitrary"),
            vmem_limit_bytes=32 * 1024 * 1024),
        cost_estimate=cost,
    )(w_flat, x2)

    return out.reshape(B, 1, H, W)


# ----------------------------------------------------------------------------
# Pure-JAX reference (mirrors the torch ops exactly)
# ----------------------------------------------------------------------------
def reference_spatial_attention(x, weight, kernel_size=7):
    pad = 3 if kernel_size == 7 else 1
    avg_out = jnp.mean(x, axis=1, keepdims=True)
    max_out = jnp.max(x, axis=1, keepdims=True)
    pooled = jnp.concatenate([avg_out, max_out], axis=1)       # (B, 2, H, W)
    y = jax.lax.conv_general_dilated(
        pooled, weight, window_strides=(1, 1),
        padding=((pad, pad), (pad, pad)),
        dimension_numbers=("NCHW", "OIHW", "NCHW"))
    return jax.nn.sigmoid(y)


# ----------------------------------------------------------------------------
if __name__ == "__main__":
    B, C, H, W = 2, 4, 16, 16
    kernel_size = 7

    key = jax.random.PRNGKey(0)
    kx, kw = jax.random.split(key)
    x = jax.random.normal(kx, (B, C, H, W), jnp.float32)
    # PyTorch Conv2d(2, 1, 7, padding=3, bias=False) weight: (1, 2, 7, 7)
    fan_in = 2 * kernel_size * kernel_size
    bound = 1.0 / math.sqrt(fan_in)
    weight = jax.random.uniform(kw, (1, 2, kernel_size, kernel_size),
                                jnp.float32, -bound, bound)

    out = spatial_attention_forward(x, weight, kernel_size=kernel_size)
    out = jax.block_until_ready(out)

    ref = reference_spatial_attention(x, weight, kernel_size)
    assert out.shape == (B, 1, H, W)
    err = jnp.max(jnp.abs(out - ref))
    assert jnp.allclose(out, ref, atol=1e-5, rtol=1e-5), f"max err {err}"
    print("KERNEL_OK")
</pallas_src>

<mosaic_0001>
module attributes {stable_mosaic.version = 11 : i64} {
  func.func @_spatial_attention_kernel(%arg0: i32, %arg1: i32, %arg2: memref<98xf32, #tpu.memory_space<smem>>, %arg3: memref<1x4x256xf32, #tpu.memory_space<vmem>>, %arg4: memref<1x1x256xf32, #tpu.memory_space<vmem>>, %arg5: memref<1x256xf32, #tpu.memory_space<vmem>>, %arg6: memref<1x256xf32, #tpu.memory_space<vmem>>, %arg7: memref<2x1x22x22xf32, #tpu.memory_space<vmem>>) attributes {dimension_semantics = [#tpu.dimension_semantics<parallel>, #tpu.dimension_semantics<arbitrary>], iteration_bounds = array<i64: 2, 1>, scalar_prefetch = 0 : i64, scratch_operands = 3 : i64, tpu.core_type = #tpu.core_type<tc>, window_params = [{transform_indices = @transform_0, window_bounds = array<i64: 98>}, {transform_indices = @transform_1, window_bounds = array<i64: 1, 4, 256>}, {transform_indices = @transform_2, window_bounds = array<i64: 1, 1, 256>}]} {
    %c0 = arith.constant 0 : index
    %c0_0 = arith.constant 0 : index
    %c0_1 = arith.constant 0 : index
    %0 = vector.load %arg3[%c0, %c0_0, %c0_1] : memref<1x4x256xf32, #tpu.memory_space<vmem>>, vector<1x4x256xf32>
    %cst = arith.constant dense<0.000000e+00> : vector<1x256xf32>
    %1 = vector.multi_reduction <add>, %0, %cst [1] : vector<1x4x256xf32> to vector<1x256xf32>
    %cst_2 = arith.constant dense<0xFF800000> : vector<1x256xf32>
    %2 = vector.multi_reduction <maximumf>, %0, %cst_2 [1] : vector<1x4x256xf32> to vector<1x256xf32>
    %cst_3 = arith.constant 2.500000e-01 : f32
    %3 = vector.broadcast %cst_3 : f32 to vector<1x256xf32>
    %4 = arith.mulf %1, %3 : vector<1x256xf32>
    %5 = vector.shape_cast %4 : vector<1x256xf32> to vector<1x16x16xf32>
    %6 = vector.shape_cast %2 : vector<1x256xf32> to vector<1x16x16xf32>
    %cst_4 = arith.constant 0.000000e+00 : f32
    %7 = vector.broadcast %cst_4 : f32 to vector<2x1x3x22xf32>
    %c0_5 = arith.constant 0 : index
    %c0_6 = arith.constant 0 : index
    %c0_7 = arith.constant 0 : index
    %c0_8 = arith.constant 0 : index
    %8 = vector.load %arg7[%c0_5, %c0_6, %c0_7, %c0_8] : memref<2x1x22x22xf32, #tpu.memory_space<vmem>>, vector<2x1x3x22xf32>
    tpu.vector_store %arg7[%c0_5, %c0_6, %c0_7, %c0_8], %7 {strides = array<i32>} : memref<2x1x22x22xf32, #tpu.memory_space<vmem>>, vector<2x1x3x22xf32>,
    %cst_9 = arith.constant 0.000000e+00 : f32
    %9 = vector.broadcast %cst_9 : f32 to vector<2x1x3x22xf32>
    %c0_10 = arith.constant 0 : index
    %c0_11 = arith.constant 0 : index
    %c19 = arith.constant 19 : index
    %c0_12 = arith.constant 0 : index
    %10 = vector.load %arg7[%c0_10, %c0_11, %c19, %c0_12] : memref<2x1x22x22xf32, #tpu.memory_space<vmem>>, vector<2x1x3x22xf32>
    tpu.vector_store %arg7[%c0_10, %c0_11, %c19, %c0_12], %9 {strides = array<i32>} : memref<2x1x22x22xf32, #tpu.memory_space<vmem>>, vector<2x1x3x22xf32>,
    %cst_13 = arith.constant 0.000000e+00 : f32
    %11 = vector.broadcast %cst_13 : f32 to vector<2x1x22x3xf32>
    %c0_14 = arith.constant 0 : index
    %c0_15 = arith.constant 0 : index
    %c0_16 = arith.constant 0 : index
    %c0_17 = arith.constant 0 : index
    %12 = vector.load %arg7[%c0_14, %c0_15, %c0_16, %c0_17] : memref<2x1x22x22xf32, #tpu.memory_space<vmem>>, vector<2x1x22x3xf32>
    tpu.vector_store %arg7[%c0_14, %c0_15, %c0_16, %c0_17], %11 {strides = array<i32>} : memref<2x1x22x22xf32, #tpu.memory_space<vmem>>, vector<2x1x22x3xf32>,
    %cst_18 = arith.constant 0.000000e+00 : f32
    %13 = vector.broadcast %cst_18 : f32 to vector<2x1x22x3xf32>
    %c0_19 = arith.constant 0 : index
    %c0_20 = arith.constant 0 : index
    %c0_21 = arith.constant 0 : index
    %c19_22 = arith.constant 19 : index
    %14 = vector.load %arg7[%c0_19, %c0_20, %c0_21, %c19_22] : memref<2x1x22x22xf32, #tpu.memory_space<vmem>>, vector<2x1x22x3xf32>
    tpu.vector_store %arg7[%c0_19, %c0_20, %c0_21, %c19_22], %13 {strides = array<i32>} : memref<2x1x22x22xf32, #tpu.memory_space<vmem>>, vector<2x1x22x3xf32>,
    %c0_23 = arith.constant 0 : index
    %c0_24 = arith.constant 0 : index
    %c3 = arith.constant 3 : index
    %c3_25 = arith.constant 3 : index
    %15 = vector.load %arg7[%c0_23, %c0_24, %c3, %c3_25] : memref<2x1x22x22xf32, #tpu.memory_space<vmem>>, vector<1x1x16x16xf32>
    %16 = vector.shape_cast %15 : vector<1x1x16x16xf32> to vector<1x16x16xf32>
    %17 = vector.shape_cast %5 : vector<1x16x16xf32> to vector<1x1x16x16xf32>
    tpu.vector_store %arg7[%c0_23, %c0_24, %c3, %c3_25], %17 {strides = array<i32>} : memref<2x1x22x22xf32, #tpu.memory_space<vmem>>, vector<1x1x16x16xf32>,
    %c1 = arith.constant 1 : index
    %c0_26 = arith.constant 0 : index
    %c3_27 = arith.constant 3 : index
    %c3_28 = arith.constant 3 : index
    %18 = vector.load %arg7[%c1, %c0_26, %c3_27, %c3_28] : memref<2x1x22x22xf32, #tpu.memory_space<vmem>>, vector<1x1x16x16xf32>
    %19 = vector.shape_cast %18 : vector<1x1x16x16xf32> to vector<1x16x16xf32>
    %20 = vector.shape_cast %6 : vector<1x16x16xf32> to vector<1x1x16x16xf32>
    tpu.vector_store %arg7[%c1, %c0_26, %c3_27, %c3_28], %20 {strides = array<i32>} : memref<2x1x22x22xf32, #tpu.memory_space<vmem>>, vector<1x1x16x16xf32>,
    %cst_29 = arith.constant 0.000000e+00 : f32
    %21 = vector.broadcast %cst_29 : f32 to vector<1x16x16xf32>
    %c0_30 = arith.constant 0 : index
    %c0_31 = arith.constant 0 : index
    %c0_32 = arith.constant 0 : index
    %c0_33 = arith.constant 0 : index
    %22 = vector.load %arg7[%c0_30, %c0_31, %c0_32, %c0_33] : memref<2x1x22x22xf32, #tpu.memory_space<vmem>>, vector<1x1x22x22xf32>
    %23 = vector.shape_cast %22 : vector<1x1x22x22xf32> to vector<1x22x22xf32>
    %24 = vector.extract_strided_slice %23 {offsets = [0, 0, 0], sizes = [1, 22, 16], strides = [1, 1, 1]} : vector<1x22x22xf32> to vector<1x22x16xf32>
    %c0_34 = arith.constant 0 : index
    %25 = memref.load %arg2[%c0_34] : memref<98xf32, #tpu.memory_space<smem>>
    %26 = vector.extract_strided_slice %24 {offsets = [0, 0, 0], sizes = [1, 16, 16], strides = [1, 1, 1]} : vector<1x22x16xf32> to vector<1x16x16xf32>
    %27 = vector.broadcast %25 : f32 to vector<1x16x16xf32>
    %28 = arith.mulf %27, %26 : vector<1x16x16xf32>
    %29 = arith.addf %21, %28 : vector<1x16x16xf32>
    %c7 = arith.constant 7 : index
    %30 = memref.load %arg2[%c7] : memref<98xf32, #tpu.memory_space<smem>>
    %31 = vector.extract_strided_slice %24 {offsets = [0, 1, 0], sizes = [1, 16, 16], strides = [1, 1, 1]} : vector<1x22x16xf32> to vector<1x16x16xf32>
    %32 = vector.broadcast %30 : f32 to vector<1x16x16xf32>
    %33 = arith.mulf %32, %31 : vector<1x16x16xf32>
    %34 = arith.addf %29, %33 : vector<1x16x16xf32>
    %c14 = arith.constant 14 : index
    %35 = memref.load %arg2[%c14] : memref<98xf32, #tpu.memory_space<smem>>
    %36 = vector.extract_strided_slice %24 {offsets = [0, 2, 0], sizes = [1, 16, 16], strides = [1, 1, 1]} : vector<1x22x16xf32> to vector<1x16x16xf32>
    %37 = vector.broadcast %35 : f32 to vector<1x16x16xf32>
    %38 = arith.mulf %37, %36 : vector<1x16x16xf32>
    %39 = arith.addf %34, %38 : vector<1x16x16xf32>
    %c21 = arith.constant 21 : index
    %40 = memref.load %arg2[%c21] : memref<98xf32, #tpu.memory_space<smem>>
    %41 = vector.extract_strided_slice %24 {offsets = [0, 3, 0], sizes = [1, 16, 16], strides = [1, 1, 1]} : vector<1x22x16xf32> to vector<1x16x16xf32>
    %42 = vector.broadcast %40 : f32 to vector<1x16x16xf32>
    %43 = arith.mulf %42, %41 : vector<1x16x16xf32>
    %44 = arith.addf %39, %43 : vector<1x16x16xf32>
    %c28 = arith.constant 28 : index
    %45 = memref.load %arg2[%c28] : memref<98xf32, #tpu.memory_space<smem>>
    %46 = vector.extract_strided_slice %24 {offsets = [0, 4, 0], sizes = [1, 16, 16], strides = [1, 1, 1]} : vector<1x22x16xf32> to vector<1x16x16xf32>
    %47 = vector.broadcast %45 : f32 to vector<1x16x16xf32>
    %48 = arith.mulf %47, %46 : vector<1x16x16xf32>
    %49 = arith.addf %44, %48 : vector<1x16x16xf32>
    %c35 = arith.constant 35 : index
    %50 = memref.load %arg2[%c35] : memref<98xf32, #tpu.memory_space<smem>>
    %51 = vector.extract_strided_slice %24 {offsets = [0, 5, 0], sizes = [1, 16, 16], strides = [1, 1, 1]} : vector<1x22x16xf32> to vector<1x16x16xf32>
    %52 = vector.broadcast %50 : f32 to vector<1x16x16xf32>
    %53 = arith.mulf %52, %51 : vector<1x16x16xf32>
    %54 = arith.addf %49, %53 : vector<1x16x16xf32>
    %c42 = arith.constant 42 : index
    %55 = memref.load %arg2[%c42] : memref<98xf32, #tpu.memory_space<smem>>
    %56 = vector.extract_strided_slice %24 {offsets = [0, 6, 0], sizes = [1, 16, 16], strides = [1, 1, 1]} : vector<1x22x16xf32> to vector<1x16x16xf32>
    %57 = vector.broadcast %55 : f32 to vector<1x16x16xf32>
    %58 = arith.mulf %57, %56 : vector<1x16x16xf32>
    %59 = arith.addf %54, %58 : vector<1x16x16xf32>
    %60 = vector.extract_strided_slice %23 {offsets = [0, 0, 1], sizes = [1, 22, 16], strides = [1, 1, 1]} : vector<1x22x22xf32> to vector<1x22x16xf32>
    %c1_35 = arith.constant 1 : index
    %61 = memref.load %arg2[%c1_35] : memref<98xf32, #tpu.memory_space<smem>>
    %62 = vector.extract_strided_slice %60 {offsets = [0, 0, 0], sizes = [1, 16, 16], strides = [1, 1, 1]} : vector<1x22x16xf32> to vector<1x16x16xf32>
    %63 = vector.broadcast %61 : f32 to vector<1x16x16xf32>
    %64 = arith.mulf %63, %62 : vector<1x16x16xf32>
    %65 = arith.addf %59, %64 : vector<1x16x16xf32>
    %c8 = arith.constant 8 : index
    %66 = memref.load %arg2[%c8] : memref<98xf32, #tpu.memory_space<smem>>
    %67 = vector.extract_strided_slice %60 {offsets = [0, 1, 0], sizes = [1, 16, 16], strides = [1, 1, 1]} : vector<1x22x16xf32> to vector<1x16x16xf32>
    %68 = vector.broadcast %66 : f32 to vector<1x16x16xf32>
    %69 = arith.mulf %68, %67 : vector<1x16x16xf32>
    %70 = arith.addf %65, %69 : vector<1x16x16xf32>
    %c15 = arith.constant 15 : index
    %71 = memref.load %arg2[%c15] : memref<98xf32, #tpu.memory_space<smem>>
    %72 = vector.extract_strided_slice %60 {offsets = [0, 2, 0], sizes = [1, 16, 16], strides = [1, 1, 1]} : vector<1x22x16xf32> to vector<1x16x16xf32>
    %73 = vector.broadcast %71 : f32 to vector<1x16x16xf32>
    %74 = arith.mulf %73, %72 : vector<1x16x16xf32>
    %75 = arith.addf %70, %74 : vector<1x16x16xf32>
    %c22 = arith.constant 22 : index
    %76 = memref.load %arg2[%c22] : memref<98xf32, #tpu.memory_space<smem>>
    %77 = vector.extract_strided_slice %60 {offsets = [0, 3, 0], sizes = [1, 16, 16], strides = [1, 1, 1]} : vector<1x22x16xf32> to vector<1x16x16xf32>
    %78 = vector.broadcast %76 : f32 to vector<1x16x16xf32>
    %79 = arith.mulf %78, %77 : vector<1x16x16xf32>
    %80 = arith.addf %75, %79 : vector<1x16x16xf32>
    %c29 = arith.constant 29 : index
    %81 = memref.load %arg2[%c29] : memref<98xf32, #tpu.memory_space<smem>>
    %82 = vector.extract_strided_slice %60 {offsets = [0, 4, 0], sizes = [1, 16, 16], strides = [1, 1, 1]} : vector<1x22x16xf32> to vector<1x16x16xf32>
    %83 = vector.broadcast %81 : f32 to vector<1x16x16xf32>
    %84 = arith.mulf %83, %82 : vector<1x16x16xf32>
    %85 = arith.addf %80, %84 : vector<1x16x16xf32>
    %c36 = arith.constant 36 : index
    %86 = memref.load %arg2[%c36] : memref<98xf32, #tpu.memory_space<smem>>
    %87 = vector.extract_strided_slice %60 {offsets = [0, 5, 0], sizes = [1, 16, 16], strides = [1, 1, 1]} : vector<1x22x16xf32> to vector<1x16x16xf32>
    %88 = vector.broadcast %86 : f32 to vector<1x16x16xf32>
    %89 = arith.mulf %88, %87 : vector<1x16x16xf32>
    %90 = arith.addf %85, %89 : vector<1x16x16xf32>
    %c43 = arith.constant 43 : index
    %91 = memref.load %arg2[%c43] : memref<98xf32, #tpu.memory_space<smem>>
    %92 = vector.extract_strided_slice %60 {offsets = [0, 6, 0], sizes = [1, 16, 16], strides = [1, 1, 1]} : vector<1x22x16xf32> to vector<1x16x16xf32>
    %93 = vector.broadcast %91 : f32 to vector<1x16x16xf32>
    %94 = arith.mulf %93, %92 : vector<1x16x16xf32>
    %95 = arith.addf %90, %94 : vector<1x16x16xf32>
    %96 = vector.extract_strided_slice %23 {offsets = [0, 0, 2], sizes = [1, 22, 16], strides = [1, 1, 1]} : vector<1x22x22xf32> to vector<1x22x16xf32>
    %c2 = arith.constant 2 : index
    %97 = memref.load %arg2[%c2] : memref<98xf32, #tpu.memory_space<smem>>
    %98 = vector.extract_strided_slice %96 {offsets = [0, 0, 0], sizes = [1, 16, 16], strides = [1, 1, 1]} : vector<1x22x16xf32> to vector<1x16x16xf32>
    %99 = vector.broadcast %97 : f32 to vector<1x16x16xf32>
    %100 = arith.mulf %99, %98 : vector<1x16x16xf32>
    %101 = arith.addf %95, %100 : vector<1x16x16xf32>
    %c9 = arith.constant 9 : index
    %102 = memref.load %arg2[%c9] : memref<98xf32, #tpu.memory_space<smem>>
    %103 = vector.extract_strided_slice %96 {offsets = [0, 1, 0], sizes = [1, 16, 16], strides = [1, 1, 1]} : vector<1x22x16xf32> to vector<1x16x16xf32>
    %104 = vector.broadcast %102 : f32 to vector<1x16x16xf32>
    %105 = arith.mulf %104, %103 : vector<1x16x16xf32>
    %106 = arith.addf %101, %105 : vector<1x16x16xf32>
    %c16 = arith.constant 16 : index
    %107 = memref.load %arg2[%c16] : memref<98xf32, #tpu.memory_space<smem>>
    %108 = vector.extract_strided_slice %96 {offsets = [0, 2, 0], sizes = [1, 16, 16], strides = [1, 1, 1]} : vector<1x22x16xf32> to vector<1x16x16xf32>
    %109 = vector.broadcast %107 : f32 to vector<1x16x16xf32>
    %110 = arith.mulf %109, %108 : vector<1x16x16xf32>
    %111 = arith.addf %106, %110 : vector<1x16x16xf32>
    %c23 = arith.constant 23 : index
    %112 = memref.load %arg2[%c23] : memref<98xf32, #tpu.memory_space<smem>>
    %113 = vector.extract_strided_slice %96 {offsets = [0, 3, 0], sizes = [1, 16, 16], strides = [1, 1, 1]} : vector<1x22x16xf32> to vector<1x16x16xf32>
    %114 = vector.broadcast %112 : f32 to vector<1x16x16xf32>
    %115 = arith.mulf %114, %113 : vector<1x16x16xf32>
    %116 = arith.addf %111, %115 : vector<1x16x16xf32>
    %c30 = arith.constant 30 : index
    %117 = memref.load %arg2[%c30] : memref<98xf32, #tpu.memory_space<smem>>
    %118 = vector.extract_strided_slice %96 {offsets = [0, 4, 0], sizes = [1, 16, 16], strides = [1, 1, 1]} : vector<1x22x16xf32> to vector<1x16x16xf32>
    %119 = vector.broadcast %117 : f32 to vector<1x16x16xf32>
    %120 = arith.mulf %119, %118 : vector<1x16x16xf32>
    %121 = arith.addf %116, %120 : vector<1x16x16xf32>
    %c37 = arith.constant 37 : index
    %122 = memref.load %arg2[%c37] : memref<98xf32, #tpu.memory_space<smem>>
    %123 = vector.extract_strided_slice %96 {offsets = [0, 5, 0], sizes = [1, 16, 16], strides = [1, 1, 1]} : vector<1x22x16xf32> to vector<1x16x16xf32>
    %124 = vector.broadcast %122 : f32 to vector<1x16x16xf32>
    %125 = arith.mulf %124, %123 : vector<1x16x16xf32>
    %126 = arith.addf %121, %125 : vector<1x16x16xf32>
    %c44 = arith.constant 44 : index
    %127 = memref.load %arg2[%c44] : memref<98xf32, #tpu.memory_space<smem>>
    %128 = vector.extract_strided_slice %96 {offsets = [0, 6, 0], sizes = [1, 16, 16], strides = [1, 1, 1]} : vector<1x22x16xf32> to vector<1x16x16xf32>
    %129 = vector.broadcast %127 : f32 to vector<1x16x16xf32>
    %130 = arith.mulf %129, %128 : vector<1x16x16xf32>
    %131 = arith.addf %126, %130 : vector<1x16x16xf32>
    %132 = vector.extract_strided_slice %23 {offsets = [0, 0, 3], sizes = [1, 22, 16], strides = [1, 1, 1]} : vector<1x22x22xf32> to vector<1x22x16xf32>
    %c3_36 = arith.constant 3 : index
    %133 = memref.load %arg2[%c3_36] : memref<98xf32, #tpu.memory_space<smem>>
    %134 = vector.extract_strided_slice %132 {offsets = [0, 0, 0], sizes = [1, 16, 16], strides = [1, 1, 1]} : vector<1x22x16xf32> to vector<1x16x16xf32>
    %135 = vector.broadcast %133 : f32 to vector<1x16x16xf32>
    %136 = arith.mulf %135, %134 : vector<1x16x16xf32>
    %137 = arith.addf %131, %136 : vector<1x16x16xf32>
    %c10 = arith.constant 10 : index
    %138 = memref.load %arg2[%c10] : memref<98xf32, #tpu.memory_space<smem>>
    %139 = vector.extract_strided_slice %132 {offsets = [0, 1, 0], sizes = [1, 16, 16], strides = [1, 1, 1]} : vector<1x22x16xf32> to vector<1x16x16xf32>
    %140 = vector.broadcast %138 : f32 to vector<1x16x16xf32>
    %141 = arith.mulf %140, %139 : vector<1x16x16xf32>
    %142 = arith.addf %137, %141 : vector<1x16x16xf32>
    %c17 = arith.constant 17 : index
    %143 = memref.load %arg2[%c17] : memref<98xf32, #tpu.memory_space<smem>>
    %144 = vector.extract_strided_slice %132 {offsets = [0, 2, 0], sizes = [1, 16, 16], strides = [1, 1, 1]} : vector<1x22x16xf32> to vector<1x16x16xf32>
    %145 = vector.broadcast %143 : f32 to vector<1x16x16xf32>
    %146 = arith.mulf %145, %144 : vector<1x16x16xf32>
    %147 = arith.addf %142, %146 : vector<1x16x16xf32>
    %c24 = arith.constant 24 : index
    %148 = memref.load %arg2[%c24] : memref<98xf32, #tpu.memory_space<smem>>
    %149 = vector.extract_strided_slice %132 {offsets = [0, 3, 0], sizes = [1, 16, 16], strides = [1, 1, 1]} : vector<1x22x16xf32> to vector<1x16x16xf32>
    %150 = vector.broadcast %148 : f32 to vector<1x16x16xf32>
    %151 = arith.mulf %150, %149 : vector<1x16x16xf32>
    %152 = arith.addf %147, %151 : vector<1x16x16xf32>
    %c31 = arith.constant 31 : index
    %153 = memref.load %arg2[%c31] : memref<98xf32, #tpu.memory_space<smem>>
    %154 = vector.extract_strided_slice %132 {offsets = [0, 4, 0], sizes = [1, 16, 16], strides = [1, 1, 1]} : vector<1x22x16xf32> to vector<1x16x16xf32>
    %155 = vector.broadcast %153 : f32 to vector<1x16x16xf32>
    %156 = arith.mulf %155, %154 : vector<1x16x16xf32>
    %157 = arith.addf %152, %156 : vector<1x16x16xf32>
    %c38 = arith.constant 38 : index
    %158 = memref.load %arg2[%c38] : memref<98xf32, #tpu.memory_space<smem>>
    %159 = vector.extract_strided_slice %132 {offsets = [0, 5, 0], sizes = [1, 16, 16], strides = [1, 1, 1]} : vector<1x22x16xf32> to vector<1x16x16xf32>
    %160 = vector.broadcast %158 : f32 to vector<1x16x16xf32>
    %161 = arith.mulf %160, %159 : vector<1x16x16xf32>
    %162 = arith.addf %157, %161 : vector<1x16x16xf32>
    %c45 = arith.constant 45 : index
    %163 = memref.load %arg2[%c45] : memref<98xf32, #tpu.memory_space<smem>>
    %164 = vector.extract_strided_slice %132 {offsets = [0, 6, 0], sizes = [1, 16, 16], strides = [1, 1, 1]} : vector<1x22x16xf32> to vector<1x16x16xf32>
    %165 = vector.broadcast %163 : f32 to vector<1x16x16xf32>
    %166 = arith.mulf %165, %164 : vector<1x16x16xf32>
    %167 = arith.addf %162, %166 : vector<1x16x16xf32>
    %168 = vector.extract_strided_slice %23 {offsets = [0, 0, 4], sizes = [1, 22, 16], strides = [1, 1, 1]} : vector<1x22x22xf32> to vector<1x22x16xf32>
    %c4 = arith.constant 4 : index
    %169 = memref.load %arg2[%c4] : memref<98xf32, #tpu.memory_space<smem>>
    %170 = vector.extract_strided_slice %168 {offsets = [0, 0, 0], sizes = [1, 16, 16], strides = [1, 1, 1]} : vector<1x22x16xf32> to vector<1x16x16xf32>
    %171 = vector.broadcast %169 : f32 to vector<1x16x16xf32>
    %172 = arith.mulf %171, %170 : vector<1x16x16xf32>
    %173 = arith.addf %167, %172 : vector<1x16x16xf32>
    %c11 = arith.constant 11 : index
    %174 = memref.load %arg2[%c11] : memref<98xf32, #tpu.memory_space<smem>>
    %175 = vector.extract_strided_slice %168 {offsets = [0, 1, 0], sizes = [1, 16, 16], strides = [1, 1, 1]} : vector<1x22x16xf32> to vector<1x16x16xf32>
    %176 = vector.broadcast %174 : f32 to vector<1x16x16xf32>
    %177 = arith.mulf %176, %175 : vector<1x16x16xf32>
    %178 = arith.addf %173, %177 : vector<1x16x16xf32>
    %c18 = arith.constant 18 : index
    %179 = memref.load %arg2[%c18] : memref<98xf32, #tpu.memory_space<smem>>
    %180 = vector.extract_strided_slice %168 {offsets = [0, 2, 0], sizes = [1, 16, 16], strides = [1, 1, 1]} : vector<1x22x16xf32> to vector<1x16x16xf32>
    %181 = vector.broadcast %179 : f32 to vector<1x16x16xf32>
    %182 = arith.mulf %181, %180 : vector<1x16x16xf32>
    %183 = arith.addf %178, %182 : vector<1x16x16xf32>
    %c25 = arith.constant 25 : index
    %184 = memref.load %arg2[%c25] : memref<98xf32, #tpu.memory_space<smem>>
    %185 = vector.extract_strided_slice %168 {offsets = [0, 3, 0], sizes = [1, 16, 16], strides = [1, 1, 1]} : vector<1x22x16xf32> to vector<1x16x16xf32>
    %186 = vector.broadcast %184 : f32 to vector<1x16x16xf32>
    %187 = arith.mulf %186, %185 : vector<1x16x16xf32>
    %188 = arith.addf %183, %187 : vector<1x16x16xf32>
    %c32 = arith.constant 32 : index
    %189 = memref.load %arg2[%c32] : memref<98xf32, #tpu.memory_space<smem>>
    %190 = vector.extract_strided_slice %168 {offsets = [0, 4, 0], sizes = [1, 16, 16], strides = [1, 1, 1]} : vector<1x22x16xf32> to vector<1x16x16xf32>
    %191 = vector.broadcast %189 : f32 to vector<1x16x16xf32>
    %192 = arith.mulf %191, %190 : vector<1x16x16xf32>
    %193 = arith.addf %188, %192 : vector<1x16x16xf32>
    %c39 = arith.constant 39 : index
    %194 = memref.load %arg2[%c39] : memref<98xf32, #tpu.memory_space<smem>>
    %195 = vector.extract_strided_slice %168 {offsets = [0, 5, 0], sizes = [1, 16, 16], strides = [1, 1, 1]} : vector<1x22x16xf32> to vector<1x16x16xf32>
    %196 = vector.broadcast %194 : f32 to vector<1x16x16xf32>
    %197 = arith.mulf %196, %195 : vector<1x16x16xf32>
    %198 = arith.addf %193, %197 : vector<1x16x16xf32>
    %c46 = arith.constant 46 : index
    %199 = memref.load %arg2[%c46] : memref<98xf32, #tpu.memory_space<smem>>
    %200 = vector.extract_strided_slice %168 {offsets = [0, 6, 0], sizes = [1, 16, 16], strides = [1, 1, 1]} : vector<1x22x16xf32> to vector<1x16x16xf32>
    %201 = vector.broadcast %199 : f32 to vector<1x16x16xf32>
    %202 = arith.mulf %201, %200 : vector<1x16x16xf32>
    %203 = arith.addf %198, %202 : vector<1x16x16xf32>
    %204 = vector.extract_strided_slice %23 {offsets = [0, 0, 5], sizes = [1, 22, 16], strides = [1, 1, 1]} : vector<1x22x22xf32> to vector<1x22x16xf32>
    %c5 = arith.constant 5 : index
    %205 = memref.load %arg2[%c5] : memref<98xf32, #tpu.memory_space<smem>>
    %206 = vector.extract_strided_slice %204 {offsets = [0, 0, 0], sizes = [1, 16, 16], strides = [1, 1, 1]} : vector<1x22x16xf32> to vector<1x16x16xf32>
    %207 = vector.broadcast %205 : f32 to vector<1x16x16xf32>
    %208 = arith.mulf %207, %206 : vector<1x16x16xf32>
    %209 = arith.addf %203, %208 : vector<1x16x16xf32>
    %c12 = arith.constant 12 : index
    %210 = memref.load %arg2[%c12] : memref<98xf32, #tpu.memory_space<smem>>
    %211 = vector.extract_strided_slice %204 {offsets = [0, 1, 0], sizes = [1, 16, 16], strides = [1, 1, 1]} : vector<1x22x16xf32> to vector<1x16x16xf32>
    %212 = vector.broadcast %210 : f32 to vector<1x16x16xf32>
    %213 = arith.mulf %212, %211 : vector<1x16x16xf32>
    %214 = arith.addf %209, %213 : vector<1x16x16xf32>
    %c19_37 = arith.constant 19 : index
    %215 = memref.load %arg2[%c19_37] : memref<98xf32, #tpu.memory_space<smem>>
    %216 = vector.extract_strided_slice %204 {offsets = [0, 2, 0], sizes = [1, 16, 16], strides = [1, 1, 1]} : vector<1x22x16xf32> to vector<1x16x16xf32>
    %217 = vector.broadcast %215 : f32 to vector<1x16x16xf32>
    %218 = arith.mulf %217, %216 : vector<1x16x16xf32>
    %219 = arith.addf %214, %218 : vector<1x16x16xf32>
    %c26 = arith.constant 26 : index
    %220 = memref.load %arg2[%c26] : memref<98xf32, #tpu.memory_space<smem>>
    %221 = vector.extract_strided_slice %204 {offsets = [0, 3, 0], sizes = [1, 16, 16], strides = [1, 1, 1]} : vector<1x22x16xf32> to vector<1x16x16xf32>
    %222 = vector.broadcast %220 : f32 to vector<1x16x16xf32>
    %223 = arith.mulf %222, %221 : vector<1x16x16xf32>
    %224 = arith.addf %219, %223 : vector<1x16x16xf32>
    %c33 = arith.constant 33 : index
    %225 = memref.load %arg2[%c33] : memref<98xf32, #tpu.memory_space<smem>>
    %226 = vector.extract_strided_slice %204 {offsets = [0, 4, 0], sizes = [1, 16, 16], strides = [1, 1, 1]} : vector<1x22x16xf32> to vector<1x16x16xf32>
    %227 = vector.broadcast %225 : f32 to vector<1x16x16xf32>
    %228 = arith.mulf %227, %226 : vector<1x16x16xf32>
    %229 = arith.addf %224, %228 : vector<1x16x16xf32>
    %c40 = arith.constant 40 : index
    %230 = memref.load %arg2[%c40] : memref<98xf32, #tpu.memory_space<smem>>
    %231 = vector.extract_strided_slice %204 {offsets = [0, 5, 0], sizes = [1, 16, 16], strides = [1, 1, 1]} : vector<1x22x16xf32> to vector<1x16x16xf32>
    %232 = vector.broadcast %230 : f32 to vector<1x16x16xf32>
    %233 = arith.mulf %232, %231 : vector<1x16x16xf32>
    %234 = arith.addf %229, %233 : vector<1x16x16xf32>
    %c47 = arith.constant 47 : index
    %235 = memref.load %arg2[%c47] : memref<98xf32, #tpu.memory_space<smem>>
    %236 = vector.extract_strided_slice %204 {offsets = [0, 6, 0], sizes = [1, 16, 16], strides = [1, 1, 1]} : vector<1x22x16xf32> to vector<1x16x16xf32>
    %237 = vector.broadcast %235 : f32 to vector<1x16x16xf32>
    %238 = arith.mulf %237, %236 : vector<1x16x16xf32>
    %239 = arith.addf %234, %238 : vector<1x16x16xf32>
    %240 = vector.extract_strided_slice %23 {offsets = [0, 0, 6], sizes = [1, 22, 16], strides = [1, 1, 1]} : vector<1x22x22xf32> to vector<1x22x16xf32>
    %c6 = arith.constant 6 : index
    %241 = memref.load %arg2[%c6] : memref<98xf32, #tpu.memory_space<smem>>
    %242 = vector.extract_strided_slice %240 {offsets = [0, 0, 0], sizes = [1, 16, 16], strides = [1, 1, 1]} : vector<1x22x16xf32> to vector<1x16x16xf32>
    %243 = vector.broadcast %241 : f32 to vector<1x16x16xf32>
    %244 = arith.mulf %243, %242 : vector<1x16x16xf32>
    %245 = arith.addf %239, %244 : vector<1x16x16xf32>
    %c13 = arith.constant 13 : index
    %246 = memref.load %arg2[%c13] : memref<98xf32, #tpu.memory_space<smem>>
    %247 = vector.extract_strided_slice %240 {offsets = [0, 1, 0], sizes = [1, 16, 16], strides = [1, 1, 1]} : vector<1x22x16xf32> to vector<1x16x16xf32>
    %248 = vector.broadcast %246 : f32 to vector<1x16x16xf32>
    %249 = arith.mulf %248, %247 : vector<1x16x16xf32>
    %250 = arith.addf %245, %249 : vector<1x16x16xf32>
    %c20 = arith.constant 20 : index
    %251 = memref.load %arg2[%c20] : memref<98xf32, #tpu.memory_space<smem>>
    %252 = vector.extract_strided_slice %240 {offsets = [0, 2, 0], sizes = [1, 16, 16], strides = [1, 1, 1]} : vector<1x22x16xf32> to vector<1x16x16xf32>
    %253 = vector.broadcast %251 : f32 to vector<1x16x16xf32>
    %254 = arith.mulf %253, %252 : vector<1x16x16xf32>
    %255 = arith.addf %250, %254 : vector<1x16x16xf32>
    %c27 = arith.constant 27 : index
    %256 = memref.load %arg2[%c27] : memref<98xf32, #tpu.memory_space<smem>>
    %257 = vector.extract_strided_slice %240 {offsets = [0, 3, 0], sizes = [1, 16, 16], strides = [1, 1, 1]} : vector<1x22x16xf32> to vector<1x16x16xf32>
    %258 = vector.broadcast %256 : f32 to vector<1x16x16xf32>
    %259 = arith.mulf %258, %257 : vector<1x16x16xf32>
    %260 = arith.addf %255, %259 : vector<1x16x16xf32>
    %c34 = arith.constant 34 : index
    %261 = memref.load %arg2[%c34] : memref<98xf32, #tpu.memory_space<smem>>
    %262 = vector.extract_strided_slice %240 {offsets = [0, 4, 0], sizes = [1, 16, 16], strides = [1, 1, 1]} : vector<1x22x16xf32> to vector<1x16x16xf32>
    %263 = vector.broadcast %261 : f32 to vector<1x16x16xf32>
    %264 = arith.mulf %263, %262 : vector<1x16x16xf32>
    %265 = arith.addf %260, %264 : vector<1x16x16xf32>
    %c41 = arith.constant 41 : index
    %266 = memref.load %arg2[%c41] : memref<98xf32, #tpu.memory_space<smem>>
    %267 = vector.extract_strided_slice %240 {offsets = [0, 5, 0], sizes = [1, 16, 16], strides = [1, 1, 1]} : vector<1x22x16xf32> to vector<1x16x16xf32>
    %268 = vector.broadcast %266 : f32 to vector<1x16x16xf32>
    %269 = arith.mulf %268, %267 : vector<1x16x16xf32>
    %270 = arith.addf %265, %269 : vector<1x16x16xf32>
    %c48 = arith.constant 48 : index
    %271 = memref.load %arg2[%c48] : memref<98xf32, #tpu.memory_space<smem>>
    %272 = vector.extract_strided_slice %240 {offsets = [0, 6, 0], sizes = [1, 16, 16], strides = [1, 1, 1]} : vector<1x22x16xf32> to vector<1x16x16xf32>
    %273 = vector.broadcast %271 : f32 to vector<1x16x16xf32>
    %274 = arith.mulf %273, %272 : vector<1x16x16xf32>
    %275 = arith.addf %270, %274 : vector<1x16x16xf32>
    %c1_38 = arith.constant 1 : index
    %c0_39 = arith.constant 0 : index
    %c0_40 = arith.constant 0 : index
    %c0_41 = arith.constant 0 : index
    %276 = vector.load %arg7[%c1_38, %c0_39, %c0_40, %c0_41] : memref<2x1x22x22xf32, #tpu.memory_space<vmem>>, vector<1x1x22x22xf32>
    %277 = vector.shape_cast %276 : vector<1x1x22x22xf32> to vector<1x22x22xf32>
    %278 = vector.extract_strided_slice %277 {offsets = [0, 0, 0], sizes = [1, 22, 16], strides = [1, 1, 1]} : vector<1x22x22xf32> to vector<1x22x16xf32>
    %c49 = arith.constant 49 : index
    %279 = memref.load %arg2[%c49] : memref<98xf32, #tpu.memory_space<smem>>
    %280 = vector.extract_strided_slice %278 {offsets = [0, 0, 0], sizes = [1, 16, 16], strides = [1, 1, 1]} : vector<1x22x16xf32> to vector<1x16x16xf32>
    %281 = vector.broadcast %279 : f32 to vector<1x16x16xf32>
    %282 = arith.mulf %281, %280 : vector<1x16x16xf32>
    %283 = arith.addf %275, %282 : vector<1x16x16xf32>
    %c56 = arith.constant 56 : index
    %284 = memref.load %arg2[%c56] : memref<98xf32, #tpu.memory_space<smem>>
    %285 = vector.extract_strided_slice %278 {offsets = [0, 1, 0], sizes = [1, 16, 16], strides = [1, 1, 1]} : vector<1x22x16xf32> to vector<1x16x16xf32>
    %286 = vector.broadcast %284 : f32 to vector<1x16x16xf32>
    %287 = arith.mulf %286, %285 : vector<1x16x16xf32>
    %288 = arith.addf %283, %287 : vector<1x16x16xf32>
    %c63 = arith.constant 63 : index
    %289 = memref.load %arg2[%c63] : memref<98xf32, #tpu.memory_space<smem>>
    %290 = vector.extract_strided_slice %278 {offsets = [0, 2, 0], sizes = [1, 16, 16], strides = [1, 1, 1]} : vector<1x22x16xf32> to vector<1x16x16xf32>
    %291 = vector.broadcast %289 : f32 to vector<1x16x16xf32>
    %292 = arith.mulf %291, %290 : vector<1x16x16xf32>
    %293 = arith.addf %288, %292 : vector<1x16x16xf32>
    %c70 = arith.constant 70 : index
    %294 = memref.load %arg2[%c70] : memref<98xf32, #tpu.memory_space<smem>>
    %295 = vector.extract_strided_slice %278 {offsets = [0, 3, 0], sizes = [1, 16, 16], strides = [1, 1, 1]} : vector<1x22x16xf32> to vector<1x16x16xf32>
    %296 = vector.broadcast %294 : f32 to vector<1x16x16xf32>
    %297 = arith.mulf %296, %295 : vector<1x16x16xf32>
    %298 = arith.addf %293, %297 : vector<1x16x16xf32>
    %c77 = arith.constant 77 : index
    %299 = memref.load %arg2[%c77] : memref<98xf32, #tpu.memory_space<smem>>
    %300 = vector.extract_strided_slice %278 {offsets = [0, 4, 0], sizes = [1, 16, 16], strides = [1, 1, 1]} : vector<1x22x16xf32> to vector<1x16x16xf32>
    %301 = vector.broadcast %299 : f32 to vector<1x16x16xf32>
    %302 = arith.mulf %301, %300 : vector<1x16x16xf32>
    %303 = arith.addf %298, %302 : vector<1x16x16xf32>
    %c84 = arith.constant 84 : index
    %304 = memref.load %arg2[%c84] : memref<98xf32, #tpu.memory_space<smem>>
    %305 = vector.extract_strided_slice %278 {offsets = [0, 5, 0], sizes = [1, 16, 16], strides = [1, 1, 1]} : vector<1x22x16xf32> to vector<1x16x16xf32>
    %306 = vector.broadcast %304 : f32 to vector<1x16x16xf32>
    %307 = arith.mulf %306, %305 : vector<1x16x16xf32>
    %308 = arith.addf %303, %307 : vector<1x16x16xf32>
    %c91 = arith.constant 91 : index
    %309 = memref.load %arg2[%c91] : memref<98xf32, #tpu.memory_space<smem>>
    %310 = vector.extract_strided_slice %278 {offsets = [0, 6, 0], sizes = [1, 16, 16], strides = [1, 1, 1]} : vector<1x22x16xf32> to vector<1x16x16xf32>
    %311 = vector.broadcast %309 : f32 to vector<1x16x16xf32>
    %312 = arith.mulf %311, %310 : vector<1x16x16xf32>
    %313 = arith.addf %308, %312 : vector<1x16x16xf32>
    %314 = vector.extract_strided_slice %277 {offsets = [0, 0, 1], sizes = [1, 22, 16], strides = [1, 1, 1]} : vector<1x22x22xf32> to vector<1x22x16xf32>
    %c50 = arith.constant 50 : index
    %315 = memref.load %arg2[%c50] : memref<98xf32, #tpu.memory_space<smem>>
    %316 = vector.extract_strided_slice %314 {offsets = [0, 0, 0], sizes = [1, 16, 16], strides = [1, 1, 1]} : vector<1x22x16xf32> to vector<1x16x16xf32>
    %317 = vector.broadcast %315 : f32 to vector<1x16x16xf32>
    %318 = arith.mulf %317, %316 : vector<1x16x16xf32>
    %319 = arith.addf %313, %318 : vector<1x16x16xf32>
    %c57 = arith.constant 57 : index
    %320 = memref.load %arg2[%c57] : memref<98xf32, #tpu.memory_space<smem>>
    %321 = vector.extract_strided_slice %314 {offsets = [0, 1, 0], sizes = [1, 16, 16], strides = [1, 1, 1]} : vector<1x22x16xf32> to vector<1x16x16xf32>
    %322 = vector.broadcast %320 : f32 to vector<1x16x16xf32>
    %323 = arith.mulf %322, %321 : vector<1x16x16xf32>
    %324 = arith.addf %319, %323 : vector<1x16x16xf32>
    %c64 = arith.constant 64 : index
    %325 = memref.load %arg2[%c64] : memref<98xf32, #tpu.memory_space<smem>>
    %326 = vector.extract_strided_slice %314 {offsets = [0, 2, 0], sizes = [1, 16, 16], strides = [1, 1, 1]} : vector<1x22x16xf32> to vector<1x16x16xf32>
    %327 = vector.broadcast %325 : f32 to vector<1x16x16xf32>
    %328 = arith.mulf %327, %326 : vector<1x16x16xf32>
    %329 = arith.addf %324, %328 : vector<1x16x16xf32>
    %c71 = arith.constant 71 : index
    %330 = memref.load %arg2[%c71] : memref<98xf32, #tpu.memory_space<smem>>
    %331 = vector.extract_strided_slice %314 {offsets = [0, 3, 0], sizes = [1, 16, 16], strides = [1, 1, 1]} : vector<1x22x16xf32> to vector<1x16x16xf32>
    %332 = vector.broadcast %330 : f32 to vector<1x16x16xf32>
    %333 = arith.mulf %332, %331 : vector<1x16x16xf32>
    %334 = arith.addf %329, %333 : vector<1x16x16xf32>
    %c78 = arith.constant 78 : index
    %335 = memref.load %arg2[%c78] : memref<98xf32, #tpu.memory_space<smem>>
    %336 = vector.extract_strided_slice %314 {offsets = [0, 4, 0], sizes = [1, 16, 16], strides = [1, 1, 1]} : vector<1x22x16xf32> to vector<1x16x16xf32>
    %337 = vector.broadcast %335 : f32 to vector<1x16x16xf32>
    %338 = arith.mulf %337, %336 : vector<1x16x16xf32>
    %339 = arith.addf %334, %338 : vector<1x16x16xf32>
    %c85 = arith.constant 85 : index
    %340 = memref.load %arg2[%c85] : memref<98xf32, #tpu.memory_space<smem>>
    %341 = vector.extract_strided_slice %314 {offsets = [0, 5, 0], sizes = [1, 16, 16], strides = [1, 1, 1]} : vector<1x22x16xf32> to vector<1x16x16xf32>
    %342 = vector.broadcast %340 : f32 to vector<1x16x16xf32>
    %343 = arith.mulf %342, %341 : vector<1x16x16xf32>
    %344 = arith.addf %339, %343 : vector<1x16x16xf32>
    %c92 = arith.constant 92 : index
    %345 = memref.load %arg2[%c92] : memref<98xf32, #tpu.memory_space<smem>>
    %346 = vector.extract_strided_slice %314 {offsets = [0, 6, 0], sizes = [1, 16, 16], strides = [1, 1, 1]} : vector<1x22x16xf32> to vector<1x16x16xf32>
    %347 = vector.broadcast %345 : f32 to vector<1x16x16xf32>
    %348 = arith.mulf %347, %346 : vector<1x16x16xf32>
    %349 = arith.addf %344, %348 : vector<1x16x16xf32>
    %350 = vector.extract_strided_slice %277 {offsets = [0, 0, 2], sizes = [1, 22, 16], strides = [1, 1, 1]} : vector<1x22x22xf32> to vector<1x22x16xf32>
    %c51 = arith.constant 51 : index
    %351 = memref.load %arg2[%c51] : memref<98xf32, #tpu.memory_space<smem>>
    %352 = vector.extract_strided_slice %350 {offsets = [0, 0, 0], sizes = [1, 16, 16], strides = [1, 1, 1]} : vector<1x22x16xf32> to vector<1x16x16xf32>
    %353 = vector.broadcast %351 : f32 to vector<1x16x16xf32>
    %354 = arith.mulf %353, %352 : vector<1x16x16xf32>
    %355 = arith.addf %349, %354 : vector<1x16x16xf32>
    %c58 = arith.constant 58 : index
    %356 = memref.load %arg2[%c58] : memref<98xf32, #tpu.memory_space<smem>>
    %357 = vector.extract_strided_slice %350 {offsets = [0, 1, 0], sizes = [1, 16, 16], strides = [1, 1, 1]} : vector<1x22x16xf32> to vector<1x16x16xf32>
    %358 = vector.broadcast %356 : f32 to vector<1x16x16xf32>
    %359 = arith.mulf %358, %357 : vector<1x16x16xf32>
    %360 = arith.addf %355, %359 : vector<1x16x16xf32>
    %c65 = arith.constant 65 : index
    %361 = memref.load %arg2[%c65] : memref<98xf32, #tpu.memory_space<smem>>
    %362 = vector.extract_strided_slice %350 {offsets = [0, 2, 0], sizes = [1, 16, 16], strides = [1, 1, 1]} : vector<1x22x16xf32> to vector<1x16x16xf32>
    %363 = vector.broadcast %361 : f32 to vector<1x16x16xf32>
    %364 = arith.mulf %363, %362 : vector<1x16x16xf32>
    %365 = arith.addf %360, %364 : vector<1x16x16xf32>
    %c72 = arith.constant 72 : index
    %366 = memref.load %arg2[%c72] : memref<98xf32, #tpu.memory_space<smem>>
    %367 = vector.extract_strided_slice %350 {offsets = [0, 3, 0], sizes = [1, 16, 16], strides = [1, 1, 1]} : vector<1x22x16xf32> to vector<1x16x16xf32>
    %368 = vector.broadcast %366 : f32 to vector<1x16x16xf32>
    %369 = arith.mulf %368, %367 : vector<1x16x16xf32>
    %370 = arith.addf %365, %369 : vector<1x16x16xf32>
    %c79 = arith.constant 79 : index
    %371 = memref.load %arg2[%c79] : memref<98xf32, #tpu.memory_space<smem>>
    %372 = vector.extract_strided_slice %350 {offsets = [0, 4, 0], sizes = [1, 16, 16], strides = [1, 1, 1]} : vector<1x22x16xf32> to vector<1x16x16xf32>
    %373 = vector.broadcast %371 : f32 to vector<1x16x16xf32>
    %374 = arith.mulf %373, %372 : vector<1x16x16xf32>
    %375 = arith.addf %370, %374 : vector<1x16x16xf32>
    %c86 = arith.constant 86 : index
    %376 = memref.load %arg2[%c86] : memref<98xf32, #tpu.memory_space<smem>>
    %377 = vector.extract_strided_slice %350 {offsets = [0, 5, 0], sizes = [1, 16, 16], strides = [1, 1, 1]} : vector<1x22x16xf32> to vector<1x16x16xf32>
    %378 = vector.broadcast %376 : f32 to vector<1x16x16xf32>
    %379 = arith.mulf %378, %377 : vector<1x16x16xf32>
    %380 = arith.addf %375, %379 : vector<1x16x16xf32>
    %c93 = arith.constant 93 : index
    %381 = memref.load %arg2[%c93] : memref<98xf32, #tpu.memory_space<smem>>
    %382 = vector.extract_strided_slice %350 {offsets = [0, 6, 0], sizes = [1, 16, 16], strides = [1, 1, 1]} : vector<1x22x16xf32> to vector<1x16x16xf32>
    %383 = vector.broadcast %381 : f32 to vector<1x16x16xf32>
    %384 = arith.mulf %383, %382 : vector<1x16x16xf32>
    %385 = arith.addf %380, %384 : vector<1x16x16xf32>
    %386 = vector.extract_strided_slice %277 {offsets = [0, 0, 3], sizes = [1, 22, 16], strides = [1, 1, 1]} : vector<1x22x22xf32> to vector<1x22x16xf32>
    %c52 = arith.constant 52 : index
    %387 = memref.load %arg2[%c52] : memref<98xf32, #tpu.memory_space<smem>>
    %388 = vector.extract_strided_slice %386 {offsets = [0, 0, 0], sizes = [1, 16, 16], strides = [1, 1, 1]} : vector<1x22x16xf32> to vector<1x16x16xf32>
    %389 = vector.broadcast %387 : f32 to vector<1x16x16xf32>
    %390 = arith.mulf %389, %388 : vector<1x16x16xf32>
    %391 = arith.addf %385, %390 : vector<1x16x16xf32>
    %c59 = arith.constant 59 : index
    %392 = memref.load %arg2[%c59] : memref<98xf32, #tpu.memory_space<smem>>
    %393 = vector.extract_strided_slice %386 {offsets = [0, 1, 0], sizes = [1, 16, 16], strides = [1, 1, 1]} : vector<1x22x16xf32> to vector<1x16x16xf32>
    %394 = vector.broadcast %392 : f32 to vector<1x16x16xf32>
    %395 = arith.mulf %394, %393 : vector<1x16x16xf32>
    %396 = arith.addf %391, %395 : vector<1x16x16xf32>
    %c66 = arith.constant 66 : index
    %397 = memref.load %arg2[%c66] : memref<98xf32, #tpu.memory_space<smem>>
    %398 = vector.extract_strided_slice %386 {offsets = [0, 2, 0], sizes = [1, 16, 16], strides = [1, 1, 1]} : vector<1x22x16xf32> to vector<1x16x16xf32>
    %399 = vector.broadcast %397 : f32 to vector<1x16x16xf32>
    %400 = arith.mulf %399, %398 : vector<1x16x16xf32>
    %401 = arith.addf %396, %400 : vector<1x16x16xf32>
    %c73 = arith.constant 73 : index
    %402 = memref.load %arg2[%c73] : memref<98xf32, #tpu.memory_space<smem>>
    %403 = vector.extract_strided_slice %386 {offsets = [0, 3, 0], sizes = [1, 16, 16], strides = [1, 1, 1]} : vector<1x22x16xf32> to vector<1x16x16xf32>
    %404 = vector.broadcast %402 : f32 to vector<1x16x16xf32>
    %405 = arith.mulf %404, %403 : vector<1x16x16xf32>
    %406 = arith.addf %401, %405 : vector<1x16x16xf32>
    %c80 = arith.constant 80 : index
    %407 = memref.load %arg2[%c80] : memref<98xf32, #tpu.memory_space<smem>>
    %408 = vector.extract_strided_slice %386 {offsets = [0, 4, 0], sizes = [1, 16, 16], strides = [1, 1, 1]} : vector<1x22x16xf32> to vector<1x16x16xf32>
    %409 = vector.broadcast %407 : f32 to vector<1x16x16xf32>
    %410 = arith.mulf %409, %408 : vector<1x16x16xf32>
    %411 = arith.addf %406, %410 : vector<1x16x16xf32>
    %c87 = arith.constant 87 : index
    %412 = memref.load %arg2[%c87] : memref<98xf32, #tpu.memory_space<smem>>
    %413 = vector.extract_strided_slice %386 {offsets = [0, 5, 0], sizes = [1, 16, 16], strides = [1, 1, 1]} : vector<1x22x16xf32> to vector<1x16x16xf32>
    %414 = vector.broadcast %412 : f32 to vector<1x16x16xf32>
    %415 = arith.mulf %414, %413 : vector<1x16x16xf32>
    %416 = arith.addf %411, %415 : vector<1x16x16xf32>
    %c94 = arith.constant 94 : index
    %417 = memref.load %arg2[%c94] : memref<98xf32, #tpu.memory_space<smem>>
    %418 = vector.extract_strided_slice %386 {offsets = [0, 6, 0], sizes = [1, 16, 16], strides = [1, 1, 1]} : vector<1x22x16xf32> to vector<1x16x16xf32>
    %419 = vector.broadcast %417 : f32 to vector<1x16x16xf32>
    %420 = arith.mulf %419, %418 : vector<1x16x16xf32>
    %421 = arith.addf %416, %420 : vector<1x16x16xf32>
    %422 = vector.extract_strided_slice %277 {offsets = [0, 0, 4], sizes = [1, 22, 16], strides = [1, 1, 1]} : vector<1x22x22xf32> to vector<1x22x16xf32>
    %c53 = arith.constant 53 : index
    %423 = memref.load %arg2[%c53] : memref<98xf32, #tpu.memory_space<smem>>
    %424 = vector.extract_strided_slice %422 {offsets = [0, 0, 0], sizes = [1, 16, 16], strides = [1, 1, 1]} : vector<1x22x16xf32> to vector<1x16x16xf32>
    %425 = vector.broadcast %423 : f32 to vector<1x16x16xf32>
    %426 = arith.mulf %425, %424 : vector<1x16x16xf32>
    %427 = arith.addf %421, %426 : vector<1x16x16xf32>
    %c60 = arith.constant 60 : index
    %428 = memref.load %arg2[%c60] : memref<98xf32, #tpu.memory_space<smem>>
    %429 = vector.extract_strided_slice %422 {offsets = [0, 1, 0], sizes = [1, 16, 16], strides = [1, 1, 1]} : vector<1x22x16xf32> to vector<1x16x16xf32>
    %430 = vector.broadcast %428 : f32 to vector<1x16x16xf32>
    %431 = arith.mulf %430, %429 : vector<1x16x16xf32>
    %432 = arith.addf %427, %431 : vector<1x16x16xf32>
    %c67 = arith.constant 67 : index
    %433 = memref.load %arg2[%c67] : memref<98xf32, #tpu.memory_space<smem>>
    %434 = vector.extract_strided_slice %422 {offsets = [0, 2, 0], sizes = [1, 16, 16], strides = [1, 1, 1]} : vector<1x22x16xf32> to vector<1x16x16xf32>
    %435 = vector.broadcast %433 : f32 to vector<1x16x16xf32>
    %436 = arith.mulf %435, %434 : vector<1x16x16xf32>
    %437 = arith.addf %432, %436 : vector<1x16x16xf32>
    %c74 = arith.constant 74 : index
    %438 = memref.load %arg2[%c74] : memref<98xf32, #tpu.memory_space<smem>>
    %439 = vector.extract_strided_slice %422 {offsets = [0, 3, 0], sizes = [1, 16, 16], strides = [1, 1, 1]} : vector<1x22x16xf32> to vector<1x16x16xf32>
    %440 = vector.broadcast %438 : f32 to vector<1x16x16xf32>
    %441 = arith.mulf %440, %439 : vector<1x16x16xf32>
    %442 = arith.addf %437, %441 : vector<1x16x16xf32>
    %c81 = arith.constant 81 : index
    %443 = memref.load %arg2[%c81] : memref<98xf32, #tpu.memory_space<smem>>
    %444 = vector.extract_strided_slice %422 {offsets = [0, 4, 0], sizes = [1, 16, 16], strides = [1, 1, 1]} : vector<1x22x16xf32> to vector<1x16x16xf32>
    %445 = vector.broadcast %443 : f32 to vector<1x16x16xf32>
    %446 = arith.mulf %445, %444 : vector<1x16x16xf32>
    %447 = arith.addf %442, %446 : vector<1x16x16xf32>
    %c88 = arith.constant 88 : index
    %448 = memref.load %arg2[%c88] : memref<98xf32, #tpu.memory_space<smem>>
    %449 = vector.extract_strided_slice %422 {offsets = [0, 5, 0], sizes = [1, 16, 16], strides = [1, 1, 1]} : vector<1x22x16xf32> to vector<1x16x16xf32>
    %450 = vector.broadcast %448 : f32 to vector<1x16x16xf32>
    %451 = arith.mulf %450, %449 : vector<1x16x16xf32>
    %452 = arith.addf %447, %451 : vector<1x16x16xf32>
    %c95 = arith.constant 95 : index
    %453 = memref.load %arg2[%c95] : memref<98xf32, #tpu.memory_space<smem>>
    %454 = vector.extract_strided_slice %422 {offsets = [0, 6, 0], sizes = [1, 16, 16], strides = [1, 1, 1]} : vector<1x22x16xf32> to vector<1x16x16xf32>
    %455 = vector.broadcast %453 : f32 to vector<1x16x16xf32>
    %456 = arith.mulf %455, %454 : vector<1x16x16xf32>
    %457 = arith.addf %452, %456 : vector<1x16x16xf32>
    %458 = vector.extract_strided_slice %277 {offsets = [0, 0, 5], sizes = [1, 22, 16], strides = [1, 1, 1]} : vector<1x22x22xf32> to vector<1x22x16xf32>
    %c54 = arith.constant 54 : index
    %459 = memref.load %arg2[%c54] : memref<98xf32, #tpu.memory_space<smem>>
    %460 = vector.extract_strided_slice %458 {offsets = [0, 0, 0], sizes = [1, 16, 16], strides = [1, 1, 1]} : vector<1x22x16xf32> to vector<1x16x16xf32>
    %461 = vector.broadcast %459 : f32 to vector<1x16x16xf32>
    %462 = arith.mulf %461, %460 : vector<1x16x16xf32>
    %463 = arith.addf %457, %462 : vector<1x16x16xf32>
    %c61 = arith.constant 61 : index
    %464 = memref.load %arg2[%c61] : memref<98xf32, #tpu.memory_space<smem>>
    %465 = vector.extract_strided_slice %458 {offsets = [0, 1, 0], sizes = [1, 16, 16], strides = [1, 1, 1]} : vector<1x22x16xf32> to vector<1x16x16xf32>
    %466 = vector.broadcast %464 : f32 to vector<1x16x16xf32>
    %467 = arith.mulf %466, %465 : vector<1x16x16xf32>
    %468 = arith.addf %463, %467 : vector<1x16x16xf32>
    %c68 = arith.constant 68 : index
    %469 = memref.load %arg2[%c68] : memref<98xf32, #tpu.memory_space<smem>>
    %470 = vector.extract_strided_slice %458 {offsets = [0, 2, 0], sizes = [1, 16, 16], strides = [1, 1, 1]} : vector<1x22x16xf32> to vector<1x16x16xf32>
    %471 = vector.broadcast %469 : f32 to vector<1x16x16xf32>
    %472 = arith.mulf %471, %470 : vector<1x16x16xf32>
    %473 = arith.addf %468, %472 : vector<1x16x16xf32>
    %c75 = arith.constant 75 : index
    %474 = memref.load %arg2[%c75] : memref<98xf32, #tpu.memory_space<smem>>
    %475 = vector.extract_strided_slice %458 {offsets = [0, 3, 0], sizes = [1, 16, 16], strides = [1, 1, 1]} : vector<1x22x16xf32> to vector<1x16x16xf32>
    %476 = vector.broadcast %474 : f32 to vector<1x16x16xf32>
    %477 = arith.mulf %476, %475 : vector<1x16x16xf32>
    %478 = arith.addf %473, %477 : vector<1x16x16xf32>
    %c82 = arith.constant 82 : index
    %479 = memref.load %arg2[%c82] : memref<98xf32, #tpu.memory_space<smem>>
    %480 = vector.extract_strided_slice %458 {offsets = [0, 4, 0], sizes = [1, 16, 16], strides = [1, 1, 1]} : vector<1x22x16xf32> to vector<1x16x16xf32>
    %481 = vector.broadcast %479 : f32 to vector<1x16x16xf32>
    %482 = arith.mulf %481, %480 : vector<1x16x16xf32>
    %483 = arith.addf %478, %482 : vector<1x16x16xf32>
    %c89 = arith.constant 89 : index
    %484 = memref.load %arg2[%c89] : memref<98xf32, #tpu.memory_space<smem>>
    %485 = vector.extract_strided_slice %458 {offsets = [0, 5, 0], sizes = [1, 16, 16], strides = [1, 1, 1]} : vector<1x22x16xf32> to vector<1x16x16xf32>
    %486 = vector.broadcast %484 : f32 to vector<1x16x16xf32>
    %487 = arith.mulf %486, %485 : vector<1x16x16xf32>
    %488 = arith.addf %483, %487 : vector<1x16x16xf32>
    %c96 = arith.constant 96 : index
    %489 = memref.load %arg2[%c96] : memref<98xf32, #tpu.memory_space<smem>>
    %490 = vector.extract_strided_slice %458 {offsets = [0, 6, 0], sizes = [1, 16, 16], strides = [1, 1, 1]} : vector<1x22x16xf32> to vector<1x16x16xf32>
    %491 = vector.broadcast %489 : f32 to vector<1x16x16xf32>
    %492 = arith.mulf %491, %490 : vector<1x16x16xf32>
    %493 = arith.addf %488, %492 : vector<1x16x16xf32>
    %494 = vector.extract_strided_slice %277 {offsets = [0, 0, 6], sizes = [1, 22, 16], strides = [1, 1, 1]} : vector<1x22x22xf32> to vector<1x22x16xf32>
    %c55 = arith.constant 55 : index
    %495 = memref.load %arg2[%c55] : memref<98xf32, #tpu.memory_space<smem>>
    %496 = vector.extract_strided_slice %494 {offsets = [0, 0, 0], sizes = [1, 16, 16], strides = [1, 1, 1]} : vector<1x22x16xf32> to vector<1x16x16xf32>
    %497 = vector.broadcast %495 : f32 to vector<1x16x16xf32>
    %498 = arith.mulf %497, %496 : vector<1x16x16xf32>
    %499 = arith.addf %493, %498 : vector<1x16x16xf32>
    %c62 = arith.constant 62 : index
    %500 = memref.load %arg2[%c62] : memref<98xf32, #tpu.memory_space<smem>>
    %501 = vector.extract_strided_slice %494 {offsets = [0, 1, 0], sizes = [1, 16, 16], strides = [1, 1, 1]} : vector<1x22x16xf32> to vector<1x16x16xf32>
    %502 = vector.broadcast %500 : f32 to vector<1x16x16xf32>
    %503 = arith.mulf %502, %501 : vector<1x16x16xf32>
    %504 = arith.addf %499, %503 : vector<1x16x16xf32>
    %c69 = arith.constant 69 : index
    %505 = memref.load %arg2[%c69] : memref<98xf32, #tpu.memory_space<smem>>
    %506 = vector.extract_strided_slice %494 {offsets = [0, 2, 0], sizes = [1, 16, 16], strides = [1, 1, 1]} : vector<1x22x16xf32> to vector<1x16x16xf32>
    %507 = vector.broadcast %505 : f32 to vector<1x16x16xf32>
    %508 = arith.mulf %507, %506 : vector<1x16x16xf32>
    %509 = arith.addf %504, %508 : vector<1x16x16xf32>
    %c76 = arith.constant 76 : index
    %510 = memref.load %arg2[%c76] : memref<98xf32, #tpu.memory_space<smem>>
    %511 = vector.extract_strided_slice %494 {offsets = [0, 3, 0], sizes = [1, 16, 16], strides = [1, 1, 1]} : vector<1x22x16xf32> to vector<1x16x16xf32>
    %512 = vector.broadcast %510 : f32 to vector<1x16x16xf32>
    %513 = arith.mulf %512, %511 : vector<1x16x16xf32>
    %514 = arith.addf %509, %513 : vector<1x16x16xf32>
    %c83 = arith.constant 83 : index
    %515 = memref.load %arg2[%c83] : memref<98xf32, #tpu.memory_space<smem>>
    %516 = vector.extract_strided_slice %494 {offsets = [0, 4, 0], sizes = [1, 16, 16], strides = [1, 1, 1]} : vector<1x22x16xf32> to vector<1x16x16xf32>
    %517 = vector.broadcast %515 : f32 to vector<1x16x16xf32>
    %518 = arith.mulf %517, %516 : vector<1x16x16xf32>
    %519 = arith.addf %514, %518 : vector<1x16x16xf32>
    %c90 = arith.constant 90 : index
    %520 = memref.load %arg2[%c90] : memref<98xf32, #tpu.memory_space<smem>>
    %521 = vector.extract_strided_slice %494 {offsets = [0, 5, 0], sizes = [1, 16, 16], strides = [1, 1, 1]} : vector<1x22x16xf32> to vector<1x16x16xf32>
    %522 = vector.broadcast %520 : f32 to vector<1x16x16xf32>
    %523 = arith.mulf %522, %521 : vector<1x16x16xf32>
    %524 = arith.addf %519, %523 : vector<1x16x16xf32>
    %c97 = arith.constant 97 : index
    %525 = memref.load %arg2[%c97] : memref<98xf32, #tpu.memory_space<smem>>
    %526 = vector.extract_strided_slice %494 {offsets = [0, 6, 0], sizes = [1, 16, 16], strides = [1, 1, 1]} : vector<1x22x16xf32> to vector<1x16x16xf32>
    %527 = vector.broadcast %525 : f32 to vector<1x16x16xf32>
    %528 = arith.mulf %527, %526 : vector<1x16x16xf32>
    %529 = arith.addf %524, %528 : vector<1x16x16xf32>
    %cst_42 = arith.constant 0.000000e+00 : f32
    %530 = vector.broadcast %cst_42 : f32 to vector<1x16x16xf32>
    %531 = arith.subf %530, %529 : vector<1x16x16xf32>
    %532 = math.exp %531 : vector<1x16x16xf32>
    %cst_43 = arith.constant 1.000000e+00 : f32
    %533 = vector.broadcast %cst_43 : f32 to vector<1x16x16xf32>
    %534 = arith.addf %533, %532 : vector<1x16x16xf32>
    %cst_44 = arith.constant 1.000000e+00 : f32
    %535 = vector.broadcast %cst_44 : f32 to vector<1x16x16xf32>
    %536 = arith.divf %535, %534 : vector<1x16x16xf32>
    %537 = vector.shape_cast %536 : vector<1x16x16xf32> to vector<1x1x256xf32>
    %c0_45 = arith.constant 0 : index
    %c0_46 = arith.constant 0 : index
    %c0_47 = arith.constant 0 : index
    %538 = vector.load %arg4[%c0_45, %c0_46, %c0_47] : memref<1x1x256xf32, #tpu.memory_space<vmem>>, vector<1x1x256xf32>
    tpu.vector_store %arg4[%c0_45, %c0_46, %c0_47], %537 {strides = array<i32>} : memref<1x1x256xf32, #tpu.memory_space<vmem>>, vector<1x1x256xf32>,
    return
  }
  func.func @transform_0(%arg0: i32, %arg1: i32) -> i32 {
    %c0_i32 = arith.constant 0 : i32
    %c0_i32_0 = arith.constant 0 : i32
    return %c0_i32 : i32
  }
  func.func @transform_1(%arg0: i32, %arg1: i32) -> (i32, i32, i32) {
    %c0_i32 = arith.constant 0 : i32
    %c0_i32_0 = arith.constant 0 : i32
    return %arg0, %arg1, %c0_i32 : i32, i32, i32
  }
  func.func @transform_2(%arg0: i32, %arg1: i32) -> (i32, i32, i32) {
    %c0_i32 = arith.constant 0 : i32
    %c0_i32_0 = arith.constant 0 : i32
    %c0_i32_1 = arith.constant 0 : i32
    return %arg0, %c0_i32, %c0_i32_0 : i32, i32, i32
  }
}

</mosaic_0001>

<bundles_post_ra>
// kernel: spatial_attention_forward.1
= control target key start
LH: loop header
LB: loop body
LE: loop exit
PB: predicated region body
PF: predicated region fallthrough
CT: control target
= control target key end

     0   :  { %7 = vsyncpa [#allocation6], 0  ;;  %s3002_s9 = smov 0   ;;  %s3004_s10 = smov 0   ;;  %s4878_s0 = inlined_call_operand.vmem [shape: f32[98], index: 0, kind: input, shape index: {}]   ;;  %s4879_s1 = inlined_call_operand.vmem [shape: f32[2,4,256], index: 1, kind: input, shape index: {}]   ;;  %s4880_s2 = inlined_call_operand.vmem [shape: f32[2,1,256], index: 2, kind: output, shape index: {}]  }
   0x1   :  { %s3006_s11 = smov 0  }
   0x2 LB: > { %s2744_s12 = sadd.s32 4294967295, %s2966_s11   ;;  %s25_s13 = sadd.s32 1, %s2962_s10  ;;  %s2966_s11 = sphi %s3006_s11, %s13_s11   ;;  %s2962_s10 = sphi %s3004_s10, %s4982_s10   ;;  %s2958_s9 = sphi %s3002_s9, %s4981_s9  }
   0x3   : > { %p27_p0 = scmp.ge.s32.totalorder %s25_s13, 2  ;;  %p2746_p1 = scmp.ge.s32.totalorder %s2966_s11, 1 }
   0x4   : > { %p105_p2 = scmp.lt.s32.totalorder %s2966_s11, 3  ;;  %p3027_p4 = scmp.eq.s32.totalorder %s2744_s12, 0 }
   0x5   : > { %s4984_s13 = smov (%p27_p0, %s25_s13), 0  ;;  %s118_s18 = sshll.u32 %s4878_s0, 4  ;;  %s119_s18 = int_to_ptr.vmem [resolvable:$true] %s118_s18 }
   0x6   : > { %p3023_p3 = pnand %p2746_p1, %p105_p2  ;;  %s2925_s19 = scalar_lea.vmem %s119_s18, 16 }
   0x7   : > { %p2926_p7 = scmp.ne.s32.totalorder %s119_s18, %s2925_s19  ;;  %p2933_p11 = scmp.lt.s32.totalorder %s119_s18, %s119_s18 }
   0x8   : > { %p2858_p5 = pneg %p3023_p3  ;;  %p2934_p12 = scmp.lt.s32.totalorder %s2925_s19, %s2925_s19 }
   0xa   : > { %p2859_p6 = pnand %p3027_p4, %p2858_p5  ;;  %p2935_p13 = por %p2934_p12, %p2933_p11 }
   0xc   : > { %p2927_p8 = pneg %p2859_p6 }
   0xe   : > { %p2928_p9 = pnand %p2927_p8, %p2926_p7 }
  0x10   : > { %p2929_p10 = pneg %p2928_p9 }
  0x12   : > { %p2936_p0 = pnand %p2935_p13, %p2929_p10 }
  0x14   : > { %2939 = shalt.err (!%p2936_p0)
}
  0x15   : > { %s2968_s20 = smov [#allocation5]   ;;  %143 = sbr.rel (%p3023_p3) target bundleno = 988 (0x3dc), region = 28 }
  0x16   : > { %2861 = dma.vmem_to_smem (!%p2859_p6), %s119_s18, 16, %s2968_s20, [#allocation6]  }
  0x1a   : > { %2953 = dma.done.wait (%p3027_p4), [#allocation6], 16  }
  0x1b   : > { %2955 = vsyncadd (%p3027_p4), [#allocation6], 4294967280 }
  0x1c   : > { %149 = sfence }
  0x1d   : > { %p169_p1 = scmp.lt.s32.totalorder %s2958_s9, 1  ;;  %vm186_vm0 = vcmask 1043456   ;;  %s2969_s25 = smov 80   ;;  %vm217_vm1 = vcmask 174080   ;;  %vm222_vm2 = vcmask 23552   ;;  %vm230_vm3 = vcmask 179352  }
  0x1e   : > { %s2970_s26 = smov 112   ;;  %s2971_s27 = smov 64   ;;  %v4882_v32 = vmov 0.0   ;;  %v2977_v47 = vmov 1983009808   ;;  %v4881_v49 = vlaneseq  ;;  %vm225_vm4 = vcmask 21504  }
  0x1f   : > { %s4986_s9 = smov (!%p169_p1, %s2958_s9), 1  ;;  %s2972_s28 = smov 96   ;;  %219 = vst.msk [vmem:[#allocation4 + $0x18] sm:$0x7] %vm217_vm1, %v4882_v32  ;;  %218 = vst.msk [vmem:[#allocation4] sm:$0x7] %vm217_vm1, %v4882_v32  ;;  %v284_v48 = vunpack.c.l.s4 %v2977_v47 }
  0x20   : > { %s2853_s21 = sshll.u32 %s4986_s9, 3  ;;  %s2973_s29 = smov 32   ;;  %228 = vst.msk [vmem:[#allocation4 + $0x20] sm:$0xff] %vm222_vm2, %v4882_v32  ;;  %224 = vst.msk [vmem:[#allocation4 + $0x8] sm:$0xff] %vm222_vm2, %v4882_v32  ;;  %v3147_v53 = vshrl.u32 %v4881_v49, 7  ;;  %vm233_vm5 = vcmask 177304  }
  0x21   : > { %s177_s24 = scalar_lea.vmem %s4879_s1, %s2853_s21  ;;  %s2974_s30 = smov 48   ;;  %220 = vst.msk [vmem:[#allocation4 + $0x13] sm:$0x7] %vm217_vm1, %v4882_v32  ;;  %221 = vst.msk [vmem:[#allocation4 + $0x2b] sm:$0x7] %vm217_vm1, %v4882_v32  ;;  %v285_v52 = vunpack.c.0.s8 %v284_v48  ;;  %vm388_vm6 = vcmask 154648  }
  0x22   : > { %v182_v0 = vld [vmem:[%s177_s24] sm:$0xff]  ;;  %s2975_s3 = smov 16   ;;  %227 = vst.msk [vmem:[#allocation4 + $0x18] sm:$0xff] %vm222_vm2, %v4882_v32  ;;  %223 = vst.msk [vmem:[#allocation4] sm:$0xff] %vm222_vm2, %v4882_v32  ;;  %v2978_v62 = vmov 1934713408  }
  0x23   : > { %v187_v1 = vsel %vm186_vm0, %v182_v0, 0.0  ;;  %v184_v2 = vcombine.high %v182_v0, %v182_v0  ;;  %v201_v16 = vsel %vm186_vm0, %v182_v0, -inf  ;;  %236 = vst.msk [vmem:[#allocation4 + $0x20] sm:$0xff] %vm230_vm3, %v4882_v32  ;;  %232 = vst.msk [vmem:[#allocation4 + $0x8] sm:$0xff] %vm230_vm3, %v4882_v32  ;;  %v3150_v57 = vsub.s32 %v285_v52, %v3147_v53  ;;  %s2979_s4 = smov 3   ;;  %s2809_s5 = sld [smem:[#allocation5 + $0x32]] }
  0x24   : > { %v188_v3 = vrot.slane %v187_v1, 4  ;;  %v202_v18 = vrot.slane %v201_v16, 4  ;;  %235 = vst.msk [vmem:[#allocation4 + $0x18] sm:$0xff] %vm230_vm3, %v4882_v32  ;;  %231 = vst.msk [vmem:[#allocation4] sm:$0xff] %vm230_vm3, %v4882_v32  ;;  %v316_v63 = vunpack.c.l.s4 %v2978_v62  ;;  %s3195_s6 = sld [smem:[#allocation5 + $0x33]]  ;;  %s2980_s12 = smov 127  }
  0x25   : > { %v194_v4 = vsel %vm186_vm0, %v184_v2, 0.0  ;;  %v208_v22 = vsel %vm186_vm0, %v184_v2, -inf  ;;  %4896 = vst [vmem:[#allocation8_spill] sm:$0xff] %v3147_v53  ;;  %4897 = vst [vmem:[#allocation9_spill] sm:$0xff] %v3150_v57  ;;  %s3198_s7 = sld [smem:[#allocation5 + $0x1]]  ;;  %s2981_s15 = smov 126  }
  0x26   : > { %v189_v5 = vadd.f32 %v188_v3, %v187_v1  ;;  %v195_v6 = vrot.slane %v194_v4, 4  ;;  %v203_v20 = vmax.f32 %v201_v16, %v202_v18  ;;  %v209_v24 = vrot.slane %v208_v22, 4  ;;  %229 = vst.msk [vmem:[#allocation4 + $0x28] sm:$0x3f] %vm225_vm4, %v4882_v32  ;;  %226 = vst.msk [vmem:[#allocation4 + $0x10] sm:$0x3f] %vm225_vm4, %v4882_v32 }
  0x27   : > { %237 = vst.msk [vmem:[#allocation4 + $0x28] sm:$0x3f] %vm233_vm5, %v4882_v32  ;;  %234 = vst.msk [vmem:[#allocation4 + $0x10] sm:$0x3f] %vm233_vm5, %v4882_v32  ;;  %s3204_s8 = sld [smem:[#allocation5 + $0x2]]  ;;  %s2982_s20 = smov 125  }
  0x28   : > { %v190_v7 = vrot.slane %v189_v5, 2  ;;  %v196_v8 = vadd.f32 %v195_v6, %v194_v4  ;;  %v204_v21 = vrot.slane %v203_v20, 2  ;;  %v210_v26 = vmax.f32 %v208_v22, %v209_v24  ;;  %s3212_s14 = sld [smem:[#allocation5 + $0x3]]  ;;  %s2983_s22 = smov 124  }
  0x29   : > { %s3218_s16 = sld [smem:[#allocation5 + $0x4]]  ;;  %s2984_s24 = smov 123   ;;  %vm561_vm7 = vcmask 1046528   ;;  %vm579_vm8 = vcmask 1045504   ;;  %vm597_vm9 = vcmask 1044480   ;;  %vm632_vm10 = vcmask 1042432  }
  0x2a   : > { %v191_v9 = vadd.f32 %v190_v7, %v189_v5  ;;  %v197_v10 = vrot.slane %v196_v8, 2  ;;  %v205_v23 = vmax.f32 %v203_v20, %v204_v21  ;;  %v211_v28 = vrot.slane %v210_v26, 2  ;;  %s3226_s17 = sld [smem:[#allocation5 + $0x5]] }
  0x2b   : > { %s2810_s18 = sld [smem:[#allocation5 + $0x39]]  ;;  %vm650_vm11 = vcmask 1041408   ;;  %vm2617_vm12 = vcmask 130048   ;;  %vm2619_vm13 = vcmask 261120   ;;  %vm2621_vm14 = vcmask 392192  }
  0x2c   : > { %v192_v11 = vrot.slane %v191_v9, 1  ;;  %v198_v13 = vadd.f32 %v197_v10, %v196_v8  ;;  %v206_v25 = vrot.slane %v205_v23, 1  ;;  %v212_v29 = vmax.f32 %v210_v26, %v211_v28  ;;  %s3235_s19 = sld [smem:[#allocation5 + $0x6]] }
  0x2d   : > { %s2811_s21 = sld [smem:[#allocation5 + $0x40]]  ;;  %vm2623_vm15 = vcmask 523264   ;;  %vm2627_vm1 = vcmask 785408   ;;  %vm2629_vm2 = vcmask 916480  }
  0x2e   : > { %v193_v12 = vadd.f32 %v192_v11, %v191_v9  ;;  %v199_v15 = vrot.slane %v198_v13, 1  ;;  %v3088_v27 = vmax.f32 %v205_v23, %v206_v25  ;;  %v213_v30 = vrot.slane %v212_v29, 1  ;;  %s2812_s23 = sld [smem:[#allocation5 + $0x47]] }
  0x2f   : > { %v317_v9 = vunpack.c.0.s8 %v316_v63 }
  0x30   : > { %v3054_v14 = vmul.f32 0.25, %v193_v12  ;;  %v200_v17 = vadd.f32 %v199_v15, %v198_v13  ;;  %v3102_v31 = vmax.f32 %v212_v29, %v213_v30 }
  0x31   : > { %v3163_v21 = vsub.s32 %v317_v9, %v3147_v53 }
  0x32   : > { %245 = vrot.lane.b32.xlu1 %v3054_v14, %s2969_s25  ;;  %239 = vrot.lane.b32.xlu0 %v3054_v14, %s2970_s26  ;;  %v3069_v19 = vmul.f32 0.25, %v200_v17 }
  0x33   : > { %4898 = vst [vmem:[#allocation10_spill] sm:$0xff] %v3163_v21 }
  0x36   : > { %248 = vrot.lane.b32.xlu1 %v3054_v14, %s2971_s27  ;;  %242 = vrot.lane.b32.xlu0 %v3054_v14, %s2972_s28 }
  0x3a   : > { %254 = vrot.lane.b32.xlu1 %v3054_v14, %s2973_s29  ;;  %251 = vrot.lane.b32.xlu0 %v3054_v14, %s2974_s30 }
  0x3e   : > { %257 = vrot.lane.b32.xlu0 %v3054_v14, %s2975_s3  ;;  %261 = vrot.lane.b32.xlu1 %v3069_v19, %s2970_s26 }
  0x42   : > { %264 = vrot.lane.b32.xlu0 %v3069_v19, %s2972_s28  ;;  %267 = vrot.lane.b32.xlu1 %v3069_v19, %s2969_s25 }
  0x46   : > { %270 = vrot.lane.b32.xlu0 %v3069_v19, %s2971_s27  ;;  %273 = vrot.lane.b32.xlu1 %v3069_v19, %s2974_s30 }
  0x4a   : > { %276 = vrot.lane.b32.xlu0 %v3069_v19, %s2973_s29  ;;  %279 = vrot.lane.b32.xlu1 %v3069_v19, %s2975_s3 }
  0x4e   : > { %392 = vrot.lane.b32.xlu0 %v3088_v27, %s2970_s26  ;;  %395 = vrot.lane.b32.xlu1 %v3088_v27, %s2972_s28 }
  0x52   : > { %398 = vrot.lane.b32.xlu0 %v3088_v27, %s2969_s25  ;;  %401 = vrot.lane.b32.xlu1 %v3088_v27, %s2971_s27 }
  0x56   : > { %404 = vrot.lane.b32.xlu0 %v3088_v27, %s2974_s30  ;;  %407 = vrot.lane.b32.xlu1 %v3088_v27, %s2973_s29 }
  0x5a   : > { %410 = vrot.lane.b32.xlu0 %v3088_v27, %s2975_s3  ;;  %414 = vrot.lane.b32.xlu1 %v3102_v31, %s2970_s26 }
  0x5e   : > { %417 = vrot.lane.b32.xlu0 %v3102_v31, %s2972_s28  ;;  %420 = vrot.lane.b32.xlu1 %v3102_v31, %s2969_s25 }
  0x62   : > { %423 = vrot.lane.b32.xlu0 %v3102_v31, %s2971_s27  ;;  %426 = vrot.lane.b32.xlu1 %v3102_v31, %s2974_s30 }
  0x66   : > { %429 = vrot.lane.b32.xlu0 %v3102_v31, %s2973_s29  ;;  %432 = vrot.lane.b32.xlu1 %v3102_v31, %s2975_s3 }
  0xa4   : > { %v246_v33 = vpop.permute.xlu1 %245  ;;  %v240_v34 = vpop.permute.xlu0 %239 }
  0xa5   : > { %v290_v4 = vcombine.low %v240_v34, %v246_v33 }
  0xa7   : > { %v297_v16 = vrot.slane %v290_v4, %v3150_v57  ;;  %v1752_v4 = vstv %s3195_s6  ;;  %s2814_s6 = sld [smem:[#allocation5 + $0x55]] }
  0xa8   : > { %v249_v35 = vpop.permute.xlu1 %248  ;;  %v243_v36 = vpop.permute.xlu0 %242 }
  0xa9   : > { %v282_v0 = vcombine.low %v3054_v14, %v243_v36 }
  0xab   : > { %v289_v11 = vrot.slane %v282_v0, %v3150_v57 }
  0xac   : > { %v255_v37 = vpop.permute.xlu1 %254  ;;  %v252_v38 = vpop.permute.xlu0 %251 }
  0xad   : > { %v298_v1 = vcombine.low %v249_v35, %v255_v37  ;;  %v314_v23 = vcombine.low %v289_v11, %v297_v16  ;;  %v801_v11 = vstv %s3204_s8  ;;  %s2817_s8 = sld [smem:[#allocation5 + $0x3a]] }
  0xaf   : > { %v305_v12 = vrot.slane %v298_v1, %v3150_v57  ;;  %v321_v36 = vrot.slane %v314_v23, %v3163_v21  ;;  %v1612_v1 = vstv %s2809_s5  ;;  %s2985_s5 = smov 122  }
  0xb0   : > { %v258_v39 = vpop.permute.xlu0 %257  ;;  %v3132_v40 = vpop.permute.xlu1 %261 }
  0xb1   : > { %v306_v58 = vcombine.low %v252_v38, %v258_v39 }
  0xb3   : > { %v313_v5 = vrot.slane %v306_v58, %v3150_v57 }
  0xb4   : > { %v3134_v41 = vpop.permute.xlu0 %264  ;;  %v3136_v42 = vpop.permute.xlu1 %267 }
  0xb5   : > { %v322_v17 = vcombine.low %v305_v12, %v313_v5  ;;  %v331_v35 = vcombine.low %v3069_v19, %v3134_v41  ;;  %v339_v37 = vcombine.low %v3132_v40, %v3136_v42 }
  0xb7   : > { %v329_v30 = vrot.slane %v322_v17, %v3163_v21  ;;  %v338_v41 = vrot.slane %v331_v35, %v3150_v57 }
  0xb8   : > { %v3138_v43 = vpop.permute.xlu0 %270  ;;  %v3140_v44 = vpop.permute.xlu1 %273 }
  0xbc   : > { %v3142_v45 = vpop.permute.xlu0 %276  ;;  %v3144_v46 = vpop.permute.xlu1 %279 }
  0xbd   : > { %v347_v33 = vcombine.low %v3138_v43, %v3142_v45  ;;  %v355_v34 = vcombine.low %v3140_v44, %v3144_v46  ;;  %v330_v45 = vcombine.low %v321_v36, %v329_v30 }
  0xbf   : > { %v354_v46 = vrot.slane %v347_v33, %v3150_v57  ;;  %v362_v47 = vrot.slane %v355_v34, %v3150_v57 }
  0xc0   : > { %v393_v50 = vpop.permute.xlu0 %392  ;;  %v396_v51 = vpop.permute.xlu1 %395 }
  0xc1   : > { %v435_v59 = vcombine.low %v3088_v27, %v396_v51  ;;  %v371_v52 = vcombine.low %v354_v46, %v362_v47 }
  0xc3   : > { %v442_v6 = vrot.slane %v435_v59, %v3150_v57 }
  0xc4   : > { %v399_v54 = vpop.permute.xlu0 %398  ;;  %v402_v55 = vpop.permute.xlu1 %401 }
  0xc5   : > { %v443_v56 = vcombine.low %v393_v50, %v399_v54  ;;  %v346_v50 = vrot.slane %v339_v37, %v3150_v57 }
  0xc7   : > { %v450_v2 = vrot.slane %v443_v56, %v3150_v57 }
  0xc8   : > { %v405_v60 = vpop.permute.xlu0 %404  ;;  %v408_v61 = vpop.permute.xlu1 %407 }
  0xc9   : > { %v451_v3 = vcombine.low %v402_v55, %v408_v61  ;;  %v467_v13 = vcombine.low %v442_v6, %v450_v2  ;;  %v363_v55 = vcombine.low %v338_v41, %v346_v50 }
  0xcb   : > { %v458_v14 = vrot.slane %v451_v3, %v3150_v57  ;;  %v474_v24 = vrot.slane %v467_v13, %v3163_v21  ;;  %v370_v61 = vrot.slane %v363_v55, %v3163_v21 }
  0xcc   : > { %v411_v7 = vpop.permute.xlu0 %410  ;;  %v415_v8 = vpop.permute.xlu1 %414 }
  0xcd   : > { %v459_v10 = vcombine.low %v405_v60, %v411_v7  ;;  %v378_v60 = vrot.slane %v371_v52, %v3163_v21 }
  0xcf   : > { %v466_v15 = vrot.slane %v459_v10, %v3150_v57  ;;  %v379_v62 = vcombine.low %v370_v61, %v378_v60 }
  0xd0   : > { %v418_v18 = vpop.permute.xlu0 %417  ;;  %v421_v20 = vpop.permute.xlu1 %420 }
  0xd1   : > { %v475_v22 = vcombine.low %v458_v14, %v466_v15  ;;  %v484_v25 = vcombine.low %v3102_v31, %v418_v18  ;;  %v492_v26 = vcombine.low %v415_v8, %v421_v20  ;;  %v661_v8 = vstv %s3198_s7  ;;  %s2815_s7 = sld [smem:[#allocation5 + $0x5c]] }
  0xd2   : > { %v941_v15 = vstv %s3212_s14  ;;  %v1081_v20 = vstv %s3218_s16  ;;  %s2818_s14 = sld [smem:[#allocation5 + $0x41]] }
  0xd3   : > { %v482_v27 = vrot.slane %v475_v22, %v3163_v21  ;;  %v491_v38 = vrot.slane %v484_v25, %v3150_v57  ;;  %v499_v39 = vrot.slane %v492_v26, %v3150_v57  ;;  %s2819_s16 = sld [smem:[#allocation5 + $0x48]] }
  0xd4   : > { %v424_v28 = vpop.permute.xlu0 %423  ;;  %v427_v29 = vpop.permute.xlu1 %426 }
  0xd5   : > { %v483_v31 = vcombine.low %v474_v24, %v482_v27  ;;  %v516_v40 = vcombine.low %v491_v38, %v499_v39  ;;  %v1221_v24 = vstv %s3226_s17  ;;  %v1626_v27 = vstv %s2810_s18  ;;  %s2820_s17 = sld [smem:[#allocation5 + $0x4f]] }
  0xd6   : > { %s2761_s18 = sld [smem:[#allocation5 + $0x8]] }
  0xd7   : > { %535 = vrot.lane.b32.xlu0 %v483_v31, %s2979_s4  ;;  %v523_v56 = vrot.slane %v516_v40, %v3163_v21  ;;  %v1647_v31 = vstv %s2811_s21  ;;  %s2763_s21 = sld [smem:[#allocation5 + $0x16]] }
  0xd8   : > { %v430_v43 = vpop.permute.xlu0 %429  ;;  %v433_v44 = vpop.permute.xlu1 %432 }
  0xd9   : > { %v500_v48 = vcombine.low %v424_v28, %v430_v43  ;;  %v508_v19 = vcombine.low %v427_v29, %v433_v44  ;;  %v1361_v28 = vstv %s3235_s19  ;;  %v1668_v43 = vstv %s2812_s23  ;;  %s2762_s19 = sld [smem:[#allocation5 + $0xf]] }
  0xda   : > { %s2764_s23 = sld [smem:[#allocation5 + $0x1d]] }
  0xdb   : > { %v507_v42 = vrot.slane %v500_v48, %v3150_v57  ;;  %v515_v51 = vrot.slane %v508_v19, %v3150_v57  ;;  %382 = vrot.lane.b32.xlu0 %v330_v45, %s2979_s4 }
  0xdd   : > { %v524_v54 = vcombine.low %v507_v42, %v515_v51 }
  0xdf   : > { %v531_v58 = vrot.slane %v524_v54, %v3163_v21 }
  0xe1   : > { %v532_v59 = vcombine.low %v523_v56, %v531_v58  ;;  %v1710_v56 = vstv %s2814_s6  ;;  %s2766_s6 = sld [smem:[#allocation5 + $0x2b]] }
  0xe3   : > { %537 = vrot.lane.b32.xlu1 %v532_v59, %s2979_s4 }
  0xe7   : > { %384 = vrot.lane.b32.xlu1 %v379_v62, %s2979_s4  ;;  %s2813_s4 = sld [smem:[#allocation5 + $0x4e]] }
  0xed   : > { %v1689_v50 = vstv %s2813_s4  ;;  %s2765_s4 = sld [smem:[#allocation5 + $0x24]] }
 0x149   : > { %v536_v63 = vpop.permute.xlu0 %535 }
 0x14a   : > { %542 = vst.msk [vmem:[#allocation4 + $0x1b] sm:$0xff] %vm388_vm6, %v536_v63 }
 0x14d   : > { %v383_v0 = vpop.permute.xlu0 %382 }
 0x14e   : > { %389 = vst.msk [vmem:[#allocation4 + $0x3] sm:$0xff] %vm388_vm6, %v383_v0 }
 0x151   : > { %v3200_v2 = vld [vmem:[#allocation4 + $0x18] sm:$0xff] }
 0x152   : > { %v1613_v3 = vmul.f32 %v1612_v1, %v3200_v2  ;;  %v1753_v6 = vmul.f32 %v1752_v4, %v3200_v2  ;;  %v1627_v30 = vmul.f32 %v1626_v27, %v3200_v2  ;;  %v1648_v38 = vmul.f32 %v1647_v31, %v3200_v2 }
 0x153   : > { %v1669_v19 = vmul.f32 %v1668_v43, %v3200_v2  ;;  %v1690_v55 = vmul.f32 %v1689_v50, %v3200_v2 }
 0x154   : > { %1617 = vrot.lane.b32.xlu0 %v1613_v3, %s2980_s12  ;;  %v1633_v37 = vrot.slane %v1627_v30, 1  ;;  %v1654_v48 = vrot.slane %v1648_v38, 2  ;;  %v1731_v3 = vstv %s2815_s7  ;;  %v1808_v38 = vstv %s2819_s16  ;;  %s2768_s7 = sld [smem:[#allocation5 + $0x9]] }
 0x155   : > { %v538_v5 = vpop.permute.xlu1 %537  ;;  %v3209_v7 = vld [vmem:[#allocation4] sm:$0xff]  ;;  %v1675_v54 = vrot.slane %v1669_v19, 3  ;;  %v1696_v0 = vrot.slane %v1690_v55, 4  ;;  %v1829_v19 = vstv %s2820_s17  ;;  %s2771_s16 = sld [smem:[#allocation5 + $0x1e]] }
 0x156   : > { %543 = vst.msk [vmem:[#allocation4 + $0x23] sm:$0xff] %vm388_vm6, %v538_v5  ;;  %v662_v10 = vmul.f32 %v661_v8, %v3209_v7  ;;  %v802_v13 = vmul.f32 %v801_v11, %v3209_v7  ;;  %v942_v16 = vmul.f32 %v941_v15, %v3209_v7  ;;  %v1082_v22 = vmul.f32 %v1081_v20, %v3209_v7  ;;  %s2772_s17 = sld [smem:[#allocation5 + $0x25]] }
 0x157   : > { %v1222_v25 = vmul.f32 %v1221_v24, %v3209_v7  ;;  %v1362_v33 = vmul.f32 %v1361_v28, %v3209_v7 }
 0x158   : > { %1757 = vrot.lane.b32.xlu0 %v1753_v6, %s2981_s15 }
 0x159   : > { %v385_v9 = vpop.permute.xlu1 %384 }
 0x15a   : > { %390 = vst.msk [vmem:[#allocation4 + $0xb] sm:$0xff] %vm388_vm6, %v385_v9 }
 0x15c   : > { %666 = vrot.lane.b32.xlu0 %v662_v10, %s2980_s12 }
 0x15d   : > { %v3221_v12 = vld [vmem:[#allocation4 + $0x20] sm:$0xff]  ;;  %v3265_v47 = vld [vmem:[#allocation4 + $0x28] sm:$0x3f] }
 0x15e   : > { %v1614_v14 = vmul.f32 %v1612_v1, %v3221_v12  ;;  %v1754_v17 = vmul.f32 %v1752_v4, %v3221_v12  ;;  %v1628_v29 = vmul.f32 %v1626_v27, %v3221_v12  ;;  %v3254_v36 = vmul.f32 %v1647_v31, %v3221_v12 }
 0x15f   : > { %v3263_v46 = vmul.f32 %v1668_v43, %v3221_v12  ;;  %v3274_v51 = vmul.f32 %v1689_v50, %v3221_v12  ;;  %v1629_v52 = vmul.f32 %v1626_v27, %v3265_v47  ;;  %v3282_v59 = vmul.f32 %v1710_v56, %v3221_v12 }
 0x160   : > { %806 = vrot.lane.b32.xlu0 %v802_v13, %s2981_s15  ;;  %1619 = vrot.lane.b32.xlu1 %v1614_v14, %s2980_s12  ;;  %v1634_v35 = vrot.slane %v1628_v29, 1  ;;  %v1655_v45 = vrot.slane %v3254_v36, 2  ;;  %v1650_v63 = vmul.f32 %v1647_v31, %v3265_v47  ;;  %v1711_v1 = vmul.f32 %v1710_v56, %v3200_v2 }
 0x161   : > { %v3232_v18 = vld [vmem:[#allocation4 + $0x8] sm:$0xff]  ;;  %v1676_v42 = vrot.slane %v3263_v46, 3  ;;  %v1697_v61 = vrot.slane %v3274_v51, 4  ;;  %v1636_v62 = vrot.slane %v1629_v52, 1  ;;  %v3291_v4 = vmul.f32 %v1731_v3, %v3221_v12 }
 0x162   : > { %v663_v23 = vmul.f32 %v661_v8, %v3232_v18  ;;  %v803_v26 = vmul.f32 %v801_v11, %v3232_v18  ;;  %v943_v34 = vmul.f32 %v941_v15, %v3232_v18  ;;  %v1083_v39 = vmul.f32 %v1081_v20, %v3232_v18 }
 0x163   : > { %v1635_v44 = vsel %vm561_vm7, %v1633_v37, %v1634_v35  ;;  %v1223_v41 = vmul.f32 %v1221_v24, %v3232_v18  ;;  %v1656_v40 = vsel %vm579_vm8, %v1654_v48, %v1655_v45  ;;  %v1363_v58 = vmul.f32 %v1361_v28, %v3232_v18 }
 0x164   : > { %946 = vrot.lane.b32.xlu0 %v942_v16, %s2982_s20  ;;  %1759 = vrot.lane.b32.xlu1 %v1754_v17, %s2981_s15  ;;  %v1677_v60 = vsel %vm597_vm9, %v1675_v54, %v1676_v42  ;;  %v1671_v5 = vmul.f32 %v1668_v43, %v3265_v47  ;;  %v1698_v6 = vsel %vm186_vm0, %v1696_v0, %v1697_v61  ;;  %v1718_v9 = vrot.slane %v3282_v59, 5 }
 0x165   : > { %v1637_v8 = vsel %vm561_vm7, %v1634_v35, %v1636_v62  ;;  %v1657_v10 = vrot.slane %v1650_v63, 2  ;;  %v1717_v11 = vrot.slane %v1711_v1, 5  ;;  %v1732_v13 = vmul.f32 %v1731_v3, %v3200_v2 }
 0x166   : > { %v1739_v14 = vrot.slane %v3291_v4, 6  ;;  %v1678_v15 = vrot.slane %v1671_v5, 3  ;;  %v1766_v16 = vstv %s2817_s8  ;;  %v1713_v28 = vmul.f32 %v1710_v56, %v3265_v47  ;;  %s2769_s8 = sld [smem:[#allocation5 + $0x10]] }
 0x167   : > { %v1719_v17 = vsel %vm632_vm10, %v1717_v11, %v1718_v9  ;;  %v1658_v20 = vsel %vm579_vm8, %v1655_v45, %v1657_v10  ;;  %v1738_v24 = vrot.slane %v1732_v13, 6  ;;  %v1734_v45 = vmul.f32 %v1731_v3, %v3265_v47 }
 0x168   : > { %1086 = vrot.lane.b32.xlu0 %v1082_v22, %s2983_s22  ;;  %668 = vrot.lane.b32.xlu1 %v663_v23, %s2980_s12  ;;  %v1768_v22 = vmul.f32 %v1766_v16, %v3221_v12  ;;  %v1692_v23 = vmul.f32 %v1689_v50, %v3265_v47  ;;  %v1679_v30 = vsel %vm597_vm9, %v1676_v42, %v1678_v15  ;;  %v1720_v37 = vrot.slane %v1713_v28, 5  ;;  %v3355_v15 = vld [vmem:[#allocation4 + $0x10] sm:$0x3f] }
 0x169   : > { %v1740_v29 = vsel %vm650_vm11, %v1738_v24, %v1739_v14  ;;  %v1809_v48 = vmul.f32 %v1808_v38, %v3200_v2  ;;  %v1769_v50 = vmul.f32 %v1766_v16, %v3265_v47  ;;  %v1741_v52 = vrot.slane %v1734_v45, 6 }
 0x16a   : > { %v1721_v42 = vsel %vm632_vm10, %v1718_v9, %v1720_v37  ;;  %v1830_v54 = vmul.f32 %v1829_v19, %v3200_v2  ;;  %v696_v0 = vstv %s2762_s19  ;;  %v717_v11 = vstv %s2763_s21  ;;  %s2775_s19 = sld [smem:[#allocation5 + $0xa]] }
 0x16b   : > { %v1815_v55 = vrot.slane %v1809_v48, 3  ;;  %v3344_v3 = vmul.f32 %v696_v0, %v3232_v18  ;;  %v697_v10 = vmul.f32 %v696_v0, %v3209_v7  ;;  %v718_v24 = vmul.f32 %v717_v11, %v3209_v7  ;;  %s2776_s21 = sld [smem:[#allocation5 + $0x11]] }
 0x16c   : > { %1226 = vrot.lane.b32.xlu0 %v1222_v25, %s2984_s24  ;;  %808 = vrot.lane.b32.xlu1 %v803_v26, %s2981_s15  ;;  %v1767_v25 = vmul.f32 %v1766_v16, %v3200_v2  ;;  %v1787_v26 = vstv %s2818_s14  ;;  %v1836_v63 = vrot.slane %v1830_v54, 4  ;;  %v815_v54 = vstv %s2768_s7  ;;  %s2770_s14 = sld [smem:[#allocation5 + $0x17]] }
 0x16d   : > { %v3309_v27 = vmul.f32 %v1787_v26, %v3221_v12  ;;  %v1788_v35 = vmul.f32 %v1787_v26, %v3200_v2  ;;  %v1790_v62 = vmul.f32 %v1787_v26, %v3265_v47  ;;  %v704_v13 = vrot.slane %v3344_v3, 2  ;;  %s2782_s7 = sld [smem:[#allocation5 + $0xb]] }
 0x16e   : > { %v1773_v31 = vrot.slane %v1767_v25, 1  ;;  %v738_v25 = vstv %s2764_s23  ;;  %s2778_s23 = sld [smem:[#allocation5 + $0x1f]] }
 0x16f   : > { %v1795_v36 = vrot.slane %v3309_v27, 2  ;;  %v1794_v46 = vrot.slane %v1788_v35, 2  ;;  %v3364_v26 = vmul.f32 %v738_v25, %v3232_v18 }
 0x170   : > { %1366 = vrot.lane.b32.xlu0 %v1362_v33, %s2985_s5  ;;  %948 = vrot.lane.b32.xlu1 %v943_v34, %s2982_s20  ;;  %v1774_v33 = vrot.slane %v1768_v22, 1  ;;  %v1699_v34 = vrot.slane %v1692_v23, 4  ;;  %v1832_v22 = vmul.f32 %v1829_v19, %v3265_v47  ;;  %v703_v23 = vrot.slane %v697_v10, 2 }
 0x172   : > { %v1700_v43 = vsel %vm186_vm0, %v1697_v61, %v1699_v34  ;;  %v705_v28 = vsel %vm579_vm8, %v703_v23, %v704_v13  ;;  %v724_v34 = vrot.slane %v718_v24, 3 }
 0x174   : > { %1638 = vrot.lane.b32.xlu0 %v1635_v44, %s2980_s12  ;;  %1088 = vrot.lane.b32.xlu1 %v1083_v39, %s2983_s22  ;;  %v1775_v39 = vsel %vm561_vm7, %v1773_v31, %v1774_v33  ;;  %v1810_v44 = vmul.f32 %v1808_v38, %v3221_v12  ;;  %v746_v31 = vrot.slane %v3364_v26, 4 }
 0x176   : > { %v1816_v51 = vrot.slane %v1810_v44, 3 }
 0x178   : > { %1659 = vrot.lane.b32.xlu0 %v1656_v40, %s2980_s12  ;;  %1228 = vrot.lane.b32.xlu1 %v1223_v41, %s2984_s24  ;;  %v3326_v41 = vmul.f32 %v1829_v19, %v3221_v12  ;;  %v1796_v40 = vsel %vm579_vm8, %v1794_v46, %v1795_v36  ;;  %v1776_v12 = vrot.slane %v1769_v50, 1  ;;  %v1817_v59 = vsel %vm597_vm9, %v1815_v55, %v1816_v51 }
 0x179   : > { %v780_v46 = vstv %s2766_s6  ;;  %s2780_s6 = sld [smem:[#allocation5 + $0x2d]] }
 0x17a   : > { %v1837_v56 = vrot.slane %v3326_v41, 4  ;;  %v1777_v4 = vsel %vm561_vm7, %v1774_v33, %v1776_v12  ;;  %v739_v33 = vmul.f32 %v738_v25, %v3209_v7  ;;  %v3383_v19 = vmul.f32 %v780_v46, %v3232_v18 }
 0x17c   : > { %1680 = vrot.lane.b32.xlu0 %v1677_v60, %s2980_s12  ;;  %1368 = vrot.lane.b32.xlu1 %v1363_v58, %s2985_s5  ;;  %v675_v58 = vstv %s2761_s18  ;;  %v1742_v60 = vsel %vm650_vm11, %v1739_v14, %v1741_v52  ;;  %v1838_v1 = vsel %vm186_vm0, %v1836_v63, %v1837_v56  ;;  %v3353_v14 = vmul.f32 %v717_v11, %v3232_v18  ;;  %s2773_s18 = sld [smem:[#allocation5 + $0x2c]] }
 0x17d   : > { %v677_v61 = vmul.f32 %v675_v58, %v3232_v18  ;;  %v676_v2 = vmul.f32 %v675_v58, %v3209_v7  ;;  %v678_v27 = vmul.f32 %v675_v58, %v3355_v15  ;;  %v745_v44 = vrot.slane %v739_v33, 4 }
 0x17e   : > { %v788_v55 = vrot.slane %v3383_v19, 6  ;;  %v836_v63 = vstv %s2769_s8  ;;  %v899_v33 = vstv %s2772_s17  ;;  %s2783_s8 = sld [smem:[#allocation5 + $0x12]] }
 0x17f   : > { %v683_v5 = vrot.slane %v677_v61, 1  ;;  %v682_v9 = vrot.slane %v676_v2, 1  ;;  %v685_v35 = vrot.slane %v678_v27, 1  ;;  %v747_v48 = vsel %vm186_vm0, %v745_v44, %v746_v31  ;;  %s2786_s17 = sld [smem:[#allocation5 + $0x27]] }
 0x180   : > { %1701 = vrot.lane.b32.xlu0 %v1698_v6, %s2980_s12  ;;  %1640 = vrot.lane.b32.xlu1 %v1637_v8, %s2980_s12  ;;  %v1797_v6 = vrot.slane %v1790_v62, 2  ;;  %v1811_v8 = vmul.f32 %v1808_v38, %v3265_v47  ;;  %v725_v47 = vrot.slane %v3353_v14, 3  ;;  %v816_v62 = vmul.f32 %v815_v54, %v3209_v7 }
 0x181   : > { %v684_v16 = vsel %vm561_vm7, %v682_v9, %v683_v5  ;;  %v686_v41 = vsel %vm561_vm7, %v683_v5, %v685_v35  ;;  %v857_v9 = vstv %s2770_s14  ;;  %s2784_s14 = sld [smem:[#allocation5 + $0x19]] }
 0x182   : > { %v726_v37 = vsel %vm597_vm9, %v724_v34, %v725_v47  ;;  %v920_v44 = vstv %s2773_s18  ;;  %s2787_s18 = sld [smem:[#allocation5 + $0x2e]] }
 0x184   : > { %1722 = vrot.lane.b32.xlu0 %v1719_v17, %s2980_s12  ;;  %1661 = vrot.lane.b32.xlu1 %v1658_v20, %s2980_s12  ;;  %v1798_v17 = vsel %vm579_vm8, %v1795_v36, %v1797_v6  ;;  %v1818_v20 = vrot.slane %v1811_v8, 3  ;;  %v759_v36 = vstv %s2765_s4  ;;  %v837_v6 = vmul.f32 %v836_v63, %v3209_v7  ;;  %s2779_s4 = sld [smem:[#allocation5 + $0x26]] }
 0x185   : > { %v760_v45 = vmul.f32 %v759_v36, %v3209_v7  ;;  %v762_v5 = vmul.f32 %v759_v36, %v3355_v15  ;;  %v822_v8 = vrot.slane %v816_v62, 1 }
 0x187   : > { %v766_v52 = vrot.slane %v760_v45, 5 }
 0x188   : > { %1743 = vrot.lane.b32.xlu0 %v1740_v29, %s2980_s12  ;;  %1682 = vrot.lane.b32.xlu1 %v1679_v30, %s2980_s12  ;;  %v1819_v29 = vsel %vm597_vm9, %v1816_v51, %v1818_v20  ;;  %v1839_v30 = vrot.slane %v1832_v22, 4  ;;  %v781_v51 = vmul.f32 %v780_v46, %v3209_v7  ;;  %v843_v20 = vrot.slane %v837_v6, 2 }
 0x189   : > { %v858_v22 = vmul.f32 %v857_v9, %v3209_v7 }
 0x18a   : > { %v1840_v38 = vsel %vm186_vm0, %v1837_v56, %v1839_v30  ;;  %v3392_v56 = vmul.f32 %v815_v54, %v3232_v18  ;;  %v787_v61 = vrot.slane %v781_v51, 6  ;;  %v955_v51 = vstv %s2775_s19  ;;  %s2789_s19 = sld [smem:[#allocation5 + $0xc]] }
 0x18c   : > { %1778 = vrot.lane.b32.xlu0 %v1775_v39, %s2981_s15  ;;  %1703 = vrot.lane.b32.xlu1 %v1700_v43, %s2980_s12  ;;  %v761_v39 = vmul.f32 %v759_v36, %v3232_v18  ;;  %v699_v43 = vmul.f32 %v696_v0, %v3355_v15  ;;  %v789_v2 = vsel %vm650_vm11, %v787_v61, %v788_v55  ;;  %v823_v3 = vrot.slane %v3392_v56, 1 }
 0x18d   : > { %v3402_v0 = vmul.f32 %v836_v63, %v3232_v18 }
 0x18e   : > { %v767_v50 = vrot.slane %v761_v39, 5 }
 0x18f   : > { %v844_v10 = vrot.slane %v3402_v0, 2 }
 0x190   : > { %1799 = vrot.lane.b32.xlu0 %v1796_v40, %s2981_s15  ;;  %1724 = vrot.lane.b32.xlu1 %v1721_v42, %s2980_s12  ;;  %v706_v40 = vrot.slane %v699_v43, 2  ;;  %v720_v42 = vmul.f32 %v717_v11, %v3355_v15  ;;  %v768_v12 = vsel %vm632_vm10, %v766_v52, %v767_v50  ;;  %v3412_v11 = vmul.f32 %v857_v9, %v3232_v18 }
 0x191   : > { %v845_v23 = vsel %vm579_vm8, %v843_v20, %v844_v10  ;;  %v900_v43 = vmul.f32 %v899_v33, %v3209_v7 }
 0x192   : > { %v707_v58 = vsel %vm579_vm8, %v704_v13, %v706_v40  ;;  %v824_v13 = vsel %vm561_vm7, %v822_v8, %v823_v3  ;;  %v865_v24 = vrot.slane %v3412_v11, 3  ;;  %v921_v40 = vmul.f32 %v920_v44, %v3209_v7 }
 0x194   : > { %1820 = vrot.lane.b32.xlu0 %v1817_v59, %s2981_s15  ;;  %1745 = vrot.lane.b32.xlu1 %v1742_v60, %s2980_s12  ;;  %v727_v59 = vrot.slane %v720_v42, 3  ;;  %v741_v60 = vmul.f32 %v738_v25, %v3355_v15  ;;  %v878_v25 = vstv %s2771_s16  ;;  %v906_v42 = vrot.slane %v900_v43, 5  ;;  %s2785_s16 = sld [smem:[#allocation5 + $0x20]] }
 0x195   : > { %v879_v30 = vmul.f32 %v878_v25, %v3209_v7 }
 0x197   : > { %v885_v39 = vrot.slane %v879_v30, 4 }
 0x198   : > { %1841 = vrot.lane.b32.xlu0 %v1838_v1, %s2981_s15  ;;  %1780 = vrot.lane.b32.xlu1 %v1777_v4, %s2981_s15  ;;  %v728_v1 = vsel %vm597_vm9, %v725_v47, %v727_v59  ;;  %v748_v4 = vrot.slane %v741_v60, 4  ;;  %v864_v47 = vrot.slane %v858_v22, 3  ;;  %v927_v59 = vrot.slane %v921_v40, 6 }
 0x199   : > { %v956_v60 = vmul.f32 %v955_v51, %v3209_v7 }
 0x19a   : > { %v749_v14 = vsel %vm186_vm0, %v746_v31, %v748_v4  ;;  %v866_v34 = vsel %vm597_vm9, %v864_v47, %v865_v24  ;;  %v3430_v31 = vmul.f32 %v899_v33, %v3232_v18  ;;  %v902_v4 = vmul.f32 %v899_v33, %v3355_v15 }
 0x19b   : > { %v958_v47 = vmul.f32 %v955_v51, %v3355_v15 }
 0x19c   : > { %687 = vrot.lane.b32.xlu0 %v684_v16, %s2980_s12  ;;  %1801 = vrot.lane.b32.xlu1 %v1798_v17, %s2981_s15  ;;  %v769_v16 = vrot.slane %v762_v5, 5  ;;  %v783_v17 = vmul.f32 %v780_v46, %v3355_v15  ;;  %v907_v45 = vrot.slane %v3430_v31, 5  ;;  %v3439_v46 = vmul.f32 %v920_v44, %v3232_v18 }
 0x19d   : > { %v962_v5 = vrot.slane %v956_v60, 1 }
 0x19e   : > { %v770_v26 = vsel %vm632_vm10, %v767_v50, %v769_v16  ;;  %v790_v27 = vrot.slane %v783_v17, 6  ;;  %v860_v50 = vmul.f32 %v857_v9, %v3355_v15  ;;  %v928_v52 = vrot.slane %v3439_v46, 6 }
 0x19f   : > { %v909_v16 = vrot.slane %v902_v4, 5  ;;  %v923_v17 = vmul.f32 %v920_v44, %v3355_v15 }
 0x1a0   : > { %708 = vrot.lane.b32.xlu0 %v705_v28, %s2980_s12  ;;  %1822 = vrot.lane.b32.xlu1 %v1819_v29, %s2981_s15  ;;  %v880_v28 = vmul.f32 %v878_v25, %v3232_v18  ;;  %v818_v29 = vmul.f32 %v815_v54, %v3355_v15  ;;  %v791_v35 = vsel %vm650_vm11, %v788_v55, %v790_v27 }
 0x1a1   : > { %v3449_v54 = vmul.f32 %v955_v51, %v3232_v18  ;;  %v908_v55 = vsel %vm632_vm10, %v906_v42, %v907_v45  ;;  %v929_v62 = vsel %vm650_vm11, %v927_v59, %v928_v52 }
 0x1a2   : > { %v886_v36 = vrot.slane %v880_v28, 4  ;;  %v910_v28 = vsel %vm632_vm10, %v907_v45, %v909_v16 }
 0x1a4   : > { %729 = vrot.lane.b32.xlu0 %v726_v37, %s2980_s12  ;;  %1843 = vrot.lane.b32.xlu1 %v1840_v38, %s2981_s15  ;;  %v825_v37 = vrot.slane %v818_v29, 1  ;;  %v839_v38 = vmul.f32 %v836_v63, %v3355_v15  ;;  %v963_v63 = vrot.slane %v3449_v54, 1  ;;  %v930_v29 = vrot.slane %v923_v17, 6 }
 0x1a6   : > { %v826_v19 = vsel %vm561_vm7, %v823_v3, %v825_v37  ;;  %v1039_v37 = vstv %s2779_s4  ;;  %s2793_s4 = sld [smem:[#allocation5 + $0x28]] }
 0x1a7   : > { %v3501_v43 = vmul.f32 %v1039_v37, %v3232_v18  ;;  %v1040_v46 = vmul.f32 %v1039_v37, %v3209_v7  ;;  %v1042_v17 = vmul.f32 %v1039_v37, %v3355_v15 }
 0x1a8   : > { %750 = vrot.lane.b32.xlu0 %v747_v48, %s2980_s12  ;;  %689 = vrot.lane.b32.xlu1 %v686_v41, %s2980_s12  ;;  %v887_v48 = vsel %vm186_vm0, %v885_v39, %v886_v36  ;;  %v846_v41 = vrot.slane %v839_v38, 2  ;;  %v931_v38 = vsel %vm650_vm11, %v928_v52, %v930_v29  ;;  %v965_v39 = vrot.slane %v958_v47, 1 }
 0x1a9   : > { %v1047_v51 = vrot.slane %v3501_v43, 5 }
 0x1aa   : > { %v847_v56 = vsel %vm579_vm8, %v844_v10, %v846_v41  ;;  %v964_v10 = vsel %vm561_vm7, %v962_v5, %v963_v63  ;;  %v966_v42 = vsel %vm561_vm7, %v963_v63, %v965_v39 }
 0x1ac   : > { %771 = vrot.lane.b32.xlu0 %v768_v12, %s2980_s12  ;;  %710 = vrot.lane.b32.xlu1 %v707_v58, %s2980_s12  ;;  %v867_v12 = vrot.slane %v860_v50, 3  ;;  %v881_v58 = vmul.f32 %v878_v25, %v3355_v15 }
 0x1ae   : > { %v868_v0 = vsel %vm597_vm9, %v865_v24, %v867_v12  ;;  %v1095_v12 = vstv %s2782_s7  ;;  %s3671_s7 = sld [smem:[#allocation5 + $0xd]] }
 0x1af   : > { %v1096_v4 = vmul.f32 %v1095_v12, %v3209_v7 }
 0x1b0   : > { %792 = vrot.lane.b32.xlu0 %v789_v2, %s2980_s12  ;;  %731 = vrot.lane.b32.xlu1 %v728_v1, %s2980_s12  ;;  %v976_v2 = vstv %s2776_s21  ;;  %v888_v1 = vrot.slane %v881_v58, 4  ;;  %s2790_s21 = sld [smem:[#allocation5 + $0x13]] }
 0x1b1   : > { %v3463_v3 = vmul.f32 %v976_v2, %v3232_v18  ;;  %v977_v6 = vmul.f32 %v976_v2, %v3209_v7  ;;  %v979_v44 = vmul.f32 %v976_v2, %v3355_v15 }
 0x1b3   : > { %v983_v22 = vrot.slane %v977_v6, 2  ;;  %v986_v52 = vrot.slane %v979_v44, 2 }
 0x1b4   : > { %827 = vrot.lane.b32.xlu0 %v824_v13, %s2981_s15  ;;  %752 = vrot.lane.b32.xlu1 %v749_v14, %s2980_s12  ;;  %v889_v13 = vsel %vm186_vm0, %v886_v36, %v888_v1  ;;  %v984_v14 = vrot.slane %v3463_v3, 2 }
 0x1b6   : > { %v985_v27 = vsel %vm579_vm8, %v983_v22, %v984_v14  ;;  %v987_v2 = vsel %vm579_vm8, %v984_v14, %v986_v52 }
 0x1b8   : > { %848 = vrot.lane.b32.xlu0 %v845_v23, %s2981_s15  ;;  %773 = vrot.lane.b32.xlu1 %v770_v26, %s2980_s12  ;;  %v1018_v23 = vstv %s2778_s23  ;;  %s2792_s23 = sld [smem:[#allocation5 + $0x21]] }
 0x1b9   : > { %v3485_v26 = vmul.f32 %v1018_v23, %v3232_v18  ;;  %v1019_v33 = vmul.f32 %v1018_v23, %v3209_v7  ;;  %v1021_v1 = vmul.f32 %v1018_v23, %v3355_v15  ;;  %v1137_v23 = vstv %s2784_s14  ;;  %s3693_s14 = sld [smem:[#allocation5]] }
 0x1bb   : > { %v1026_v36 = vrot.slane %v3485_v26, 4  ;;  %v1025_v45 = vrot.slane %v1019_v33, 4  ;;  %v1028_v14 = vrot.slane %v1021_v1, 4  ;;  %v1049_v33 = vrot.slane %v1042_v17, 5 }
 0x1bc   : > { %869 = vrot.lane.b32.xlu0 %v866_v34, %s2981_s15  ;;  %794 = vrot.lane.b32.xlu1 %v791_v35, %s2980_s12  ;;  %s2777_s12 = sld [smem:[#allocation5 + $0x18]] }
 0x1bd   : > { %v1027_v50 = vsel %vm186_vm0, %v1025_v45, %v1026_v36  ;;  %v1029_v47 = vsel %vm186_vm0, %v1026_v36, %v1028_v14  ;;  %v1158_v45 = vstv %s2785_s16  ;;  %s3700_s16 = sld [smem:[#allocation5 + $0x7]] }
 0x1c0   : > { %890 = vrot.lane.b32.xlu0 %v887_v48, %s2981_s15  ;;  %829 = vrot.lane.b32.xlu1 %v826_v19, %s2981_s15  ;;  %v1060_v48 = vstv %s2780_s6  ;;  %s2794_s6 = sld [smem:[#allocation5 + $0x2f]] }
 0x1c1   : > { %v3513_v40 = vmul.f32 %v1060_v48, %v3232_v18 }
 0x1c2   : > { %v997_v8 = vstv %s2777_s12  ;;  %s2791_s12 = sld [smem:[#allocation5 + $0x1a]] }
 0x1c3   : > { %v3473_v11 = vmul.f32 %v997_v8, %v3232_v18  ;;  %v998_v20 = vmul.f32 %v997_v8, %v3209_v7  ;;  %v1000_v54 = vmul.f32 %v997_v8, %v3355_v15  ;;  %v1068_v60 = vrot.slane %v3513_v40, 6 }
 0x1c4   : > { %911 = vrot.lane.b32.xlu0 %v908_v55, %s2981_s15  ;;  %850 = vrot.lane.b32.xlu1 %v847_v56, %s2981_s15  ;;  %v1061_v55 = vmul.f32 %v1060_v48, %v3209_v7  ;;  %v1046_v56 = vrot.slane %v1040_v46, 5  ;;  %v1050_v46 = vsel %vm632_vm10, %v1047_v51, %v1049_v33 }
 0x1c5   : > { %v1005_v25 = vrot.slane %v3473_v11, 3  ;;  %v1004_v30 = vrot.slane %v998_v20, 3  ;;  %v1116_v11 = vstv %s2783_s8  ;;  %v1102_v20 = vrot.slane %v1096_v4, 1  ;;  %s3691_s8 = sld [smem:[#allocation5 + $0x14]] }
 0x1c6   : > { %v3457_v61 = vpop.permute.xlu0 %1617  ;;  %v1048_v63 = vsel %vm632_vm10, %v1046_v56, %v1047_v51  ;;  %v1067_v3 = vrot.slane %v1061_v55, 6  ;;  %v3543_v16 = vmul.f32 %v1116_v11, %v3232_v18  ;;  %v1117_v22 = vmul.f32 %v1116_v11, %v3209_v7 }
 0x1c7   : > { %4899 = vst [vmem:[#allocation11_spill] sm:$0xff] %v3457_v61  ;;  %v1006_v35 = vsel %vm597_vm9, %v1004_v30, %v1005_v25  ;;  %v1179_v56 = vstv %s2786_s17  ;;  %s3705_s17 = sld [smem:[#allocation5 + $0x1b]] }
 0x1c8   : > { %932 = vrot.lane.b32.xlu0 %v929_v62, %s2981_s15  ;;  %871 = vrot.lane.b32.xlu1 %v868_v0, %s2981_s15  ;;  %v3527_v62 = vmul.f32 %v1095_v12, %v3232_v18  ;;  %v1007_v0 = vrot.slane %v1000_v54, 3  ;;  %v1069_v8 = vsel %vm650_vm11, %v1067_v3, %v1068_v60  ;;  %v1124_v30 = vrot.slane %v3543_v16, 2 }
 0x1c9   : > { %v1123_v37 = vrot.slane %v1117_v22, 2  ;;  %v1180_v1 = vmul.f32 %v1179_v56, %v3209_v7  ;;  %v1200_v3 = vstv %s2787_s18  ;;  %s3707_s18 = sld [smem:[#allocation5 + $0xe]] }
 0x1ca   : > { %v3469_v9 = vpop.permute.xlu0 %1757 }
 0x1cb   : > { %4900 = vst [vmem:[#allocation12_spill] sm:$0xff] %v3469_v9  ;;  %v1125_v36 = vsel %vm579_vm8, %v1123_v37, %v1124_v30  ;;  %v1186_v22 = vrot.slane %v1180_v1, 5  ;;  %v1161_v37 = vmul.f32 %v1158_v45, %v3355_v15 }
 0x1cc   : > { %967 = vrot.lane.b32.xlu0 %v964_v10, %s2982_s20  ;;  %892 = vrot.lane.b32.xlu1 %v889_v13, %s2981_s15  ;;  %v1103_v10 = vrot.slane %v3527_v62, 1  ;;  %v1008_v13 = vsel %vm597_vm9, %v1005_v25, %v1007_v0  ;;  %v3554_v25 = vmul.f32 %v1137_v23, %v3232_v18 }
 0x1ce   : > { %v3481_v24 = vpop.permute.xlu0 %666  ;;  %v1104_v29 = vsel %vm561_vm7, %v1102_v20, %v1103_v10  ;;  %v1145_v43 = vrot.slane %v3554_v25, 3  ;;  %v1201_v20 = vmul.f32 %v1200_v3, %v3209_v7 }
 0x1d0   : > { %988 = vrot.lane.b32.xlu0 %v985_v27, %s2982_s20  ;;  %913 = vrot.lane.b32.xlu1 %v910_v28, %s2981_s15  ;;  %v1063_v28 = vmul.f32 %v1060_v48, %v3355_v15  ;;  %v3571_v48 = vmul.f32 %v1158_v45, %v3232_v18 }
 0x1d2   : > { %v3493_v34 = vpop.permute.xlu0 %806  ;;  %v3495_v31 = vpop.permute.xlu1 %1619  ;;  %v1070_v44 = vrot.slane %v1063_v28, 6  ;;  %v1166_v62 = vrot.slane %v3571_v48, 4 }
 0x1d3   : > { %4901 = vst [vmem:[#allocation13_spill] sm:$0xff] %v3495_v31 }
 0x1d4   : > { %1009 = vrot.lane.b32.xlu0 %v1006_v35, %s2982_s20  ;;  %934 = vrot.lane.b32.xlu1 %v931_v38, %s2981_s15  ;;  %v1138_v35 = vmul.f32 %v1137_v23, %v3209_v7  ;;  %v1071_v51 = vsel %vm650_vm11, %v1068_v60, %v1070_v44  ;;  %v1207_v44 = vrot.slane %v1201_v20, 6 }
 0x1d6   : > { %v3507_v19 = vpop.permute.xlu0 %946  ;;  %v3509_v41 = vpop.permute.xlu1 %1759  ;;  %v1144_v40 = vrot.slane %v1138_v35, 3 }
 0x1d7   : > { %4902 = vst [vmem:[#allocation14_spill] sm:$0xff] %v3509_v41 }
 0x1d8   : > { %1030 = vrot.lane.b32.xlu0 %v1027_v50, %s2982_s20  ;;  %969 = vrot.lane.b32.xlu1 %v966_v42, %s2982_s20  ;;  %v1098_v50 = vmul.f32 %v1095_v12, %v3355_v15  ;;  %v1159_v42 = vmul.f32 %v1158_v45, %v3209_v7  ;;  %v1146_v55 = vsel %vm597_vm9, %v1144_v40, %v1145_v43  ;;  %v1256_v40 = vstv %s2790_s21  ;;  %s3725_s21 = sld [smem:[#allocation5 + $0x1c]] }
 0x1d9   : > { %v1168_v45 = vrot.slane %v1161_v37, 4 }
 0x1da   : > { %v3521_v58 = vpop.permute.xlu0 %1086  ;;  %v3523_v59 = vpop.permute.xlu1 %668  ;;  %v1105_v12 = vrot.slane %v1098_v50, 1  ;;  %v1165_v0 = vrot.slane %v1159_v42, 4 }
 0x1dc   : > { %1051 = vrot.lane.b32.xlu0 %v1048_v63, %s2982_s20  ;;  %990 = vrot.lane.b32.xlu1 %v987_v2, %s2982_s20  ;;  %v3585_v63 = vmul.f32 %v1179_v56, %v3232_v18  ;;  %v1119_v2 = vmul.f32 %v1116_v11, %v3355_v15  ;;  %v1167_v11 = vsel %vm186_vm0, %v1165_v0, %v1166_v62 }
 0x1dd   : > { %v1106_v14 = vsel %vm561_vm7, %v1103_v10, %v1105_v12 }
 0x1de   : > { %v3535_v5 = vpop.permute.xlu0 %1226  ;;  %v3537_v6 = vpop.permute.xlu1 %808  ;;  %v1187_v16 = vrot.slane %v3585_v63, 5  ;;  %v1126_v17 = vrot.slane %v1119_v2, 2  ;;  %v1257_v63 = vmul.f32 %v1256_v40, %v3209_v7  ;;  %v1277_v2 = vstv %s2791_s12  ;;  %s3729_s12 = sld [smem:[#allocation5 + $0x23]] }
 0x1df   : > { %v3638_v1 = vmul.f32 %v1277_v2, %v3232_v18 }
 0x1e0   : > { %1072 = vrot.lane.b32.xlu0 %v1069_v8, %s2982_s20  ;;  %1011 = vrot.lane.b32.xlu1 %v1008_v13, %s2982_s20  ;;  %v3596_v8 = vmul.f32 %v1200_v3, %v3232_v18  ;;  %v1140_v13 = vmul.f32 %v1137_v23, %v3355_v15  ;;  %v1188_v10 = vsel %vm632_vm10, %v1186_v22, %v1187_v16  ;;  %v1263_v20 = vrot.slane %v1257_v63, 2 }
 0x1e1   : > { %v1127_v33 = vsel %vm579_vm8, %v1124_v30, %v1126_v17  ;;  %v1278_v17 = vmul.f32 %v1277_v2, %v3209_v7 }
 0x1e2   : > { %v3549_v26 = vpop.permute.xlu0 %1366  ;;  %v3551_v27 = vpop.permute.xlu1 %948  ;;  %v1208_v23 = vrot.slane %v3596_v8, 6  ;;  %v1203_v8 = vmul.f32 %v1200_v3, %v3355_v15  ;;  %v1285_v3 = vrot.slane %v3638_v1, 3  ;;  %v3760_v1 = vstv %s3700_s16  ;;  %s3801_s16 = sld [smem:[#allocation5 + $0x5d]] }
 0x1e4   : > { %1107 = vrot.lane.b32.xlu0 %v1104_v29, %s2983_s22  ;;  %1032 = vrot.lane.b32.xlu1 %v1029_v47, %s2982_s20  ;;  %v1147_v29 = vrot.slane %v1140_v13, 3  ;;  %v1235_v47 = vstv %s2789_s19  ;;  %v1209_v50 = vsel %vm650_vm11, %v1207_v44, %v1208_v23  ;;  %v1169_v13 = vsel %vm186_vm0, %v1166_v62, %v1168_v45  ;;  %s3715_s19 = sld [smem:[#allocation5 + $0x15]] }
 0x1e5   : > { %v3613_v35 = vmul.f32 %v1235_v47, %v3232_v18  ;;  %v1238_v44 = vmul.f32 %v1235_v47, %v3355_v15 }
 0x1e6   : > { %v3563_v38 = vpop.permute.xlu0 %1638  ;;  %v3565_v39 = vpop.permute.xlu1 %1088  ;;  %v1148_v30 = vsel %vm597_vm9, %v1145_v43, %v1147_v29 }
 0x1e7   : > { %4903 = vst [vmem:[#allocation15_spill] sm:$0xff] %v3563_v38  ;;  %v1243_v42 = vrot.slane %v3613_v35, 1 }
 0x1e8   : > { %1128 = vrot.lane.b32.xlu0 %v1125_v36, %s2983_s22  ;;  %1053 = vrot.lane.b32.xlu1 %v1050_v46, %s2982_s20  ;;  %v1236_v36 = vmul.f32 %v1235_v47, %v3209_v7  ;;  %v1284_v7 = vrot.slane %v1278_v17, 3  ;;  %v1319_v47 = vstv %s2793_s4  ;;  %s3747_s4 = sld [smem:[#allocation5 + $0x2a]] }
 0x1e9   : > { %v3675_v63 = vmul.f32 %v1319_v47, %v3232_v18  ;;  %v1322_v32 = vmul.f32 %v1319_v47, %v3355_v15 }
 0x1ea   : > { %v3577_v52 = vpop.permute.xlu0 %1659  ;;  %v3579_v54 = vpop.permute.xlu1 %1228  ;;  %v1242_v12 = vrot.slane %v1236_v36, 1  ;;  %v3660_v36 = vld [vmem:[#allocation4] sm:$0xff] }
 0x1eb   : > { %4904 = vst [vmem:[#allocation16_spill] sm:$0xff] %v3577_v52  ;;  %v1329_v21 = vrot.slane %v1322_v32, 5  ;;  %v3807_v32 = vstv %s3725_s21  ;;  %s4085_s21 = sld [smem:[#allocation5 + $0x50]] }
 0x1ec   : > { %1149 = vrot.lane.b32.xlu0 %v1146_v55, %s2983_s22  ;;  %1074 = vrot.lane.b32.xlu1 %v1071_v51, %s2982_s20  ;;  %v3627_v55 = vmul.f32 %v1256_v40, %v3232_v18  ;;  %v1182_v51 = vmul.f32 %v1179_v56, %v3355_v15  ;;  %v1244_v56 = vsel %vm561_vm7, %v1242_v12, %v1243_v42  ;;  %v1245_v12 = vrot.slane %v1238_v44, 1 }
 0x1ee   : > { %v3591_v4 = vpop.permute.xlu0 %1680  ;;  %v3593_v60 = vpop.permute.xlu1 %1368 }
 0x1ef   : > { %4905 = vst [vmem:[#allocation17_spill] sm:$0xff] %v3591_v4  ;;  %4906 = vst [vmem:[#allocation18_spill] sm:$0xff] %v3593_v60 }
 0x1f0   : > { %1170 = vrot.lane.b32.xlu0 %v1167_v11, %s2983_s22  ;;  %1109 = vrot.lane.b32.xlu1 %v1106_v14, %s2983_s22  ;;  %v1264_v11 = vrot.slane %v3627_v55, 2  ;;  %v1189_v14 = vrot.slane %v1182_v51, 5 }
 0x1f2   : > { %v3605_v25 = vpop.permute.xlu0 %1701  ;;  %v3607_v28 = vpop.permute.xlu1 %1640  ;;  %v1265_v62 = vsel %vm579_vm8, %v1263_v20, %v1264_v11  ;;  %v1190_v35 = vsel %vm632_vm10, %v1187_v16, %v1189_v14  ;;  %v1286_v16 = vsel %vm597_vm9, %v1284_v7, %v1285_v3  ;;  %v1340_v14 = vstv %s2794_s6  ;;  %v3685_v20 = vld [vmem:[#allocation4 + $0x8] sm:$0xff]  ;;  %s3757_s6 = sld [smem:[#allocation5 + $0x29]] }
 0x1f3   : > { %4907 = vst [vmem:[#allocation19_spill] sm:$0xff] %v3605_v25  ;;  %4908 = vst [vmem:[#allocation20_spill] sm:$0xff] %v3607_v28  ;;  %v3914_v25 = vmul.f32 %v3685_v20, %v3807_v32 }
 0x1f4   : > { %1191 = vrot.lane.b32.xlu0 %v1188_v10, %s2983_s22  ;;  %1130 = vrot.lane.b32.xlu1 %v1127_v33, %s2983_s22  ;;  %v1210_v10 = vrot.slane %v1203_v8, 6  ;;  %v1298_v33 = vstv %s2792_s23  ;;  %v1259_v8 = vmul.f32 %v1256_v40, %v3355_v15  ;;  %s3745_s23 = sld [smem:[#allocation5 + $0x22]] }
 0x1f5   : > { %v3655_v37 = vmul.f32 %v1298_v33, %v3232_v18  ;;  %v1280_v18 = vmul.f32 %v1277_v2, %v3355_v15  ;;  %v1341_v2 = vmul.f32 %v3660_v36, %v1340_v14 }
 0x1f6   : > { %v3619_v46 = vpop.permute.xlu0 %1722  ;;  %v3621_v48 = vpop.permute.xlu1 %1661  ;;  %v1211_v55 = vsel %vm650_vm11, %v1208_v23, %v1210_v10  ;;  %v3688_v10 = vmul.f32 %v3685_v20, %v1340_v14  ;;  %v1266_v44 = vrot.slane %v1259_v8, 2 }
 0x1f7   : > { %4909 = vst [vmem:[#allocation21_spill] sm:$0xff] %v3619_v46  ;;  %4910 = vst [vmem:[#allocation22_spill] sm:$0xff] %v3621_v48  ;;  %v1306_v51 = vrot.slane %v3655_v37, 4  ;;  %v3804_v37 = vstv %s3715_s19  ;;  %v609_v46 = vmul.f32 %v3660_v36, %v3807_v32  ;;  %s4004_s19 = sld [smem:[#allocation5 + $0x42]] }
 0x1f8   : > { %1212 = vrot.lane.b32.xlu0 %v1209_v50, %s2983_s22  ;;  %1151 = vrot.lane.b32.xlu1 %v1148_v30, %s2983_s22  ;;  %v1299_v50 = vmul.f32 %v3660_v36, %v1298_v33 }
 0x1fa   : > { %v3633_v0 = vpop.permute.xlu0 %1743  ;;  %v3635_v43 = vpop.permute.xlu1 %1682  ;;  %v3819_v53 = vstv %s3745_s23  ;;  %s4132_s23 = sld [smem:[#allocation5 + $0x5e]] }
 0x1fb   : > { %4911 = vst [vmem:[#allocation23_spill] sm:$0xff] %v3633_v0  ;;  %4912 = vst [vmem:[#allocation24_spill] sm:$0xff] %v3635_v43 }
 0x1fc   : > { %1247 = vrot.lane.b32.xlu0 %v1244_v56, %s2984_s24  ;;  %1172 = vrot.lane.b32.xlu1 %v1169_v13, %s2983_s22  ;;  %v1305_v56 = vrot.slane %v1299_v50, 4  ;;  %v1320_v13 = vmul.f32 %v3660_v36, %v1319_v47  ;;  %v3771_v47 = vmul.f32 %v3685_v20, %v3760_v1 }
 0x1fe   : > { %v3647_v22 = vpop.permute.xlu0 %1778  ;;  %v3649_v29 = vpop.permute.xlu1 %1703  ;;  %v1307_v40 = vsel %vm186_vm0, %v1305_v56, %v1306_v51  ;;  %v1326_v7 = vrot.slane %v1320_v13, 5  ;;  %v1267_v56 = vsel %vm579_vm8, %v1264_v11, %v1266_v44 }
 0x1ff   : > { %4913 = vst [vmem:[#allocation25_spill] sm:$0xff] %v3647_v22  ;;  %4914 = vst [vmem:[#allocation26_spill] sm:$0xff] %v3649_v29  ;;  %v4928_v29 = vrot.slane %v3688_v10, 6  ;;  %v4929_v22 = vstv %s3693_s14 }
 0x200   : > { %1268 = vrot.lane.b32.xlu0 %v1265_v62, %s2984_s24  ;;  %1193 = vrot.lane.b32.xlu1 %v1190_v35, %s2983_s22  ;;  %v1246_v62 = vsel %vm561_vm7, %v1243_v42, %v1245_v12  ;;  %v4885_v35 = vrot.slane %v3675_v63, 5  ;;  %v4884_v42 = vrot.slane %v3688_v10, 6  ;;  %v1375_v12 = vstv %s3671_s7  ;;  %s3767_s7 = sld [smem:[#allocation5 + $0x56]] }
 0x201   : > { %v3722_v13 = vmul.f32 %v3685_v20, %v1375_v12  ;;  %v549_v28 = vmul.f32 %v3660_v36, %v4929_v22  ;;  %v591_v10 = vmul.f32 %v3660_v36, %v3804_v37 }
 0x202   : > { %v3663_v30 = vpop.permute.xlu0 %1799  ;;  %v3665_v45 = vpop.permute.xlu1 %1724  ;;  %v1328_v8 = vsel %vm632_vm10, %v1326_v7, %v4885_v35 }
 0x203   : > { %4915 = vst [vmem:[#allocation27_spill] sm:$0xff] %v3663_v30  ;;  %4916 = vst [vmem:[#allocation28_spill] sm:$0xff] %v3665_v45  ;;  %v3835_v45 = vstv %s3747_s4  ;;  %v598_v0 = vrot.slane %v591_v10, 3  ;;  %s4193_s4 = sld [smem:[#allocation5 + $0x35]] }
 0x204   : > { %1289 = vrot.lane.b32.xlu0 %v1286_v16, %s2984_s24  ;;  %1214 = vrot.lane.b32.xlu1 %v1211_v55, %s2983_s22  ;;  %v1287_v55 = vrot.slane %v1280_v18, 3  ;;  %v1347_v18 = vrot.slane %v1341_v2, 6  ;;  %v4891_v2 = vrot.slane %v3722_v13, 1 }
 0x206   : > { %v3681_v23 = vpop.permute.xlu0 %1820  ;;  %v3683_v17 = vpop.permute.xlu1 %1745  ;;  %v1288_v44 = vsel %vm597_vm9, %v1285_v3, %v1287_v55 }
 0x207   : > { %4917 = vst [vmem:[#allocation29_spill] sm:$0xff] %v3681_v23  ;;  %4918 = vst [vmem:[#allocation30_spill] sm:$0xff] %v3683_v17  ;;  %v4925_v17 = vrot.slane %v3675_v63, 5 }
 0x208   : > { %1310 = vrot.lane.b32.xlu0 %v1307_v40, %s2984_s24  ;;  %1249 = vrot.lane.b32.xlu1 %v1246_v62, %s2984_s24  ;;  %v1301_v40 = vmul.f32 %v1298_v33, %v3355_v15  ;;  %v1376_v62 = vmul.f32 %v3660_v36, %v1375_v12  ;;  %v1349_v33 = vsel %vm650_vm11, %v1347_v18, %v4884_v42 }
 0x20a   : > { %v3709_v50 = vpop.permute.xlu0 %1841  ;;  %v3711_v16 = vpop.permute.xlu1 %1780  ;;  %v1382_v3 = vrot.slane %v1376_v62, 1 }
 0x20b   : > { %4919 = vst [vmem:[#allocation31_spill] sm:$0xff] %v3709_v50  ;;  %4920 = vst [vmem:[#allocation32_spill] sm:$0xff] %v3711_v16 }
 0x20c   : > { %1331 = vrot.lane.b32.xlu0 %v1328_v8, %s2984_s24  ;;  %1270 = vrot.lane.b32.xlu1 %v1267_v56, %s2984_s24  ;;  %v3743_v8 = vstv %s3691_s8  ;;  %v1308_v56 = vrot.slane %v1301_v40, 4  ;;  %v3765_v40 = vstv %s3705_s17  ;;  %s3782_s8 = sld [smem:[#allocation5 + $0x30]]  ;;  %v1384_v42 = vsel %vm561_vm7, %v1382_v3, %v4891_v2 }
 0x20d   : > { %v3752_v49 = vmul.f32 %v3685_v20, %v3743_v8  ;;  %v1397_v55 = vmul.f32 %v3660_v36, %v3743_v8  ;;  %v3779_v62 = vmul.f32 %v3685_v20, %v3765_v40  ;;  %v3829_v3 = vmul.f32 %v3685_v20, %v3819_v53  ;;  %s3945_s17 = sld [smem:[#allocation5 + $0x34]] }
 0x20e   : > { %v3732_v7 = vpop.permute.xlu0 %687  ;;  %v3734_v11 = vpop.permute.xlu1 %1801  ;;  %v1309_v35 = vsel %vm186_vm0, %v1306_v51, %v1308_v56  ;;  %v3810_v51 = vstv %s3729_s12  ;;  %s4102_s12 = sld [smem:[#allocation5 + $0x57]] }
 0x20f   : > { %4921 = vst [vmem:[#allocation33_spill] sm:$0xff] %v3734_v11  ;;  %v3795_v11 = vstv %s3707_s18  ;;  %v1403_v56 = vrot.slane %v1397_v55, 2  ;;  %v4924_v16 = vrot.slane %v3752_v49, 2  ;;  %v1330_v55 = vsel %vm632_vm10, %v4925_v17, %v1329_v21  ;;  %s3958_s18 = sld [smem:[#allocation5 + $0x3b]] }
 0x210   : > { %1352 = vrot.lane.b32.xlu0 %v1349_v33, %s2984_s24  ;;  %1291 = vrot.lane.b32.xlu1 %v1288_v44, %s2984_s24  ;;  %v1343_v44 = vmul.f32 %v1340_v14, %v3355_v15  ;;  %v1418_v14 = vmul.f32 %v3660_v36, %v3765_v40  ;;  %v3841_v21 = vmul.f32 %v3685_v20, %v3795_v11  ;;  %v4934_v61 = vrot.slane %v3752_v49, 2 }
 0x211   : > { %v1405_v41 = vsel %vm579_vm8, %v1403_v56, %v4924_v16  ;;  %v1439_v17 = vmul.f32 %v3660_v36, %v3819_v53  ;;  %v3846_v16 = vstv %s3757_s6  ;;  %v3954_v49 = vmul.f32 %v3685_v20, %v3810_v51  ;;  %s4209_s6 = sld [smem:[#allocation5 + $0x43]] }
 0x212   : > { %v3773_v18 = vpop.permute.xlu0 %708  ;;  %v3775_v33 = vpop.permute.xlu1 %1822  ;;  %v1350_v57 = vrot.slane %v1343_v44, 6  ;;  %v573_v44 = vmul.f32 %v3660_v36, %v3795_v11  ;;  %v1424_v63 = vrot.slane %v1418_v14, 3  ;;  %v4927_v14 = vrot.slane %v3779_v62, 3 }
 0x213   : > { %4922 = vst [vmem:[#allocation34_spill] sm:$0xff] %v3775_v33  ;;  %v555_v33 = vmul.f32 %v3660_v36, %v3760_v1  ;;  %v3865_v43 = vstv %s3782_s8  ;;  %v1460_v22 = vmul.f32 %v3660_v36, %v3846_v16  ;;  %s4254_s8 = sld [smem:[#allocation5 + $0x51]] }
 0x214   : > { %1387 = vrot.lane.b32.xlu0 %v1384_v42, %s2985_s5  ;;  %1312 = vrot.lane.b32.xlu1 %v1309_v35, %s2984_s24  ;;  %v1426_v50 = vsel %vm597_vm9, %v1424_v63, %v4927_v14  ;;  %v1351_v23 = vsel %vm650_vm11, %v4928_v29, %v1350_v57  ;;  %v580_v63 = vrot.slane %v573_v44, 2  ;;  %v3882_v57 = vstv %s3801_s16  ;;  %s4277_s16 = sld [smem:[#allocation5 + $0x58]] }
 0x215   : > { %v562_v35 = vrot.slane %v555_v33, 1  ;;  %v4926_v33 = vrot.slane %v3771_v47, 1  ;;  %v557_v14 = vmul.f32 %v3760_v1, %v3355_v15  ;;  %v1420_v29 = vmul.f32 %v3765_v40, %v3355_v15 }
 0x216   : > { %v3813_v2 = vpop.permute.xlu0 %729  ;;  %v3815_v42 = vpop.permute.xlu1 %1843  ;;  %v4932_v40 = vrot.slane %v3841_v21, 2 }
 0x217   : > { %4923 = vst [vmem:[#allocation35_spill] sm:$0xff] %v3815_v42  ;;  %v1378_v42 = vmul.f32 %v1375_v12, %v3355_v15  ;;  %v3849_v12 = vstv %s3767_s7  ;;  %v1427_v4 = vrot.slane %v1420_v29, 3  ;;  %v3949_v29 = vmul.f32 %v3660_v36, %v3835_v45  ;;  %s4241_s7 = sld [smem:[#allocation5 + $0x4a]] }
 0x218   : > { %1408 = vrot.lane.b32.xlu0 %v1405_v41, %s2985_s5  ;;  %1333 = vrot.lane.b32.xlu1 %v1330_v55, %s2984_s24  ;;  %v564_v41 = vsel %vm561_vm7, %v562_v35, %v4926_v33  ;;  %v3870_v35 = vmul.f32 %v3685_v20, %v3846_v16  ;;  %v1399_v33 = vmul.f32 %v3743_v8, %v3355_v15  ;;  %v1445_v8 = vrot.slane %v1439_v17, 4 }
 0x219   : > { %v1385_v48 = vrot.slane %v1378_v42, 1  ;;  %v3887_v42 = vmul.f32 %v3685_v20, %v3804_v37  ;;  %v569_v44 = vadd.f32 %v564_v41, %v549_v28  ;;  %v4930_v17 = vrot.slane %v3829_v3, 4 }
 0x21a   : > { %v3854_v56 = vpop.permute.xlu0 %750  ;;  %v3856_v55 = vpop.permute.xlu1 %689  ;;  %v4931_v28 = vrot.slane %v3722_v13, 1  ;;  %v1406_v31 = vrot.slane %v1399_v33, 2  ;;  %v1481_v13 = vmul.f32 %v3660_v36, %v3865_v43  ;;  %v582_v33 = vsel %vm579_vm8, %v580_v63, %v4932_v40  ;;  %v3937_v40 = vld [vmem:[#allocation4 + $0x20] sm:$0xff] }
 0x21b   : > { %v1447_v9 = vsel %vm186_vm0, %v1445_v8, %v4930_v17  ;;  %v4892_v10 = vrot.slane %v3887_v42, 3  ;;  %v1466_v8 = vrot.slane %v1460_v22, 5  ;;  %v587_v17 = vadd.f32 %v582_v33, %v569_v44 }
 0x21c   : > { %1429 = vrot.lane.b32.xlu0 %v1426_v50, %s2985_s5  ;;  %1354 = vrot.lane.b32.xlu1 %v1351_v23, %s2984_s24  ;;  %v3899_v23 = vmul.f32 %v3685_v20, %v3865_v43  ;;  %v1386_v41 = vsel %vm561_vm7, %v4931_v28, %v1385_v48  ;;  %v626_v48 = vmul.f32 %v3660_v36, %v3810_v51  ;;  %v565_v28 = vrot.slane %v557_v14, 1  ;;  %v3965_v14 = vld [vmem:[#allocation4 + $0x18] sm:$0xff] }
 0x21d   : > { %v4933_v52 = vrot.slane %v3870_v35, 5  ;;  %v1407_v63 = vsel %vm579_vm8, %v4934_v61, %v1406_v31  ;;  %v3941_v22 = vmul.f32 %v3937_v40, %v3849_v12  ;;  %v1441_v44 = vmul.f32 %v3819_v53, %v3355_v15 }
 0x21e   : > { %v3893_v30 = vpop.permute.xlu0 %771  ;;  %v3895_v50 = vpop.permute.xlu1 %710  ;;  %v1487_v61 = vrot.slane %v1481_v13, 6  ;;  %v615_v53 = vrot.slane %v609_v46, 4  ;;  %v600_v31 = vsel %vm597_vm9, %v598_v0, %v4892_v10  ;;  %v575_v36 = vmul.f32 %v3795_v11, %v3355_v15 }
 0x21f   : > { %v1468_v38 = vsel %vm632_vm10, %v1466_v8, %v4933_v52  ;;  %v1851_v33 = vmul.f32 %v3965_v14, %v3849_v12  ;;  %v4935_v8 = vrot.slane %v3771_v47, 1  ;;  %v4936_v15 = vrot.slane %v3779_v62, 3 }
 0x220   : > { %1450 = vrot.lane.b32.xlu0 %v1447_v9, %s2985_s5  ;;  %1389 = vrot.lane.b32.xlu1 %v1386_v41, %s2985_s5  ;;  %v4893_v41 = vrot.slane %v3899_v23, 6  ;;  %v1448_v52 = vrot.slane %v1441_v44, 4  ;;  %v3985_v47 = vmul.f32 %v3937_v40, %v3882_v57  ;;  %v4938_v44 = vstv %s3693_s14  ;;  %s4033_s14 = sld [smem:[#allocation5 + $0x49]] }
 0x221   : > { %v566_v13 = vsel %vm561_vm7, %v4935_v8, %v565_v28  ;;  %v1428_v11 = vsel %vm597_vm9, %v4936_v15, %v1427_v4  ;;  %v3997_v4 = vmul.f32 %v3685_v20, %v3835_v45  ;;  %v550_v8 = vmul.f32 %v3685_v20, %v4938_v44 }
 0x222   : > { %v3926_v1 = vpop.permute.xlu0 %792  ;;  %v3928_v9 = vpop.permute.xlu1 %731  ;;  %v1489_v0 = vsel %vm650_vm11, %v1487_v61, %v4893_v41  ;;  %v633_v41 = vrot.slane %v626_v48, 5  ;;  %v1879_v60 = vrot.slane %v3985_v47, 6 }
 0x223   : > { %v570_v10 = vadd.f32 %v566_v13, %v550_v8  ;;  %v4031_v8 = vstv %s3958_s18  ;;  %s4360_s18 = sld [smem:[#allocation5 + $0x36]] }
 0x224   : > { %1471 = vrot.lane.b32.xlu0 %v1468_v38, %s2985_s5  ;;  %1410 = vrot.lane.b32.xlu1 %v1407_v63, %s2985_s5  ;;  %v605_v38 = vadd.f32 %v600_v31, %v587_v17  ;;  %v3987_v17 = vld [vmem:[#allocation4 + $0x10] sm:$0x3f]  ;;  %v4937_v31 = vrot.slane %v3914_v25, 4 }
 0x225   : > { %v1462_v28 = vmul.f32 %v3987_v17, %v3846_v16  ;;  %v583_v16 = vrot.slane %v575_v36, 2  ;;  %v593_v15 = vmul.f32 %v3987_v17, %v3804_v37  ;;  %v4939_v36 = vrot.slane %v3941_v22, 5 }
 0x226   : > { %v3972_v63 = vpop.permute.xlu0 %827  ;;  %v3974_v46 = vpop.permute.xlu1 %752  ;;  %v617_v61 = vsel %vm186_vm0, %v615_v53, %v4937_v31  ;;  %v1857_v53 = vrot.slane %v1851_v33, 5  ;;  %v1872_v31 = vmul.f32 %v3965_v14, %v3882_v57  ;;  %v4940_v33 = vrot.slane %v3829_v3, 4 }
 0x227   : > { %v622_v62 = vadd.f32 %v617_v61, %v605_v38  ;;  %v1469_v48 = vrot.slane %v1462_v28, 5  ;;  %v4941_v38 = vrot.slane %v3954_v49, 5  ;;  %v652_v61 = vrot.slane %v3997_v4, 6 }
 0x228   : > { %1492 = vrot.lane.b32.xlu0 %v1489_v0, %s2985_s5  ;;  %1431 = vrot.lane.b32.xlu1 %v1428_v11, %s2985_s5  ;;  %v1483_v11 = vmul.f32 %v3987_v17, %v3865_v43  ;;  %v1859_v37 = vsel %vm632_vm10, %v1857_v53, %v4939_v36  ;;  %v1449_v44 = vsel %vm186_vm0, %v4940_v33, %v1448_v52  ;;  %v4942_v3 = vrot.slane %v3841_v21, 2 }
 0x229   : > { %v635_v13 = vsel %vm632_vm10, %v633_v41, %v4941_v38  ;;  %v601_v28 = vrot.slane %v593_v15, 3  ;;  %v611_v53 = vmul.f32 %v3987_v17, %v3807_v32  ;;  %v1878_v41 = vrot.slane %v1872_v31, 6 }
 0x22a   : > { %v4010_v20 = vpop.permute.xlu0 %848  ;;  %v4012_v0 = vpop.permute.xlu1 %773  ;;  %v584_v52 = vsel %vm579_vm8, %v4942_v3, %v583_v16  ;;  %v651_v36 = vrot.slane %v3949_v29, 6  ;;  %v1490_v43 = vrot.slane %v1483_v11, 6  ;;  %v4943_v16 = vrot.slane %v3870_v35, 5  ;;  %v4055_v29 = vld [vmem:[#allocation4 + $0x28] sm:$0x3f] }
 0x22b   : > { %v588_v33 = vadd.f32 %v584_v52, %v570_v10  ;;  %v1880_v21 = vsel %vm650_vm11, %v1878_v41, %v1879_v60  ;;  %v4053_v32 = vmul.f32 %v3937_v40, %v4031_v8  ;;  %v1853_v10 = vmul.f32 %v4055_v29, %v3849_v12 }
 0x22c   : > { %1862 = vrot.lane.b32.xlu0 %v1859_v37, %s2981_s15  ;;  %1452 = vrot.lane.b32.xlu1 %v1449_v44, %s2985_s5  ;;  %v640_v37 = vadd.f32 %v635_v13, %v622_v62  ;;  %v1470_v15 = vsel %vm632_vm10, %v4943_v16, %v1469_v48  ;;  %v653_v62 = vsel %vm650_vm11, %v651_v36, %v652_v61  ;;  %v4065_v35 = vstv %s4004_s19  ;;  %s2839_s19 = sld [smem:[#allocation5 + $0x44]] }
 0x22d   : > { %v4944_v31 = vrot.slane %v3887_v42, 3  ;;  %v618_v48 = vrot.slane %v611_v53, 4  ;;  %v628_v13 = vmul.f32 %v3987_v17, %v3810_v51  ;;  %v1907_v12 = vmul.f32 %v3965_v14, %v4031_v8 }
 0x22e   : > { %v4041_v44 = vpop.permute.xlu0 %869  ;;  %v4043_v38 = vpop.permute.xlu1 %794  ;;  %v658_v3 = vadd.f32 %v653_v62, %v640_v37  ;;  %v4083_v42 = vmul.f32 %v3937_v40, %v4065_v35  ;;  %v4946_v51 = vrot.slane %v3899_v23, 6  ;;  %v1914_v53 = vrot.slane %v4053_v32, 1 }
 0x22f   : > { %v602_v11 = vsel %vm597_vm9, %v4944_v31, %v601_v28  ;;  %v1860_v37 = vrot.slane %v1853_v10, 5  ;;  %v1928_v62 = vmul.f32 %v3965_v14, %v4065_v35  ;;  %v4100_v31 = vstv %s4033_s14  ;;  %s4399_s14 = sld [smem:[#allocation5 + $0x4b]] }
 0x230   : > { %1883 = vrot.lane.b32.xlu0 %v1880_v21, %s2981_s15  ;;  %1473 = vrot.lane.b32.xlu1 %v1470_v15, %s2985_s5  ;;  %v606_v52 = vadd.f32 %v602_v11, %v588_v33  ;;  %v4945_v21 = vstv %s3945_s17  ;;  %v1491_v28 = vsel %vm650_vm11, %v4946_v51, %v1490_v43  ;;  %v1874_v33 = vmul.f32 %v4055_v29, %v3882_v57 }
 0x231   : > { %v1893_v16 = vmul.f32 %v3965_v14, %v4945_v21  ;;  %v646_v15 = vmul.f32 %v3987_v17, %v3835_v45  ;;  %v672_v23 = vadd.f32 %v3481_v24, %v658_v3  ;;  %v4947_v43 = vrot.slane %v3914_v25, 4 }
 0x232   : > { %v4074_v41 = vpop.permute.xlu0 %890  ;;  %v4076_v36 = vpop.permute.xlu1 %829  ;;  %v636_v10 = vrot.slane %v628_v13, 5  ;;  %v1913_v11 = vrot.slane %v1907_v12, 1  ;;  %v4115_v51 = vmul.f32 %v3937_v40, %v4100_v31  ;;  %v4948_v25 = vrot.slane %v3941_v22, 5 }
 0x233   : > { %v619_v57 = vsel %vm186_vm0, %v4947_v43, %v618_v48  ;;  %v1881_v13 = vrot.slane %v1874_v33, 6  ;;  %v1934_v12 = vrot.slane %v1928_v62, 2  ;;  %v4949_v3 = vrot.slane %v3954_v49, 5 }
 0x234   : > { %1897 = vrot.lane.b32.xlu0 %v1893_v16, %s2982_s20  ;;  %1494 = vrot.lane.b32.xlu1 %v1491_v28, %s2985_s5  ;;  %v623_v45 = vadd.f32 %v619_v57, %v606_v52  ;;  %v1935_v16 = vrot.slane %v4083_v42, 2  ;;  %v693_v28 = vadd.f32 %v3732_v7, %v672_v23  ;;  %v1915_v24 = vsel %vm561_vm7, %v1913_v11, %v1914_v53 }
 0x235   : > { %v1861_v48 = vsel %vm632_vm10, %v4948_v25, %v1860_v37  ;;  %v637_v52 = vsel %vm632_vm10, %v4949_v3, %v636_v10  ;;  %v654_v7 = vrot.slane %v646_v15, 6  ;;  %v1949_v22 = vmul.f32 %v3965_v14, %v4100_v31 }
 0x236   : > { %v4108_v17 = vpop.permute.xlu0 %911  ;;  %v4110_v21 = vpop.permute.xlu1 %850  ;;  %v714_v23 = vadd.f32 %v3773_v18, %v693_v28  ;;  %v641_v37 = vadd.f32 %v637_v52, %v623_v45  ;;  %v1936_v49 = vsel %vm579_vm8, %v1934_v12, %v1935_v16  ;;  %v1956_v62 = vrot.slane %v4115_v51, 3 }
 0x237   : > { %v1969_v15 = vstv %s4085_s21  ;;  %v1882_v57 = vsel %vm650_vm11, %v1879_v60, %v1881_v13  ;;  %v1909_v11 = vmul.f32 %v4055_v29, %v4031_v8  ;;  %v1990_v45 = vstv %s4102_s12  ;;  %s4413_s21 = sld [smem:[#allocation5 + $0x52]] }
 0x238   : > { %1918 = vrot.lane.b32.xlu0 %v1915_v24, %s2982_s20  ;;  %1864 = vrot.lane.b32.xlu1 %v1861_v48, %s2981_s15  ;;  %v735_v18 = vadd.f32 %v3813_v2, %v714_v23  ;;  %v4148_v10 = vmul.f32 %v3937_v40, %v1969_v15  ;;  %v655_v28 = vsel %vm650_vm11, %v652_v61, %v654_v7  ;;  %v1955_v47 = vrot.slane %v1949_v22, 3  ;;  %s4432_s12 = sld [smem:[#allocation5 + $0x59]] }
 0x239   : > { %v1970_v60 = vmul.f32 %v3965_v14, %v1969_v15  ;;  %v659_v24 = vadd.f32 %v655_v28, %v641_v37  ;;  %v4950_v8 = vstv %s3945_s17  ;;  %v4168_v12 = vmul.f32 %v3937_v40, %v1990_v45  ;;  %s4300_s17 = sld [smem:[#allocation5 + $0x5f]] }
 0x23a   : > { %v4134_v33 = vpop.permute.xlu0 %932  ;;  %v4136_v43 = vpop.permute.xlu1 %871  ;;  %v756_v2 = vadd.f32 %v3854_v56, %v735_v18  ;;  %v1894_v13 = vmul.f32 %v3937_v40, %v4950_v8  ;;  %v1930_v4 = vmul.f32 %v4055_v29, %v4065_v35  ;;  %v1957_v61 = vsel %vm597_vm9, %v1955_v47, %v1956_v62 }
 0x23b   : > { %v1977_v3 = vrot.slane %v4148_v10, 4  ;;  %v1916_v52 = vrot.slane %v1909_v11, 1  ;;  %v1991_v7 = vmul.f32 %v3965_v14, %v1990_v45  ;;  %v673_v23 = vadd.f32 %v3523_v59, %v659_v24 }
 0x23c   : > { %1939 = vrot.lane.b32.xlu0 %v1936_v49, %s2982_s20  ;;  %1885 = vrot.lane.b32.xlu1 %v1882_v57, %s2981_s15  ;;  %v777_v56 = vadd.f32 %v3893_v30, %v756_v2  ;;  %v1976_v35 = vrot.slane %v1970_v60, 4  ;;  %v2011_v37 = vstv %s4132_s23  ;;  %s4183_s15 = sld [smem:[#allocation5 + $0x3c]]  ;;  %v1998_v18 = vrot.slane %v4168_v12, 5 }
 0x23d   : > { %v1937_v57 = vrot.slane %v1930_v4, 2  ;;  %v4191_v11 = vmul.f32 %v3937_v40, %v2011_v37  ;;  %v694_v59 = vadd.f32 %v3856_v55, %v673_v23  ;;  %v1917_v28 = vsel %vm561_vm7, %v1914_v53, %v1916_v52  ;;  %s2843_s23 = sld [smem:[#allocation5 + $0x60]] }
 0x23e   : > { %v4160_v25 = vpop.permute.xlu0 %967  ;;  %v4162_v48 = vpop.permute.xlu1 %892  ;;  %v798_v22 = vadd.f32 %v3926_v1, %v777_v56  ;;  %v1978_v1 = vsel %vm186_vm0, %v1976_v35, %v1977_v3  ;;  %v1951_v2 = vmul.f32 %v4055_v29, %v4100_v31  ;;  %v1997_v47 = vrot.slane %v1991_v7, 5 }
 0x23f   : > { %v2012_v60 = vmul.f32 %v3965_v14, %v2011_v37  ;;  %v715_v55 = vadd.f32 %v3895_v50, %v694_v59  ;;  %v2019_v8 = vrot.slane %v4191_v11, 6  ;;  %v1938_v50 = vsel %vm579_vm8, %v1935_v16, %v1937_v57 }
 0x240   : > { %1960 = vrot.lane.b32.xlu0 %v1957_v61, %s2982_s20  ;;  %1899 = vrot.lane.b32.xlu1 %v1894_v13, %s2982_s20  ;;  %v812_v24 = vadd.f32 %v3493_v34, %v798_v22  ;;  %v1999_v31 = vsel %vm632_vm10, %v1997_v47, %v1998_v18  ;;  %v1958_v34 = vrot.slane %v1951_v2, 3  ;;  %v1972_v4 = vmul.f32 %v4055_v29, %v1969_v15 }
 0x241   : > { %v736_v13 = vadd.f32 %v3928_v9, %v715_v55  ;;  %v2018_v56 = vrot.slane %v2012_v60, 6  ;;  %v2032_v16 = vstv %s4193_s4  ;;  %v1993_v22 = vmul.f32 %v4055_v29, %v1990_v45  ;;  %s4509_s4 = sld [smem:[#allocation5 + $0x45]] }
 0x242   : > { %v4185_v30 = vpop.permute.xlu0 %988  ;;  %v4187_v49 = vpop.permute.xlu1 %913  ;;  %v833_v61 = vadd.f32 %v3972_v63, %v812_v24  ;;  %v2046_v7 = vstv %s4183_s15  ;;  %v1959_v35 = vsel %vm597_vm9, %v1956_v62, %v1958_v34  ;;  %v1979_v57 = vrot.slane %v1972_v4, 4  ;;  %s4497_s15 = sld [smem:[#allocation5 + $0x37]] }
 0x243   : > { %v757_v52 = vadd.f32 %v3974_v46, %v736_v13  ;;  %v2020_v42 = vsel %vm650_vm11, %v2018_v56, %v2019_v8  ;;  %v4238_v15 = vmul.f32 %v3937_v40, %v2046_v7  ;;  %v2047_v45 = vmul.f32 %v3965_v14, %v2046_v7 }
 0x244   : > { %1981 = vrot.lane.b32.xlu0 %v1978_v1, %s2982_s20  ;;  %1920 = vrot.lane.b32.xlu1 %v1917_v28, %s2982_s20  ;;  %v854_v63 = vadd.f32 %v4010_v20, %v833_v61  ;;  %v2067_v28 = vstv %s4209_s6  ;;  %v2033_v51 = vmul.f32 %v3965_v14, %v2032_v16  ;;  %v2014_v2 = vmul.f32 %v4055_v29, %v2011_v37  ;;  %s4521_s6 = sld [smem:[#allocation5 + $0x4c]] }
 0x245   : > { %v778_v46 = vadd.f32 %v4012_v0, %v757_v52  ;;  %v4264_v62 = vmul.f32 %v3937_v40, %v2067_v28  ;;  %v2054_v47 = vrot.slane %v4238_v15, 1  ;;  %v2000_v60 = vrot.slane %v1993_v22, 5 }
 0x246   : > { %v4211_v32 = vpop.permute.xlu0 %1009  ;;  %v4213_v53 = vpop.permute.xlu1 %934  ;;  %v875_v59 = vadd.f32 %v4041_v44, %v854_v63  ;;  %v2068_v55 = vmul.f32 %v3965_v14, %v2067_v28  ;;  %v2021_v13 = vrot.slane %v2014_v2, 6  ;;  %v2109_v52 = vstv %s4254_s8  ;;  %s4551_s8 = sld [smem:[#allocation5 + $0x31]] }
 0x247   : > { %v799_v1 = vadd.f32 %v4043_v38, %v778_v46  ;;  %v1980_v38 = vsel %vm186_vm0, %v1977_v3, %v1979_v57  ;;  %v2075_v3 = vrot.slane %v4264_v62, 2  ;;  %v2049_v57 = vmul.f32 %v4055_v29, %v2046_v7 }
 0x248   : > { %2002 = vrot.lane.b32.xlu0 %v1999_v31, %s2982_s20  ;;  %1941 = vrot.lane.b32.xlu1 %v1938_v50, %s2982_s20  ;;  %v896_v44 = vadd.f32 %v4074_v41, %v875_v59  ;;  %v2053_v31 = vrot.slane %v2047_v45, 1  ;;  %v2088_v50 = vstv %s4241_s7  ;;  %v2074_v56 = vrot.slane %v2068_v55, 2  ;;  %s4526_s7 = sld [smem:[#allocation5 + $0x53]] }
 0x249   : > { %v813_v24 = vadd.f32 %v3537_v6, %v799_v1  ;;  %v4293_v4 = vmul.f32 %v3937_v40, %v2088_v50  ;;  %v2022_v22 = vsel %vm650_vm11, %v2019_v8, %v2021_v13  ;;  %v2110_v59 = vmul.f32 %v3965_v14, %v2109_v52 }
 0x24a   : > { %v4229_v23 = vpop.permute.xlu0 %1030  ;;  %v4231_v9 = vpop.permute.xlu1 %969  ;;  %v917_v37 = vadd.f32 %v4108_v17, %v896_v44  ;;  %v2055_v6 = vsel %vm561_vm7, %v2053_v31, %v2054_v47  ;;  %v2001_v17 = vsel %vm632_vm10, %v1998_v18, %v2000_v60  ;;  %v2076_v18 = vsel %vm579_vm8, %v2074_v56, %v2075_v3 }
 0x24b   : > { %v834_v61 = vadd.f32 %v4076_v36, %v813_v24  ;;  %v4313_v36 = vmul.f32 %v3937_v40, %v2109_v52  ;;  %v2130_v1 = vstv %s4277_s16  ;;  %v2070_v2 = vmul.f32 %v4055_v29, %v2067_v28  ;;  %s4558_s16 = sld [smem:[#allocation5 + $0x38]] }
 0x24c   : > { %2023 = vrot.lane.b32.xlu0 %v2020_v42, %s2982_s20  ;;  %1962 = vrot.lane.b32.xlu1 %v1959_v35, %s2982_s20  ;;  %v938_v34 = vadd.f32 %v4134_v33, %v917_v37  ;;  %v2089_v33 = vmul.f32 %v3965_v14, %v2088_v50  ;;  %v2096_v35 = vrot.slane %v4293_v4, 3  ;;  %v2056_v60 = vrot.slane %v2049_v57, 1 }
 0x24d   : > { %v855_v63 = vadd.f32 %v4110_v21, %v834_v61  ;;  %v2117_v7 = vrot.slane %v4313_v36, 4  ;;  %v2131_v55 = vmul.f32 %v3965_v14, %v2130_v1  ;;  %v2151_v37 = vstv %s4300_s17  ;;  %s4570_s17 = sld [smem:[#allocation5 + $0x3f]] }
 0x24e   : > { %v4256_v20 = vpop.permute.xlu0 %1051  ;;  %v4258_v0 = vpop.permute.xlu1 %990  ;;  %v952_v46 = vadd.f32 %v3507_v19, %v938_v34  ;;  %v2095_v8 = vrot.slane %v2089_v33, 3  ;;  %v2034_v19 = vmul.f32 %v3937_v40, %v2032_v16  ;;  %v2116_v16 = vrot.slane %v2110_v59, 4 }
 0x24f   : > { %v876_v11 = vadd.f32 %v4136_v43, %v855_v63  ;;  %v2077_v34 = vrot.slane %v2070_v2, 2  ;;  %v2091_v56 = vmul.f32 %v4055_v29, %v2088_v50  ;;  %v2137_v61 = vrot.slane %v2131_v55, 5 }
 0x250   : > { %2037 = vrot.lane.b32.xlu0 %v2033_v51, %s2983_s22  ;;  %1983 = vrot.lane.b32.xlu1 %v1980_v38, %s2982_s20  ;;  %v4333_v51 = vmul.f32 %v3937_v40, %v2130_v1  ;;  %v973_v44 = vadd.f32 %v4160_v25, %v952_v46  ;;  %v2097_v38 = vsel %vm597_vm9, %v2095_v8, %v2096_v35  ;;  %v2172_v8 = vstv %s4360_s18  ;;  %s4583_s18 = sld [smem:[#allocation5 + $0x46]] }
 0x251   : > { %v897_v43 = vadd.f32 %v4162_v48, %v876_v11  ;;  %v2118_v31 = vsel %vm186_vm0, %v2116_v16, %v2117_v7  ;;  %v2098_v63 = vrot.slane %v2091_v56, 3  ;;  %v2112_v46 = vmul.f32 %v4055_v29, %v2109_v52 }
 0x252   : > { %v4279_v41 = vpop.permute.xlu0 %1072  ;;  %v4281_v10 = vpop.permute.xlu1 %1011  ;;  %v994_v24 = vadd.f32 %v4185_v30, %v973_v44  ;;  %v2138_v13 = vrot.slane %v4333_v51, 5  ;;  %v2173_v4 = vmul.f32 %v3965_v14, %v2172_v8  ;;  %v2154_v55 = vmul.f32 %v4055_v29, %v2151_v37 }
 0x253   : > { %v918_v28 = vadd.f32 %v4187_v49, %v897_v43  ;;  %v2119_v2 = vrot.slane %v2112_v46, 4  ;;  %v2174_v46 = vmul.f32 %v3937_v40, %v2172_v8 }
 0x254   : > { %2058 = vrot.lane.b32.xlu0 %v2055_v6, %s2983_s22  ;;  %2004 = vrot.lane.b32.xlu1 %v2001_v17, %s2982_s20  ;;  %v4358_v6 = vmul.f32 %v3937_v40, %v2151_v37  ;;  %v1015_v30 = vadd.f32 %v4211_v32, %v994_v24  ;;  %v2057_v17 = vsel %vm561_vm7, %v2054_v47, %v2056_v60 }
 0x255   : > { %v939_v49 = vadd.f32 %v4213_v53, %v918_v28  ;;  %v2139_v15 = vsel %vm632_vm10, %v2137_v61, %v2138_v13  ;;  %v2078_v47 = vsel %vm579_vm8, %v2075_v3, %v2077_v34 }
 0x256   : > { %v4302_v42 = vpop.permute.xlu0 %1107  ;;  %v4304_v12 = vpop.permute.xlu1 %1032  ;;  %v1036_v33 = vadd.f32 %v4229_v23, %v1015_v30  ;;  %v2159_v50 = vrot.slane %v4358_v6, 6 }
 0x257   : > { %v953_v23 = vadd.f32 %v3551_v27, %v939_v49  ;;  %v2161_v49 = vrot.slane %v2154_v55, 6 }
 0x258   : > { %2079 = vrot.lane.b32.xlu0 %v2076_v18, %s2983_s22  ;;  %2025 = vrot.lane.b32.xlu1 %v2022_v22, %s2982_s20  ;;  %s4347_s20 = sld [smem:[#allocation5 + $0x3d]]  ;;  %v2152_v18 = vmul.f32 %v3965_v14, %v2151_v37  ;;  %v1057_v22 = vadd.f32 %v4256_v20, %v1036_v33  ;;  %v2133_v20 = vmul.f32 %v4055_v29, %v2130_v1 }
 0x259   : > { %v974_v52 = vadd.f32 %v4231_v9, %v953_v23  ;;  %v2207_v9 = vstv %s2839_s19  ;;  %s4596_s19 = sld [smem:[#allocation5 + $0x61]] }
 0x25a   : > { %v4324_v45 = vpop.permute.xlu0 %1128  ;;  %v4326_v21 = vpop.permute.xlu1 %1053  ;;  %v1078_v57 = vadd.f32 %v4279_v41, %v1057_v22  ;;  %v2158_v59 = vrot.slane %v2152_v18, 6  ;;  %v2140_v16 = vrot.slane %v2133_v20, 5  ;;  %v2270_v20 = vstv %s4432_s12 }
 0x25b   : > { %v995_v1 = vadd.f32 %v4258_v0, %v974_v52  ;;  %v4425_v0 = vmul.f32 %v3937_v40, %v2207_v9 }
 0x25c   : > { %2100 = vrot.lane.b32.xlu0 %v2097_v38, %s2983_s22  ;;  %2039 = vrot.lane.b32.xlu1 %v2034_v19, %s2983_s22  ;;  %v2160_v41 = vsel %vm650_vm11, %v2158_v59, %v2159_v50  ;;  %v2099_v19 = vsel %vm597_vm9, %v2096_v35, %v2098_v63  ;;  %v1092_v43 = vadd.f32 %v3521_v58, %v1078_v57 }
 0x25d   : > { %v1016_v24 = vadd.f32 %v4281_v10, %v995_v1  ;;  %v2120_v58 = vsel %vm186_vm0, %v2117_v7, %v2119_v2  ;;  %v2141_v30 = vsel %vm632_vm10, %v2138_v13, %v2140_v16  ;;  %v2215_v56 = vrot.slane %v4425_v0, 2 }
 0x25e   : > { %v4349_v25 = vpop.permute.xlu0 %1149  ;;  %v4351_v48 = vpop.permute.xlu1 %1074  ;;  %v2186_v11 = vstv %s4347_s20  ;;  %v1113_v34 = vadd.f32 %v4302_v42, %v1092_v43  ;;  %v2210_v2 = vmul.f32 %v4055_v29, %v2207_v9  ;;  %v2291_v43 = vstv %s2843_s23  ;;  %s4578_s20 = sld [smem:[#allocation5 + $0x5a]] }
 0x25f   : > { %v4396_v27 = vmul.f32 %v3937_v40, %v2186_v11  ;;  %v2187_v44 = vmul.f32 %v3965_v14, %v2186_v11  ;;  %v1037_v37 = vadd.f32 %v4304_v12, %v1016_v24  ;;  %v2189_v23 = vmul.f32 %v4055_v29, %v2186_v11 }
 0x260   : > { %2121 = vrot.lane.b32.xlu0 %v2118_v31, %s2983_s22  ;;  %2060 = vrot.lane.b32.xlu1 %v2057_v17, %s2983_s22  ;;  %v2208_v31 = vmul.f32 %v3965_v14, %v2207_v9  ;;  %v2228_v17 = vstv %s4399_s14  ;;  %v1134_v42 = vadd.f32 %v4324_v45, %v1113_v34  ;;  %v2217_v24 = vrot.slane %v2210_v2, 2  ;;  %s4633_s14 = sld [smem:[#allocation5 + $0x54]] }
 0x261   : > { %v2194_v35 = vrot.slane %v4396_v27, 1  ;;  %v2193_v28 = vrot.slane %v2187_v44, 1  ;;  %v1058_v12 = vadd.f32 %v4326_v21, %v1037_v37  ;;  %v4449_v61 = vmul.f32 %v3937_v40, %v2228_v17 }
 0x262   : > { %v4372_v32 = vpop.permute.xlu0 %1170  ;;  %v4374_v53 = vpop.permute.xlu1 %1109  ;;  %v2214_v33 = vrot.slane %v2208_v31, 2  ;;  %v1155_v51 = vadd.f32 %v4349_v25, %v1134_v42  ;;  %v2229_v18 = vmul.f32 %v3965_v14, %v2228_v17  ;;  %v2162_v25 = vsel %vm650_vm11, %v2159_v50, %v2161_v49 }
 0x263   : > { %v2195_v7 = vsel %vm561_vm7, %v2193_v28, %v2194_v35  ;;  %v1079_v13 = vadd.f32 %v4351_v48, %v1058_v12  ;;  %v2236_v48 = vrot.slane %v4449_v61, 3  ;;  %v4502_v0 = vmul.f32 %v3937_v40, %v2291_v43 }
 0x264   : > { %2142 = vrot.lane.b32.xlu0 %v2139_v15, %s2983_s22  ;;  %2081 = vrot.lane.b32.xlu1 %v2078_v47, %s2983_s22  ;;  %v2249_v15 = vstv %s4413_s21  ;;  %v1176_v22 = vadd.f32 %v4372_v32, %v1155_v51  ;;  %v2216_v63 = vsel %vm579_vm8, %v2214_v33, %v2215_v56  ;;  %v2235_v11 = vrot.slane %v2229_v18, 3  ;;  %s4664_s21 = sld [smem:[#allocation5 + $0x5b]] }
 0x265   : > { %v4458_v47 = vmul.f32 %v3937_v40, %v2249_v15  ;;  %v2250_v57 = vmul.f32 %v3965_v14, %v2249_v15  ;;  %v1093_v59 = vadd.f32 %v3565_v39, %v1079_v13  ;;  %v2231_v28 = vmul.f32 %v4055_v29, %v2228_v17 }
 0x266   : > { %v4390_v62 = vpop.permute.xlu0 %1191  ;;  %v4392_v3 = vpop.permute.xlu1 %1130  ;;  %v2237_v8 = vsel %vm597_vm9, %v2235_v11, %v2236_v48  ;;  %v2292_v31 = vmul.f32 %v3965_v14, %v2291_v43  ;;  %v2218_v37 = vsel %vm579_vm8, %v2215_v56, %v2217_v24  ;;  %v2299_v49 = vrot.slane %v4502_v0, 6 }
 0x267   : > { %v1197_v32 = vadd.f32 %v4390_v62, %v1176_v22  ;;  %v2257_v50 = vrot.slane %v4458_v47, 4  ;;  %v2256_v39 = vrot.slane %v2250_v57, 4  ;;  %v2271_v62 = vmul.f32 %v3965_v14, %v2270_v20 }
 0x268   : > { %2163 = vrot.lane.b32.xlu0 %v2160_v41, %s2983_s22  ;;  %2102 = vrot.lane.b32.xlu1 %v2099_v19, %s2983_s22  ;;  %v2196_v41 = vrot.slane %v2189_v23, 1  ;;  %v4476_v19 = vmul.f32 %v3937_v40, %v2270_v20  ;;  %v1114_v1 = vadd.f32 %v4374_v53, %v1093_v59  ;;  %v2238_v17 = vrot.slane %v2231_v28, 3 }
 0x269   : > { %v2258_v9 = vsel %vm186_vm0, %v2256_v39, %v2257_v50  ;;  %v2277_v27 = vrot.slane %v2271_v62, 5  ;;  %v2298_v33 = vrot.slane %v2292_v31, 6  ;;  %v2312_v13 = vstv %s4497_s15 }
 0x26a   : > { %v1213_v38 = vpop.permute.xlu0 %1212  ;;  %v4415_v60 = vpop.permute.xlu1 %1151  ;;  %v2278_v55 = vrot.slane %v4476_v19, 5  ;;  %v1135_v53 = vadd.f32 %v4392_v3, %v1114_v1  ;;  %v2347_v57 = vstv %s4509_s4  ;;  %v4556_v2 = vstv %s4521_s6 }
 0x26b   : > { %v1218_v44 = vadd.f32 %v1213_v38, %v1197_v32  ;;  %v2197_v38 = vsel %vm561_vm7, %v2194_v35, %v2196_v41  ;;  %v2294_v41 = vmul.f32 %v4055_v29, %v2291_v43  ;;  %v4564_v47 = vmul.f32 %v3937_v40, %v4556_v2 }
 0x26c   : > { %2177 = vrot.lane.b32.xlu0 %v2173_v4, %s2984_s24  ;;  %2123 = vrot.lane.b32.xlu1 %v2120_v58, %s2983_s22  ;;  %v1156_v35 = vadd.f32 %v4415_v60, %v1135_v53  ;;  %v2369_v43 = vmul.f32 %v3965_v14, %v4556_v2 }
 0x26d   : > { %v1232_v58 = vadd.f32 %v3535_v5, %v1218_v44  ;;  %v2279_v5 = vsel %vm632_vm10, %v2277_v27, %v2278_v55  ;;  %v2301_v53 = vrot.slane %v2294_v41, 6  ;;  %v2376_v19 = vrot.slane %v4564_v47, 3 }
 0x26e   : > { %v4434_v10 = vpop.permute.xlu0 %1247  ;;  %v4436_v36 = vpop.permute.xlu1 %1172 }
 0x26f   : > { %v1177_v60 = vadd.f32 %v4436_v36, %v1156_v35 }
 0x270   : > { %2198 = vrot.lane.b32.xlu0 %v2195_v7, %s2984_s24  ;;  %2144 = vrot.lane.b32.xlu1 %v2141_v30, %s2983_s22  ;;  %v2252_v7 = vmul.f32 %v4055_v29, %v2249_v15  ;;  %v1253_v30 = vadd.f32 %v4434_v10, %v1232_v58  ;;  %v2273_v15 = vmul.f32 %v4055_v29, %v2270_v20 }
 0x271   : > { %v4549_v20 = vmul.f32 %v3937_v40, %v2347_v57 }
 0x272   : > { %v1269_v45 = vpop.permute.xlu0 %1268  ;;  %v1194_v21 = vpop.permute.xlu1 %1193  ;;  %v2259_v36 = vrot.slane %v2252_v7, 4  ;;  %v1504_v7 = vstv %s4551_s8 }
 0x273   : > { %v1274_v42 = vadd.f32 %v1269_v45, %v1253_v30  ;;  %v1198_v12 = vadd.f32 %v1194_v21, %v1177_v60  ;;  %v2300_v45 = vsel %vm650_vm11, %v2298_v33, %v2299_v49  ;;  %v2239_v21 = vsel %vm597_vm9, %v2236_v48, %v2238_v17 }
 0x274   : > { %2219 = vrot.lane.b32.xlu0 %v2216_v63, %s2984_s24  ;;  %2165 = vrot.lane.b32.xlu1 %v2162_v25, %s2983_s22  ;;  %s4486_s22 = sld [smem:[#allocation5 + $0x3e]]  ;;  %v2313_v25 = vmul.f32 %v3965_v14, %v2312_v13  ;;  %v2260_v11 = vsel %vm186_vm0, %v2257_v50, %v2259_v36  ;;  %v2280_v48 = vrot.slane %v2273_v15, 5  ;;  %v2355_v24 = vrot.slane %v4549_v20, 2 }
 0x275   : > { %v2350_v33 = vmul.f32 %v4055_v29, %v2347_v57 }
 0x276   : > { %v1290_v52 = vpop.permute.xlu0 %1289  ;;  %v1215_v6 = vpop.permute.xlu1 %1214  ;;  %v2281_v1 = vsel %vm632_vm10, %v2278_v55, %v2280_v48 }
 0x277   : > { %v1295_v23 = vadd.f32 %v1290_v52, %v1274_v42  ;;  %v1219_v22 = vadd.f32 %v1215_v6, %v1198_v12 }
 0x278   : > { %2240 = vrot.lane.b32.xlu0 %v2237_v8, %s2984_s24  ;;  %2179 = vrot.lane.b32.xlu1 %v2174_v46, %s2984_s24  ;;  %v2348_v8 = vmul.f32 %v3965_v14, %v2347_v57 }
 0x279   : > { %v1233_v52 = vadd.f32 %v3579_v54, %v1219_v22  ;;  %v4568_v54 = vstv %s4526_s7 }
 0x27a   : > { %v1311_v4 = vpop.permute.xlu0 %1310  ;;  %v4488_v16 = vpop.permute.xlu1 %1249  ;;  %v2326_v56 = vstv %s4486_s22  ;;  %v2390_v55 = vmul.f32 %v3965_v14, %v4568_v54  ;;  %v2354_v27 = vrot.slane %v2348_v8, 2 }
 0x27b   : > { %v4530_v18 = vmul.f32 %v3937_v40, %v2326_v56  ;;  %v1316_v63 = vadd.f32 %v1311_v4, %v1295_v23  ;;  %v2327_v46 = vmul.f32 %v3965_v14, %v2326_v56  ;;  %v2329_v4 = vmul.f32 %v4055_v29, %v2326_v56 }
 0x27c   : > { %2261 = vrot.lane.b32.xlu0 %v2258_v9, %s2984_s24  ;;  %2200 = vrot.lane.b32.xlu1 %v2197_v38, %s2984_s24  ;;  %v1254_v9 = vadd.f32 %v4488_v16, %v1233_v52  ;;  %v4592_v16 = vmul.f32 %v3937_v40, %v4568_v54  ;;  %v2356_v60 = vsel %vm579_vm8, %v2354_v27, %v2355_v24  ;;  %v2396_v42 = vrot.slane %v2390_v55, 4 }
 0x27d   : > { %v2334_v61 = vrot.slane %v4530_v18, 1  ;;  %v2333_v44 = vrot.slane %v2327_v46, 1  ;;  %v4636_v23 = vstv %s4578_s20 }
 0x27e   : > { %v1332_v3 = vpop.permute.xlu0 %1331  ;;  %v4511_v34 = vpop.permute.xlu1 %1270  ;;  %v2397_v12 = vrot.slane %v4592_v16, 4  ;;  %v2924_v16 = vld [vmem:[#allocation4 + $0x28] sm:$0x3f] }
 0x27f   : > { %v1337_v6 = vadd.f32 %v1332_v3, %v1316_v63  ;;  %v2335_v38 = vsel %vm561_vm7, %v2333_v44, %v2334_v61  ;;  %v1275_v58 = vadd.f32 %v4511_v34, %v1254_v9  ;;  %v2375_v3 = vrot.slane %v2369_v43, 3  ;;  %v4676_v9 = vld [vmem:[#allocation4 + $0x20] sm:$0xff] }
 0x280   : > { %2282 = vrot.lane.b32.xlu0 %v2279_v5, %s2984_s24  ;;  %2221 = vrot.lane.b32.xlu1 %v2218_v37, %s2984_s24  ;;  %v2314_v5 = vmul.f32 %v3937_v40, %v2312_v13  ;;  %v2336_v37 = vrot.slane %v2329_v4, 1  ;;  %v4607_v34 = vstv %s4558_s16  ;;  %v4643_v63 = vmul.f32 %v3937_v40, %v4636_v23 }
 0x281   : > { %v2377_v17 = vsel %vm597_vm9, %v2375_v3, %v2376_v19  ;;  %v1511_v18 = vmul.f32 %v3965_v14, %v4607_v34  ;;  %v4631_v15 = vmul.f32 %v3937_v40, %v4607_v34 }
 0x282   : > { %v1353_v51 = vpop.permute.xlu0 %1352  ;;  %v1292_v10 = vpop.permute.xlu1 %1291  ;;  %v2337_v36 = vsel %vm561_vm7, %v2334_v61, %v2336_v37  ;;  %v4659_v61 = vstv %s4596_s19  ;;  %v2392_v37 = vmul.f32 %v4055_v29, %v4568_v54 }
 0x283   : > { %v1358_v50 = vadd.f32 %v1353_v51, %v1337_v6  ;;  %v1296_v30 = vadd.f32 %v1292_v10, %v1275_v58  ;;  %v4622_v51 = vstv %s4570_s17  ;;  %v1517_v6 = vrot.slane %v1511_v18, 1 }
 0x284   : > { %2303 = vrot.lane.b32.xlu0 %v2300_v45, %s2984_s24  ;;  %2242 = vrot.lane.b32.xlu1 %v2239_v21, %s2984_s24  ;;  %v4639_v21 = vstv %s4583_s18  ;;  %v1528_v46 = vmul.f32 %v3965_v14, %v4622_v51  ;;  %v4654_v57 = vmul.f32 %v3937_v40, %v4622_v51  ;;  %v1518_v41 = vrot.slane %v4631_v15, 1 }
 0x285   : > { %v1372_v28 = vadd.f32 %v3549_v26, %v1358_v50  ;;  %v2302_v26 = vsel %vm650_vm11, %v2299_v49, %v2301_v53  ;;  %v4619_v49 = vmul.f32 %v3965_v14, %v1504_v7  ;;  %v1545_v50 = vmul.f32 %v3965_v14, %v4639_v21  ;;  %v4951_v53 = vld [vmem:[#allocation18_spill] sm:$0xff] }
 0x286   : > { %v1388_v59 = vpop.permute.xlu0 %1387  ;;  %v1313_v32 = vpop.permute.xlu1 %1312  ;;  %v4668_v44 = vmul.f32 %v3937_v40, %v4659_v61  ;;  %v1534_v43 = vrot.slane %v1528_v46, 2  ;;  %v1535_v4 = vrot.slane %v4654_v57, 2  ;;  %v4680_v40 = vmul.f32 %v4676_v9, %v4639_v21 }
 0x287   : > { %v1393_v0 = vadd.f32 %v1388_v59, %v1372_v28  ;;  %v1317_v56 = vadd.f32 %v1313_v32, %v1296_v30  ;;  %v1519_v27 = vsel %vm561_vm7, %v1517_v6, %v1518_v41  ;;  %v4718_v18 = vstv %s4664_s21 }
 0x288   : > { %2317 = vrot.lane.b32.xlu0 %v2313_v25, %s2985_s5  ;;  %2263 = vrot.lane.b32.xlu1 %v2260_v11, %s2984_s24  ;;  %v2398_v25 = vsel %vm186_vm0, %v2396_v42, %v2397_v12  ;;  %v2411_v11 = vmul.f32 %v3965_v14, %v4636_v23  ;;  %v1552_v42 = vrot.slane %v4680_v40, 3 }
 0x28a   : > { %v1409_v39 = vpop.permute.xlu0 %1408  ;;  %v1334_v62 = vpop.permute.xlu1 %1333  ;;  %v2417_v28 = vrot.slane %v2411_v11, 5  ;;  %v1536_v11 = vsel %vm579_vm8, %v1534_v43, %v1535_v4 }
 0x28b   : > { %v1414_v22 = vadd.f32 %v1409_v39, %v1393_v0  ;;  %v1338_v45 = vadd.f32 %v1334_v62, %v1317_v56  ;;  %v2418_v39 = vrot.slane %v4643_v63, 5  ;;  %v2357_v62 = vrot.slane %v2350_v33, 2  ;;  %v2923_v56 = vld [vmem:[#allocation4 + $0x18] sm:$0xff] }
 0x28c   : > { %2338 = vrot.lane.b32.xlu0 %v2335_v38, %s2985_s5  ;;  %2284 = vrot.lane.b32.xlu1 %v2281_v1, %s2984_s24  ;;  %v2371_v1 = vmul.f32 %v4055_v29, %v4556_v2  ;;  %v2432_v38 = vmul.f32 %v3965_v14, %v4659_v61 }
 0x28d   : > { %v2419_v30 = vsel %vm632_vm10, %v2417_v28, %v2418_v39 }
 0x28e   : > { %v1430_v35 = vpop.permute.xlu0 %1429  ;;  %v1355_v31 = vpop.permute.xlu1 %1354  ;;  %v2438_v54 = vrot.slane %v2432_v38, 6 }
 0x28f   : > { %v1435_v59 = vadd.f32 %v1430_v35, %v1414_v22  ;;  %v1359_v32 = vadd.f32 %v1355_v31, %v1338_v45  ;;  %v4692_v35 = vstv %s4633_s14 }
 0x290   : > { %2359 = vrot.lane.b32.xlu0 %v2356_v60, %s2985_s5  ;;  %2305 = vrot.lane.b32.xlu1 %v2302_v26, %s2984_s24  ;;  %s4624_s24 = sld [smem:[#allocation5 + $0x4d]]  ;;  %v2358_v60 = vsel %vm579_vm8, %v2355_v24, %v2357_v62  ;;  %v2378_v26 = vrot.slane %v2371_v1, 3  ;;  %v4713_v20 = vmul.f32 %v4676_v9, %v4692_v35  ;;  %v1596_v62 = vmul.f32 %v2923_v56, %v4718_v18 }
 0x291   : > { %v1373_v55 = vadd.f32 %v4951_v53, %v1359_v32  ;;  %v1513_v53 = vmul.f32 %v4055_v29, %v4607_v34 }
 0x292   : > { %v1451_v10 = vpop.permute.xlu0 %1450  ;;  %v1390_v13 = vpop.permute.xlu1 %1389  ;;  %v2379_v32 = vsel %vm597_vm9, %v2376_v19, %v2378_v26  ;;  %v1586_v19 = vrot.slane %v4713_v20, 5  ;;  %v1547_v26 = vmul.f32 %v2924_v16, %v4639_v21 }
 0x293   : > { %v1456_v8 = vadd.f32 %v1451_v10, %v1435_v59  ;;  %v1394_v0 = vadd.f32 %v1390_v13, %v1373_v55 }
 0x294   : > { %2380 = vrot.lane.b32.xlu0 %v2377_v17, %s2985_s5  ;;  %2319 = vrot.lane.b32.xlu1 %v2314_v5, %s2985_s5  ;;  %v2439_v5 = vrot.slane %v4668_v44, 6  ;;  %v1551_v17 = vrot.slane %v1545_v50, 3 }
 0x296   : > { %v1472_v48 = vpop.permute.xlu0 %1471  ;;  %v1411_v52 = vpop.permute.xlu1 %1410  ;;  %v4686_v2 = vstv %s4624_s24  ;;  %v2440_v13 = vsel %vm650_vm11, %v2438_v54, %v2439_v5 }
 0x297   : > { %v1477_v58 = vadd.f32 %v1472_v48, %v1456_v8  ;;  %v4706_v33 = vmul.f32 %v4676_v9, %v4686_v2  ;;  %v1562_v10 = vmul.f32 %v2923_v56, %v4686_v2  ;;  %v1415_v46 = vadd.f32 %v1411_v52, %v1394_v0 }
 0x298   : > { %2401 = vrot.lane.b32.xlu0 %v2398_v25, %s2985_s5  ;;  %2340 = vrot.lane.b32.xlu1 %v2337_v36, %s2985_s5  ;;  %v1579_v36 = vmul.f32 %v2923_v56, %v4692_v35  ;;  %v2399_v25 = vrot.slane %v2392_v37, 4  ;;  %v1553_v48 = vsel %vm597_vm9, %v1551_v17, %v1552_v42  ;;  %v4739_v52 = vmul.f32 %v4676_v9, %v4718_v18 }
 0x299   : > { %v1569_v6 = vrot.slane %v4706_v33, 4  ;;  %v1568_v47 = vrot.slane %v1562_v10, 4 }
 0x29a   : > { %v1493_v31 = vpop.permute.xlu0 %1492  ;;  %v1432_v3 = vpop.permute.xlu1 %1431  ;;  %v1585_v8 = vrot.slane %v1579_v36, 5  ;;  %v2400_v38 = vsel %vm186_vm0, %v2397_v12, %v2399_v25  ;;  %v1530_v12 = vmul.f32 %v2924_v16, %v4622_v51 }
 0x29b   : > { %v1498_v14 = vadd.f32 %v1493_v31, %v1477_v58  ;;  %v1436_v50 = vadd.f32 %v1432_v3, %v1415_v46  ;;  %v1570_v31 = vsel %vm186_vm0, %v1568_v47, %v1569_v6  ;;  %v1603_v3 = vrot.slane %v4739_v52, 6 }
 0x29c   : > { %2422 = vrot.lane.b32.xlu0 %v2419_v30, %s2985_s5  ;;  %2361 = vrot.lane.b32.xlu1 %v2358_v60, %s2985_s5  ;;  %v1587_v37 = vsel %vm632_vm10, %v1585_v8, %v1586_v19  ;;  %v1602_v30 = vrot.slane %v1596_v62, 6  ;;  %v1537_v20 = vrot.slane %v1530_v12, 2  ;;  %v4959_v12 = vld [vmem:[#allocation13_spill] sm:$0xff] }
 0x29d   : > { %v1507_v24 = vadd.f32 %v4619_v49, %v1498_v14  ;;  %v2413_v49 = vmul.f32 %v4055_v29, %v4636_v23 }
 0x29e   : > { %v4720_v22 = vpop.permute.xlu0 %1862  ;;  %v1453_v45 = vpop.permute.xlu1 %1452  ;;  %v1604_v10 = vsel %vm650_vm11, %v1602_v30, %v1603_v3  ;;  %v4961_v30 = vld [vmem:[#allocation20_spill] sm:$0xff] }
 0x29f   : > { %v1524_v59 = vadd.f32 %v1519_v27, %v1507_v24  ;;  %v1457_v58 = vadd.f32 %v1453_v45, %v1436_v50  ;;  %v2420_v28 = vrot.slane %v2413_v49, 5  ;;  %v2434_v27 = vmul.f32 %v4055_v29, %v4659_v61 }
 0x2a0   : > { %2443 = vrot.lane.b32.xlu0 %v2440_v13, %s2985_s5  ;;  %2382 = vrot.lane.b32.xlu1 %v2379_v32, %s2985_s5  ;;  %v1506_v29 = vmul.f32 %v4676_v9, %v1504_v7  ;;  %v1520_v61 = vrot.slane %v1513_v53, 1  ;;  %v1564_v24 = vmul.f32 %v2924_v16, %v4686_v2  ;;  %v1554_v9 = vrot.slane %v1547_v26, 3  ;;  %v4962_v26 = vld [vmem:[#allocation25_spill] sm:$0xff] }
 0x2a1   : > { %v1541_v23 = vadd.f32 %v1536_v11, %v1524_v59  ;;  %v2421_v51 = vsel %vm632_vm10, %v2418_v39, %v2420_v28  ;;  %v2441_v56 = vrot.slane %v2434_v27, 6  ;;  %v1581_v45 = vmul.f32 %v2924_v16, %v4692_v35  ;;  %v4952_v39 = vld [vmem:[#allocation11_spill] sm:$0xff] }
 0x2a2   : > { %v4745_v1 = vpop.permute.xlu0 %1883  ;;  %v1474_v43 = vpop.permute.xlu1 %1473  ;;  %v1521_v21 = vsel %vm561_vm7, %v1518_v41, %v1520_v61  ;;  %v1538_v59 = vsel %vm579_vm8, %v1535_v4, %v1537_v20  ;;  %v1571_v15 = vrot.slane %v1564_v24, 4  ;;  %v1598_v41 = vmul.f32 %v2924_v16, %v4718_v18  ;;  %v4953_v35 = vld [vmem:[#allocation15_spill] sm:$0xff] }
 0x2a3   : > { %v1558_v55 = vadd.f32 %v1553_v48, %v1541_v23  ;;  %v1478_v14 = vadd.f32 %v1474_v43, %v1457_v58  ;;  %v2442_v2 = vsel %vm650_vm11, %v2439_v5, %v2441_v56  ;;  %v1555_v11 = vsel %vm597_vm9, %v1552_v42, %v1554_v9  ;;  %v4954_v5 = vld [vmem:[#allocation16_spill] sm:$0xff]  ;;  %v4955_v23 = vld [vmem:[#allocation17_spill] sm:$0xff]  ;;  %v4958_v16 = vld [vmem:[#allocation23_spill] sm:$0xff] }
 0x2a4   : > { %2403 = vrot.lane.b32.xlu1 %v2400_v38, %s2985_s5  ;;  %v1588_v48 = vrot.slane %v1581_v45, 5  ;;  %v1572_v4 = vsel %vm186_vm0, %v1569_v6, %v1571_v15  ;;  %v1605_v18 = vrot.slane %v1598_v41, 6  ;;  %v4956_v38 = vld [vmem:[#allocation19_spill] sm:$0xff]  ;;  %v4957_v58 = vld [vmem:[#allocation21_spill] sm:$0xff]  ;;  %v4965_v56 = vld [vmem:[#allocation24_spill] sm:$0xff]  ;;  %vm2625_vm0 = vcmask 654336  }
 0x2a5   : > { %v1575_v34 = vadd.f32 %v1570_v31, %v1558_v55  ;;  %v4968_v45 = vld [vmem:[#allocation31_spill] sm:$0xff]  ;;  %v4970_v41 = vld [vmem:[#allocation30_spill] sm:$0xff] }
 0x2a6   : > { %v4761_v60 = vpop.permute.xlu0 %1897  ;;  %v1495_v17 = vpop.permute.xlu1 %1494  ;;  %v1589_v62 = vsel %vm632_vm10, %v1586_v19, %v1588_v48  ;;  %v1606_v55 = vsel %vm650_vm11, %v1603_v3, %v1605_v18  ;;  %v4964_v3 = vld [vmem:[#allocation27_spill] sm:$0xff] }
 0x2a7   : > { %v1592_v54 = vadd.f32 %v1587_v37, %v1575_v34  ;;  %v1499_v0 = vadd.f32 %v1495_v17, %v1478_v14  ;;  %v4960_v34 = vld [vmem:[#allocation12_spill] sm:$0xff] }
 0x2a8   : > { %2424 = vrot.lane.b32.xlu1 %v2421_v51, %s2985_s5 }
 0x2a9   : > { %v1609_v36 = vadd.f32 %v1604_v10, %v1592_v54  ;;  %v1508_v7 = vadd.f32 %v1506_v29, %v1499_v0  ;;  %v4963_v54 = vld [vmem:[#allocation22_spill] sm:$0xff] }
 0x2aa   : > { %v1919_v63 = vpop.permute.xlu0 %1918  ;;  %v4777_v13 = vpop.permute.xlu1 %1864 }
 0x2ab   : > { %v1623_v25 = vadd.f32 %v4952_v39, %v1609_v36  ;;  %v1525_v46 = vadd.f32 %v1521_v21, %v1508_v7  ;;  %v4966_v36 = vld [vmem:[#allocation29_spill] sm:$0xff]  ;;  %v4967_v21 = vld [vmem:[#allocation26_spill] sm:$0xff] }
 0x2ac   : > { %2445 = vrot.lane.b32.xlu1 %v2442_v2, %s2985_s5 }
 0x2ad   : > { %v1644_v32 = vadd.f32 %v4953_v35, %v1623_v25  ;;  %v1542_v49 = vadd.f32 %v1538_v59, %v1525_v46  ;;  %v4969_v25 = vld [vmem:[#allocation28_spill] sm:$0xff] }
 0x2ae   : > { %v1940_v44 = vpop.permute.xlu0 %1939  ;;  %v1886_v52 = vpop.permute.xlu1 %1885 }
 0x2af   : > { %v1665_v47 = vadd.f32 %v4954_v5, %v1644_v32  ;;  %v1559_v57 = vadd.f32 %v1555_v11, %v1542_v49  ;;  %v4971_v49 = vld [vmem:[#allocation14_spill] sm:$0xff] }
 0x2b1   : > { %v1686_v50 = vadd.f32 %v4955_v23, %v1665_v47  ;;  %v1576_v8 = vadd.f32 %v1572_v4, %v1559_v57  ;;  %v4972_v57 = vld [vmem:[#allocation32_spill] sm:$0xff]  ;;  %v4973_v23 = vld [vmem:[#allocation33_spill] sm:$0xff] }
 0x2b2   : > { %v1961_v43 = vpop.permute.xlu0 %1960  ;;  %v1900_v40 = vpop.permute.xlu1 %1899 }
 0x2b3   : > { %v1707_v42 = vadd.f32 %v4956_v38, %v1686_v50  ;;  %v1593_v53 = vadd.f32 %v1589_v62, %v1576_v8  ;;  %v4974_v38 = vld [vmem:[#allocation34_spill] sm:$0xff] }
 0x2b5   : > { %v1728_v28 = vadd.f32 %v4957_v58, %v1707_v42  ;;  %v1610_v27 = vadd.f32 %v1606_v55, %v1593_v53  ;;  %v4975_v53 = vld [vmem:[#allocation35_spill] sm:$0xff] }
 0x2b6   : > { %v1982_v31 = vpop.permute.xlu0 %1981  ;;  %v1921_v33 = vpop.permute.xlu1 %1920 }
 0x2b7   : > { %v1749_v6 = vadd.f32 %v4958_v16, %v1728_v28  ;;  %v1624_v37 = vadd.f32 %v4959_v12, %v1610_v27 }
 0x2b9   : > { %v1763_v14 = vadd.f32 %v4960_v34, %v1749_v6  ;;  %v1645_v19 = vadd.f32 %v4961_v30, %v1624_v37 }
 0x2ba   : > { %v2003_v29 = vpop.permute.xlu0 %2002  ;;  %v1942_v61 = vpop.permute.xlu1 %1941 }
 0x2bb   : > { %v1784_v17 = vadd.f32 %v4962_v26, %v1763_v14  ;;  %v1666_v0 = vadd.f32 %v4963_v54, %v1645_v19 }
 0x2bd   : > { %v1805_v51 = vadd.f32 %v4964_v3, %v1784_v17  ;;  %v1687_v10 = vadd.f32 %v4965_v56, %v1666_v0 }
 0x2be   : > { %v2024_v20 = vpop.permute.xlu0 %2023  ;;  %v1963_v24 = vpop.permute.xlu1 %1962 }
 0x2bf   : > { %v1826_v7 = vadd.f32 %v4966_v36, %v1805_v51  ;;  %v1708_v9 = vadd.f32 %v4967_v21, %v1687_v10 }
 0x2c1   : > { %v1847_v39 = vadd.f32 %v4968_v45, %v1826_v7  ;;  %v1729_v46 = vadd.f32 %v4969_v25, %v1708_v9 }
 0x2c2   : > { %v2038_v2 = vpop.permute.xlu0 %2037  ;;  %v1984_v59 = vpop.permute.xlu1 %1983 }
 0x2c3   : > { %v1868_v15 = vadd.f32 %v4720_v22, %v1847_v39  ;;  %v1750_v35 = vadd.f32 %v4970_v41, %v1729_v46 }
 0x2c5   : > { %v1889_v32 = vadd.f32 %v4745_v1, %v1868_v15  ;;  %v1764_v11 = vadd.f32 %v4971_v49, %v1750_v35 }
 0x2c6   : > { %v2059_v48 = vpop.permute.xlu0 %2058  ;;  %v2005_v5 = vpop.permute.xlu1 %2004 }
 0x2c7   : > { %v1903_v47 = vadd.f32 %v4761_v60, %v1889_v32  ;;  %v1785_v4 = vadd.f32 %v4972_v57, %v1764_v11 }
 0x2c9   : > { %v1924_v18 = vadd.f32 %v1919_v63, %v1903_v47  ;;  %v1806_v50 = vadd.f32 %v4973_v23, %v1785_v4 }
 0x2ca   : > { %v2080_v8 = vpop.permute.xlu0 %2079  ;;  %v2026_v62 = vpop.permute.xlu1 %2025 }
 0x2cb   : > { %v1827_v42 = vadd.f32 %v4974_v38, %v1806_v50  ;;  %v1945_v22 = vadd.f32 %v1940_v44, %v1924_v18 }
 0x2cd   : > { %v1848_v55 = vadd.f32 %v4975_v53, %v1827_v42  ;;  %v1966_v58 = vadd.f32 %v1961_v43, %v1945_v22 }
 0x2ce   : > { %v2101_v1 = vpop.permute.xlu0 %2100  ;;  %v2040_v28 = vpop.permute.xlu1 %2039 }
 0x2cf   : > { %v1869_v27 = vadd.f32 %v4777_v13, %v1848_v55  ;;  %v1987_v16 = vadd.f32 %v1982_v31, %v1966_v58 }
 0x2d1   : > { %v1890_v6 = vadd.f32 %v1886_v52, %v1869_v27  ;;  %v2008_v60 = vadd.f32 %v2003_v29, %v1987_v16 }
 0x2d2   : > { %v2122_v12 = vpop.permute.xlu0 %2121  ;;  %v2061_v37 = vpop.permute.xlu1 %2060 }
 0x2d3   : > { %v1904_v63 = vadd.f32 %v1900_v40, %v1890_v6  ;;  %v2029_v14 = vadd.f32 %v2024_v20, %v2008_v60 }
 0x2d5   : > { %v1925_v34 = vadd.f32 %v1921_v33, %v1904_v63  ;;  %v2043_v44 = vadd.f32 %v2038_v2, %v2029_v14 }
 0x2d6   : > { %v2143_v30 = vpop.permute.xlu0 %2142  ;;  %v2082_v19 = vpop.permute.xlu1 %2081 }
 0x2d7   : > { %v1946_v26 = vadd.f32 %v1942_v61, %v1925_v34  ;;  %v2064_v3 = vadd.f32 %v2059_v48, %v2043_v44 }
 0x2d9   : > { %v1967_v17 = vadd.f32 %v1963_v24, %v1946_v26  ;;  %v2085_v31 = vadd.f32 %v2080_v8, %v2064_v3 }
 0x2da   : > { %v2164_v54 = vpop.permute.xlu0 %2163  ;;  %v2103_v0 = vpop.permute.xlu1 %2102 }
 0x2db   : > { %v1988_v43 = vadd.f32 %v1984_v59, %v1967_v17  ;;  %v2106_v36 = vadd.f32 %v2101_v1, %v2085_v31 }
 0x2dd   : > { %v2009_v51 = vadd.f32 %v2005_v5, %v1988_v43  ;;  %v2127_v7 = vadd.f32 %v2122_v12, %v2106_v36 }
 0x2de   : > { %v2178_v56 = vpop.permute.xlu0 %2177  ;;  %v2124_v13 = vpop.permute.xlu1 %2123 }
 0x2df   : > { %v2030_v52 = vadd.f32 %v2026_v62, %v2009_v51  ;;  %v2148_v9 = vadd.f32 %v2143_v30, %v2127_v7 }
 0x2e1   : > { %v2044_v40 = vadd.f32 %v2040_v28, %v2030_v52  ;;  %v2169_v46 = vadd.f32 %v2164_v54, %v2148_v9 }
 0x2e2   : > { %v2199_v29 = vpop.permute.xlu0 %2198  ;;  %v2145_v10 = vpop.permute.xlu1 %2144 }
 0x2e3   : > { %v2065_v21 = vadd.f32 %v2061_v37, %v2044_v40  ;;  %v2183_v41 = vadd.f32 %v2178_v56, %v2169_v46 }
 0x2e5   : > { %v2086_v45 = vadd.f32 %v2082_v19, %v2065_v21  ;;  %v2204_v11 = vadd.f32 %v2199_v29, %v2183_v41 }
 0x2e6   : > { %v2220_v33 = vpop.permute.xlu0 %2219  ;;  %v2166_v20 = vpop.permute.xlu1 %2165 }
 0x2e7   : > { %v2107_v2 = vadd.f32 %v2103_v0, %v2086_v45  ;;  %v2225_v57 = vadd.f32 %v2220_v33, %v2204_v11 }
 0x2e9   : > { %v2128_v35 = vadd.f32 %v2124_v13, %v2107_v2  ;;  %v4977_v2 = vld [vmem:[#allocation10_spill] sm:$0xff] }
 0x2ea   : > { %v2241_v61 = vpop.permute.xlu0 %2240  ;;  %v2180_v24 = vpop.permute.xlu1 %2179 }
 0x2eb   : > { %v2149_v48 = vadd.f32 %v2145_v10, %v2128_v35  ;;  %v2246_v50 = vadd.f32 %v2241_v61, %v2225_v57 }
 0x2ed   : > { %v2170_v4 = vadd.f32 %v2166_v20, %v2149_v48 }
 0x2ee   : > { %v2262_v39 = vpop.permute.xlu0 %2261  ;;  %v2201_v25 = vpop.permute.xlu1 %2200 }
 0x2ef   : > { %v2184_v8 = vadd.f32 %v2180_v24, %v2170_v4  ;;  %v2267_v62 = vadd.f32 %v2262_v39, %v2246_v50 }
 0x2f1   : > { %v2205_v53 = vadd.f32 %v2201_v25, %v2184_v8  ;;  %v4976_v25 = vld [vmem:[#allocation9_spill] sm:$0xff] }
 0x2f2   : > { %v2283_v59 = vpop.permute.xlu0 %2282  ;;  %v2222_v15 = vpop.permute.xlu1 %2221 }
 0x2f3   : > { %v2288_v22 = vadd.f32 %v2283_v59, %v2267_v62  ;;  %v2226_v27 = vadd.f32 %v2222_v15, %v2205_v53  ;;  %v4978_v15 = vmov 0.0  }
 0x2f6   : > { %v2304_v32 = vpop.permute.xlu0 %2303  ;;  %v2243_v49 = vpop.permute.xlu1 %2242 }
 0x2f7   : > { %v2309_v55 = vadd.f32 %v2304_v32, %v2288_v22  ;;  %v2247_v12 = vadd.f32 %v2243_v49, %v2226_v27 }
 0x2fa   : > { %v2318_v5 = vpop.permute.xlu0 %2317  ;;  %v2264_v47 = vpop.permute.xlu1 %2263 }
 0x2fb   : > { %v2323_v28 = vadd.f32 %v2318_v5, %v2309_v55  ;;  %v2268_v63 = vadd.f32 %v2264_v47, %v2247_v12 }
 0x2fe   : > { %v2339_v18 = vpop.permute.xlu0 %2338  ;;  %v2285_v23 = vpop.permute.xlu1 %2284 }
 0x2ff   : > { %v2344_v16 = vadd.f32 %v2339_v18, %v2323_v28  ;;  %v2289_v19 = vadd.f32 %v2285_v23, %v2268_v63 }
 0x302   : > { %v2360_v38 = vpop.permute.xlu0 %2359  ;;  %v2306_v42 = vpop.permute.xlu1 %2305 }
 0x303   : > { %v2365_v37 = vadd.f32 %v2360_v38, %v2344_v16  ;;  %v2310_v17 = vadd.f32 %v2306_v42, %v2289_v19 }
 0x306   : > { %v2381_v58 = vpop.permute.xlu0 %2380  ;;  %v2320_v1 = vpop.permute.xlu1 %2319 }
 0x307   : > { %v2386_v34 = vadd.f32 %v2381_v58, %v2365_v37  ;;  %v2324_v43 = vadd.f32 %v2320_v1, %v2310_v17 }
 0x30a   : > { %v2402_v6 = vpop.permute.xlu0 %2401  ;;  %v2341_v60 = vpop.permute.xlu1 %2340 }
 0x30b   : > { %v2407_v26 = vadd.f32 %v2402_v6, %v2386_v34  ;;  %v2345_v51 = vadd.f32 %v2341_v60, %v2324_v43 }
 0x30e   : > { %v2423_v14 = vpop.permute.xlu0 %2422  ;;  %v2362_v30 = vpop.permute.xlu1 %2361 }
 0x30f   : > { %v2428_v44 = vadd.f32 %v2423_v14, %v2407_v26  ;;  %v2366_v31 = vadd.f32 %v2362_v30, %v2345_v51 }
 0x312   : > { %v2444_v54 = vpop.permute.xlu0 %2443  ;;  %v2383_v0 = vpop.permute.xlu1 %2382 }
 0x313   : > { %v2449_v3 = vadd.f32 %v2444_v54, %v2428_v44  ;;  %v2387_v29 = vadd.f32 %v2383_v0, %v2366_v31  ;;  %v2986_v44 = vmov 1966171168  }
 0x314   : > { %v2642_v54 = vunpack.c.l.s4 %v2986_v44 }
 0x315   : > { %v2451_v56 = vsub.f32 0.0, %v2449_v3 }
 0x316   : > { %v2404_v13 = vpop.permute.xlu1 %2403 }
 0x317   : > { %v2453_v52 = vmul.f32 1.442695, %v2451_v56  ;;  %v2408_v36 = vadd.f32 %v2404_v13, %v2387_v29 }
 0x319   : > { %2908 = vpow2.f32 %v2453_v52  ;;  %v2643_v52 = vunpack.c.0.s8 %v2642_v54 }
 0x31a   : > { %v2425_v10 = vpop.permute.xlu1 %2424 }
 0x31b   : > { %v2429_v40 = vadd.f32 %v2425_v10, %v2408_v36 }
 0x31e   : > { %v2446_v33 = vpop.permute.xlu1 %2445 }
 0x31f   : > { %v2450_v20 = vadd.f32 %v2446_v33, %v2429_v40 }
 0x321   : > { %v2452_v7 = vsub.f32 0.0, %v2450_v20 }
 0x323   : > { %v2455_v21 = vmul.f32 1.442695, %v2452_v7 }
 0x325   : > { %2910 = vpow2.f32 %v2455_v21  ;;  %v4979_v21 = vld [vmem:[#allocation8_spill] sm:$0xff] }
 0x326   : > { %v2909_v61 = vpop.eup %2908 }
 0x327   : > { %v2457_v24 = vadd.f32 1.0, %v2909_v61  ;;  %v2646_v61 = vsub.s32 %v2643_v52, %v4979_v21 }
 0x329   : > { %2912 = vrcp.f32 %v2457_v24 }
 0x332   : > { %v2911_v9 = vpop.eup %2910 }
 0x333   : > { %v2458_v45 = vadd.f32 1.0, %v2911_v9 }
 0x335   : > { %2914 = vrcp.f32 %v2458_v45 }
 0x336   : > { %v2913_v39 = vpop.eup %2912 }
 0x337   : > { %v2470_v46 = vrot.slane %v2913_v39, %v4976_v25  ;;  %v2463_v32 = vcombine.high %v2913_v39, %v4978_v15 }
 0x339   : > { %v2485_v59 = vrot.slane %v2470_v46, %v4977_v2  ;;  %v2478_v35 = vcombine.high %v2470_v46, %v4978_v15  ;;  %v2477_v11 = vrot.slane %v2463_v32, %v4976_v25  ;;  %v4980_v46 = vlaneseq }
 0x33b   : > { %v2508_v41 = vcombine.high %v2485_v59, %v4978_v15  ;;  %v2492_v49 = vrot.slane %v2478_v35, %v4977_v2  ;;  %v2500_v5 = vrot.slane %v2477_v11, %v4977_v2  ;;  %v2493_v38 = vcombine.high %v2477_v11, %v4978_v15 }
 0x33c   : > { %vm2658_vm3 = vcmp.lt.s32.totalorder %v4980_v46, 256 }
 0x33d   : > { %2562 = vrot.lane.b32.xlu0 %v2508_v41, %s2975_s3  ;;  %v2509_v4 = vcombine.high %v2492_v49, %v4978_v15  ;;  %v2510_v8 = vcombine.high %v2500_v5, %v4978_v15  ;;  %v2507_v22 = vrot.slane %v2493_v38, %v4977_v2 }
 0x33f   : > { %v2511_v55 = vcombine.high %v2507_v22, %v4978_v15 }
 0x341   : > { %2566 = vrot.lane.b32.xlu0 %v2492_v49, %s2973_s29 }
 0x342   : > { %v2915_v48 = vpop.eup %2914 }
 0x343   : > { %v2519_v47 = vrot.slane %v2915_v48, %v4976_v25  ;;  %v2512_v50 = vcombine.high %v2915_v48, %v4978_v15 }
 0x345   : > { %2574 = vrot.lane.b32.xlu0 %v2500_v5, %s2971_s27  ;;  %v2534_v57 = vrot.slane %v2519_v47, %v4977_v2  ;;  %v2527_v23 = vcombine.high %v2519_v47, %v4978_v15  ;;  %v2526_v42 = vrot.slane %v2512_v50, %v4976_v25 }
 0x347   : > { %v2557_v18 = vcombine.high %v2534_v57, %v4978_v15  ;;  %v2541_v62 = vrot.slane %v2527_v23, %v4977_v2  ;;  %v2549_v53 = vrot.slane %v2526_v42, %v4977_v2  ;;  %v2542_v28 = vcombine.high %v2526_v42, %v4978_v15 }
 0x349   : > { %2570 = vrot.lane.b32.xlu0 %v2509_v4, %s2974_s30  ;;  %2590 = vrot.lane.b32.xlu1 %v2557_v18, %s2975_s3  ;;  %v2558_v58 = vcombine.high %v2541_v62, %v4978_v15  ;;  %v2559_v1 = vcombine.high %v2549_v53, %v4978_v15  ;;  %v2556_v27 = vrot.slane %v2542_v28, %v4977_v2 }
 0x34b   : > { %v2560_v16 = vcombine.high %v2556_v27, %v4978_v15 }
 0x34d   : > { %2578 = vrot.lane.b32.xlu0 %v2510_v8, %s2969_s25  ;;  %2594 = vrot.lane.b32.xlu1 %v2541_v62, %s2973_s29 }
 0x351   : > { %2582 = vrot.lane.b32.xlu0 %v2507_v22, %s2972_s28  ;;  %2602 = vrot.lane.b32.xlu1 %v2549_v53, %s2971_s27 }
 0x355   : > { %2586 = vrot.lane.b32.xlu0 %v2511_v55, %s2970_s26  ;;  %2598 = vrot.lane.b32.xlu1 %v2558_v58, %s2974_s30 }
 0x359   : > { %2606 = vrot.lane.b32.xlu1 %v2559_v1, %s2969_s25  ;;  %s2753_s25 = sshll.u32 %s4986_s9, 1 }
 0x35d   : > { %2610 = vrot.lane.b32.xlu1 %v2556_v27, %s2972_s28  ;;  %s181_s28 = scalar_lea.vmem %s4880_s2, %s2753_s25 }
 0x361   : > { %2614 = vrot.lane.b32.xlu1 %v2560_v16, %s2970_s26 }
 0x3af   : > { %v2563_v6 = vpop.permute.xlu0 %2562 }
 0x3b0   : > { %v2618_v0 = vsel %vm2617_vm12, %v2485_v59, %v2563_v6 }
 0x3b3   : > { %v2567_v60 = vpop.permute.xlu0 %2566 }
 0x3b4   : > { %v2620_v3 = vsel %vm2619_vm13, %v2618_v0, %v2567_v60 }
 0x3b7   : > { %v2575_v12 = vpop.permute.xlu0 %2574 }
 0x3bb   : > { %v2591_v37 = vpop.permute.xlu1 %2590  ;;  %v2571_v63 = vpop.permute.xlu0 %2570 }
 0x3bc   : > { %v2631_v43 = vsel %vm2617_vm12, %v2534_v57, %v2591_v37  ;;  %v2622_v56 = vsel %vm2621_vm14, %v2620_v3, %v2571_v63 }
 0x3bd   : > { %v2624_v29 = vsel %vm2623_vm15, %v2622_v56, %v2575_v12 }
 0x3bf   : > { %v2595_v34 = vpop.permute.xlu1 %2594  ;;  %v2579_v30 = vpop.permute.xlu0 %2578 }
 0x3c0   : > { %v2632_v51 = vsel %vm2619_vm13, %v2631_v43, %v2595_v34  ;;  %v2626_v40 = vsel %vm2625_vm0, %v2624_v29, %v2579_v30 }
 0x3c3   : > { %v2603_v14 = vpop.permute.xlu1 %2602  ;;  %v2583_v26 = vpop.permute.xlu0 %2582 }
 0x3c4   : > { %v2628_v20 = vsel %vm2627_vm1, %v2626_v40, %v2583_v26 }
 0x3c7   : > { %v2599_v19 = vpop.permute.xlu1 %2598  ;;  %v2587_v10 = vpop.permute.xlu0 %2586 }
 0x3c8   : > { %v2633_v13 = vsel %vm2621_vm14, %v2632_v51, %v2599_v19  ;;  %v2630_v9 = vsel %vm2629_vm2, %v2628_v20, %v2587_v10 }
 0x3c9   : > { %v2634_v36 = vsel %vm2623_vm15, %v2633_v13, %v2603_v14 }
 0x3cb   : > { %v2607_v17 = vpop.permute.xlu1 %2606 }
 0x3cc   : > { %v2635_v33 = vsel %vm2625_vm0, %v2634_v36, %v2607_v17 }
 0x3cf   : > { %v2611_v31 = vpop.permute.xlu1 %2610 }
 0x3d0   : > { %v2636_v7 = vsel %vm2627_vm1, %v2635_v33, %v2611_v31 }
 0x3d3   : > { %v2615_v24 = vpop.permute.xlu1 %2614 }
 0x3d4   : > { %v2637_v45 = vsel %vm2629_vm2, %v2636_v7, %v2615_v24 }
 0x3d5   : > { %v2640_v39 = vcombine.low %v2630_v9, %v2637_v45 }
 0x3d7   : > { %v2647_v25 = vrot.slane %v2640_v39, %v2646_v61 }
 0x3d9   : > { %v2654_v2 = vrot.slane %v2647_v25, %v2646_v61 }
 0x3db   : > { %2660 = vst.msk [vmem:[%s181_s28] sm:$0x3] %vm2658_vm3, %v2654_v2 }
 0x3dc PF: > { %s13_s11 = sadd.s32 1, %s2966_s11   ;;  %s4981_s9 = smov %s2962_s10 }
 0x3dd   : > { %p10_p2 = scmp.ge.s32.totalorder %s13_s11, 4   ;;  %s4982_s10 = smov %s4984_s13 }
 0x3df   :  { %12 = sbr.rel (!%p10_p2) target bundleno = 2 (0x2), region = 64 }
 0x3e4   :  { %2680 = vsyncpa [#allocation6], 1 }
 0x3e5   :  { %2682 = vsyncpa [#allocation6 + $0x1], 1 }

</bundles_post_ra>
